<compile_context>
chip_gen: v7x
topology: tpu7x:2x2x1
jax: 0.10.0
libtpu: 0.0.40
codegen_flags: <defaults>
</compile_context>

<pallas_src>
import numpy as np
import jax
import jax.numpy as jnp
from jax.experimental import pallas as pl
from jax.experimental.pallas import tpu as pltpu

# ---------------- hyper-parameters (small, consistent with the module) -------
BATCH = 4
INPUT_SIZE = 32        # N (sequence length)
N_CHANNELS = 4         # C
OUTPUT_SIZE = 2        # must be 2 (real/imag)
POLY_DEGREE = 3        # D
OUT_WINDOW = 10        # W
BN_EPS = 1e-5
LANE_PAD = 128         # per poly-feature block lane width (one vreg)


# ---------------------------- Pallas kernel ----------------------------------
def lin_poly_leakage_kernel(x_ref,    # (B, 2*N*C)  native-layout input, flattened
                            w1_ref,   # (2*N*C, 256) fused real|imag banded filters
                            w2_ref,   # (6*128 + 8, 4*C) folded coeff*out weights
                                      #   cols 0..2C-1  : interleaved outputs
                                      #   cols 2C..4C-1 : pair-swapped copy
                                      #   row 6*128     : gamma (interleaved)
                                      #   row 6*128 + 1 : beta  (interleaved)
                            out_ref): # (B, 2*C) interleaved (r0,i0,r1,i1,...)
    B = x_ref.shape[0]
    C2 = out_ref.shape[1]                       # 2 * C
    D = POLY_DEGREE
    KF = 2 * D * LANE_PAD                       # contracting dim of folded dot
    prec = jax.lax.Precision.HIGHEST            # DEFAULT (bf16) misses tolerance

    # --- Stage 1: both sliding-window filter banks in ONE banded MXU matmul --
    s1 = jnp.dot(x_ref[...], w1_ref[...], precision=prec,
                 preferred_element_type=jnp.float32)            # (B, 256)
    fr = s1[:, 0:LANE_PAD]               # lanes 0..W*C-1 = f_real, rest exactly 0
    fi = s1[:, LANE_PAD:2 * LANE_PAD]    # lanes 0..W*C-1 = f_imag, rest exactly 0

    # --- Stage 2: polynomial features, six vreg-aligned 128-lane blocks ------
    blocks = []
    frp, fip = fr, fi                    # running powers f^d
    for d in range(D):
        xp = frp + fip                   # f_r^(d+1) + f_i^(d+1)
        blocks.append(xp * fr)           # block 2d   : real features
        blocks.append(xp * fi)           # block 2d+1 : imag features
        if d + 1 < D:
            frp = frp * fr
            fip = fip * fi
    feat = jnp.concatenate(blocks, axis=-1)                     # (B, 6*128)

    # --- Stages 2+3 folded: ONE dot, interleaved + pair-swapped columns ------
    yy = jnp.dot(feat, w2_ref[0:KF, :], precision=prec,
                 preferred_element_type=jnp.float32)            # (B, 4*C)
    y = yy[:, 0:C2]                      # interleaved outputs (r0,i0,r1,i1,...)
    yp = yy[:, C2:2 * C2]                # yp[b, j] == y[b, j^1] (real/imag partner)

    gamma = w2_ref[KF:KF + 1, 0:C2]                              # (1, 2C)
    beta = w2_ref[KF + 1:KF + 2, 0:C2]

    # --- Stage 4: BatchNorm1d(C), training-mode stats over (B, real/imag) ----
    inv = 1.0 / (2.0 * B)
    mean = jnp.sum(y + yp, axis=0, keepdims=True) * inv          # per-channel mean,
    dev = y - mean                                               #  broadcast to both lanes
    devp = yp - mean                                             # == dev pair-swapped
    var = jnp.sum(dev * dev + devp * devp, axis=0, keepdims=True) * inv
    scale = jax.lax.rsqrt(var + BN_EPS) * gamma
    out_ref[...] = dev * scale + beta


# ------------------------------ wrapper ---------------------------------------
@jax.jit
def lin_poly_leakage(x, kp):
    """x: (B, N, C, 2) float32 (native PyTorch layout).  Returns (B, C, 2)."""
    B, N, C, two = x.shape
    assert two == 2 and N == INPUT_SIZE and C == N_CHANNELS
    x_flat = x.reshape(B, N * C * 2).astype(jnp.float32)         # contiguous: free
    vmem = lambda: pl.BlockSpec(memory_space=pltpu.MemorySpace.VMEM)
    y = pl.pallas_call(
        lin_poly_leakage_kernel,
        out_shape=jax.ShapeDtypeStruct((B, 2 * C), jnp.float32),
        in_specs=[vmem(), vmem(), vmem()],
        out_specs=vmem(),
    )(x_flat, kp["w1"], kp["w2"])
    return y.reshape(B, C, 2)                                    # contiguous: free


# ------------------------ parameter construction ------------------------------
def make_params(key):
    """Deterministic parameters in PyTorch-equivalent layout."""
    C, D, W = N_CHANNELS, POLY_DEGREE, OUT_WINDOW
    L = INPUT_SIZE - OUT_WINDOW + 1
    ks = jax.random.split(key, 5)
    s = 0.1
    return {
        # filter_layers_in[c].filt_{real,imag}.weight -> (1, L) each
        "w_in_real": jax.random.normal(ks[0], (C, L), jnp.float32) * s,
        "w_in_imag": jax.random.normal(ks[1], (C, L), jnp.float32) * s,
        # coeff_layers[c].weight -> (output_size, 2*(C-1)*D)
        "w_coeff": jax.random.normal(ks[2], (C, OUTPUT_SIZE, 2 * (C - 1) * D),
                                     jnp.float32) * s,
        # filter_layers_out[c].filt_{real,imag}.weight -> (1, W) each
        "w_out_real": jax.random.normal(ks[3], (C, W), jnp.float32) * s,
        "w_out_imag": jax.random.normal(ks[4], (C, W), jnp.float32) * s,
        # BatchNorm1d default init
        "gamma": jnp.ones((C,), jnp.float32),
        "beta": jnp.zeros((C,), jnp.float32),
    }


def prepare_kernel_params(params):
    """One-time host-side repacking of PyTorch-layout params into the kernel's
    two matmul operands.  Runs ONCE, outside the jitted forward path.  The
    stage-2/3 fold is computed in float64 then cast (per review guidance)."""
    C, D, W, N, O = N_CHANNELS, POLY_DEGREE, OUT_WINDOW, INPUT_SIZE, OUTPUT_SIZE
    assert O == 2, "LinPolyLeakage forward is only shape-consistent for output_size == 2"
    L = N - W + 1
    P = LANE_PAD

    w_in_r = np.asarray(params["w_in_real"], np.float64)     # (C, L)
    w_in_i = np.asarray(params["w_in_imag"], np.float64)
    w_coeff = np.asarray(params["w_coeff"], np.float64)      # (C, 2, 2*(C-1)*D)
    w_out_r = np.asarray(params["w_out_real"], np.float64)   # (C, W)
    w_out_i = np.asarray(params["w_out_imag"], np.float64)
    gamma = np.asarray(params["gamma"], np.float64)
    beta = np.asarray(params["beta"], np.float64)

    # Stage 1 fused banded weight (2*N*C, 2*P): real filters in cols [0, W*C),
    # imag filters in cols [P, P + W*C); all other columns are zero so the
    # unused pad lanes of the stage-1 result are exactly zero.
    w1 = np.zeros((2 * N * C, 2 * P), np.float64)
    for c in range(C):
        for w in range(W):
            for l in range(L):
                n = w + l
                w1[(n * C + c) * 2 + 0, w * C + c] = w_in_r[c, l]
                w1[(n * C + c) * 2 + 1, P + w * C + c] = w_in_i[c, l]

    # Folded stage-2/3 weight (6*P, 2*C): row block k = 2*d + part holds the
    # degree-(d+1) real(part=0)/imag(part=1) poly feature at lane w*C + x;
    # column 2c / 2c+1 is channel c's real / imag output.  Entry =
    # coeff weight (channel exclusion as zeros) * output-window filter weight.
    wfold = np.zeros((2 * D * P, 2 * C), np.float64)
    for c in range(C):
        others = [idx for idx in range(C) if idx != c]
        for pos, xch in enumerate(others):
            for d in range(D):
                for w in range(W):
                    r_row = (2 * d) * P + w * C + xch
                    i_row = (2 * d + 1) * P + w * C + xch
                    wfold[r_row, 2 * c + 0] = w_coeff[c, 0, pos * D + d] * w_out_r[c, w]
                    wfold[r_row, 2 * c + 1] = w_coeff[c, 1, pos * D + d] * w_out_i[c, w]
                    wfold[i_row, 2 * c + 0] = w_coeff[c, 0, (C - 1) * D + pos * D + d] * w_out_r[c, w]
                    wfold[i_row, 2 * c + 1] = w_coeff[c, 1, (C - 1) * D + pos * D + d] * w_out_i[c, w]

    # Pack into a single operand: interleaved output cols, a pair-swapped copy
    # (so BN needs no cross-lane ops), and the BN affine rows.
    kf = 2 * D * P
    swap = [j ^ 1 for j in range(2 * C)]
    w2 = np.zeros((kf + 8, 4 * C), np.float64)
    w2[:kf, 0:2 * C] = wfold
    w2[:kf, 2 * C:4 * C] = wfold[:, swap]
    w2[kf, 0:2 * C] = np.repeat(gamma, 2)      # [g0,g0,g1,g1,...]
    w2[kf + 1, 0:2 * C] = np.repeat(beta, 2)

    return {"w1": jnp.asarray(w1.astype(np.float32)),
            "w2": jnp.asarray(w2.astype(np.float32))}


# ----------------------- pure-numpy reference (PyTorch loops) -----------------
def reference_forward(x, params):
    x = np.asarray(x, np.float32)
    p = {k: np.asarray(v, np.float32) for k, v in params.items()}
    B, N, C, _ = x.shape
    W, D = OUT_WINDOW, POLY_DEGREE
    xr0, xi0 = x[..., 0], x[..., 1]
    filtered_real = np.zeros((B, W, C, D), np.float32)
    filtered_imag = np.zeros((B, W, C, D), np.float32)
    for c in range(C):
        x_real, x_imag = xr0[:, :, c], xi0[:, :, c]
        for wid in range(W):
            fr = (x_real[:, wid:N - W + wid + 1] @ p["w_in_real"][c])[:, None]
            fi = (x_imag[:, wid:N - W + wid + 1] @ p["w_in_imag"][c])[:, None]
            out_r, out_i = [], []
            for d in range(1, D + 1):
                x_pow = fr ** d + fi ** d
                out_r.append(x_pow * fr)
                out_i.append(x_pow * fi)
            filtered_real[:, wid, c, :] = np.concatenate(out_r, axis=-1)
            filtered_imag[:, wid, c, :] = np.concatenate(out_i, axis=-1)
    nonlin_real = np.zeros((B, W, C), np.float32)
    nonlin_imag = np.zeros((B, W, C), np.float32)
    for wid in range(W):
        for c in range(C):
            fr_c = np.concatenate([filtered_real[:, wid, idx, :]
                                   for idx in range(C) if idx != c], axis=-1)
            fi_c = np.concatenate([filtered_imag[:, wid, idx, :]
                                   for idx in range(C) if idx != c], axis=-1)
            total = np.concatenate([fr_c, fi_c], axis=-1)
            c_out = total @ p["w_coeff"][c].T
            nonlin_real[:, wid, c] = c_out[:, 0]
            nonlin_imag[:, wid, c] = c_out[:, 1]
    output = np.zeros((B, C, 2), np.float32)
    for c in range(C):
        output[:, c, 0] = nonlin_real[:, :, c] @ p["w_out_real"][c]
        output[:, c, 1] = nonlin_imag[:, :, c] @ p["w_out_imag"][c]
    mean = output.mean(axis=(0, 2), keepdims=True)
    var = output.var(axis=(0, 2), keepdims=True)       # biased, BN training mode
    gamma = p["gamma"].reshape(1, C, 1)
    beta = p["beta"].reshape(1, C, 1)
    return (output - mean) / np.sqrt(var + BN_EPS) * gamma + beta


# --------------------------------- main ---------------------------------------
if __name__ == "__main__":
    key = jax.random.PRNGKey(0)
    kx, kparam_key = jax.random.split(key)
    x = jax.random.normal(kx, (BATCH, INPUT_SIZE, N_CHANNELS, 2), jnp.float32)

    params = make_params(kparam_key)
    kernel_params = prepare_kernel_params(params)   # built once, outside hot path

    out = jax.block_until_ready(lin_poly_leakage(x, kernel_params))

    ref = reference_forward(x, params)
    np.testing.assert_allclose(np.asarray(out), ref, rtol=2e-4, atol=1e-4)
    print("KERNEL_OK")
</pallas_src>

<mosaic_0001>
module attributes {stable_mosaic.version = 11 : i64} {
  func.func @lin_poly_leakage_kernel(%arg0: memref<4x256xf32, #tpu.memory_space<vmem>>, %arg1: memref<256x256xf32, #tpu.memory_space<vmem>>, %arg2: memref<776x16xf32, #tpu.memory_space<vmem>>, %arg3: memref<4x8xf32, #tpu.memory_space<vmem>>) attributes {dimension_semantics = [], scalar_prefetch = 0 : i64, scratch_operands = 0 : i64, tpu.core_type = #tpu.core_type<tc>} {
    %c0 = arith.constant 0 : index
    %c0_0 = arith.constant 0 : index
    %0 = vector.load %arg0[%c0, %c0_0] : memref<4x256xf32, #tpu.memory_space<vmem>>, vector<4x256xf32>
    %c0_1 = arith.constant 0 : index
    %c0_2 = arith.constant 0 : index
    %1 = vector.load %arg1[%c0_1, %c0_2] : memref<256x256xf32, #tpu.memory_space<vmem>>, vector<256x256xf32>
    %cst = arith.constant dense<0.000000e+00> : vector<4x256xf32>
    %2 = tpu.matmul %0, %1, %cst {dimension_numbers = #tpu.dot_dimension_numbers<[1], [0], [0], [1], [0, 0, 1, 1], [], []>, precision = #tpu.contract_precision<fp32>} : vector<4x256xf32>, vector<256x256xf32>, vector<4x256xf32> -> vector<4x256xf32>
    %3 = vector.extract_strided_slice %2 {offsets = [0, 0], sizes = [4, 128], strides = [1, 1]} : vector<4x256xf32> to vector<4x128xf32>
    %4 = vector.extract_strided_slice %2 {offsets = [0, 128], sizes = [4, 128], strides = [1, 1]} : vector<4x256xf32> to vector<4x128xf32>
    %5 = arith.addf %3, %4 : vector<4x128xf32>
    %6 = arith.mulf %5, %3 : vector<4x128xf32>
    %7 = arith.mulf %5, %4 : vector<4x128xf32>
    %8 = arith.mulf %3, %3 : vector<4x128xf32>
    %9 = arith.mulf %4, %4 : vector<4x128xf32>
    %10 = arith.addf %8, %9 : vector<4x128xf32>
    %11 = arith.mulf %10, %3 : vector<4x128xf32>
    %12 = arith.mulf %10, %4 : vector<4x128xf32>
    %13 = arith.mulf %8, %3 : vector<4x128xf32>
    %14 = arith.mulf %9, %4 : vector<4x128xf32>
    %15 = arith.addf %13, %14 : vector<4x128xf32>
    %16 = arith.mulf %15, %3 : vector<4x128xf32>
    %17 = arith.mulf %15, %4 : vector<4x128xf32>
    %18 = tpu.concatenate %6, %7, %11, %12, %16, %17 in 1 : vector<4x128xf32>, vector<4x128xf32>, vector<4x128xf32>, vector<4x128xf32>, vector<4x128xf32>, vector<4x128xf32> -> vector<4x768xf32>
    %c0_3 = arith.constant 0 : index
    %c0_4 = arith.constant 0 : index
    %19 = vector.load %arg2[%c0_3, %c0_4] : memref<776x16xf32, #tpu.memory_space<vmem>>, vector<768x16xf32>
    %cst_5 = arith.constant dense<0.000000e+00> : vector<4x16xf32>
    %20 = tpu.matmul %18, %19, %cst_5 {dimension_numbers = #tpu.dot_dimension_numbers<[1], [0], [0], [1], [0, 0, 1, 1], [], []>, precision = #tpu.contract_precision<fp32>} : vector<4x768xf32>, vector<768x16xf32>, vector<4x16xf32> -> vector<4x16xf32>
    %21 = vector.extract_strided_slice %20 {offsets = [0, 0], sizes = [4, 8], strides = [1, 1]} : vector<4x16xf32> to vector<4x8xf32>
    %22 = vector.extract_strided_slice %20 {offsets = [0, 8], sizes = [4, 8], strides = [1, 1]} : vector<4x16xf32> to vector<4x8xf32>
    %c768 = arith.constant 768 : index
    %c0_6 = arith.constant 0 : index
    %23 = vector.load %arg2[%c768, %c0_6] : memref<776x16xf32, #tpu.memory_space<vmem>>, vector<1x8xf32>
    %c769 = arith.constant 769 : index
    %c0_7 = arith.constant 0 : index
    %24 = vector.load %arg2[%c769, %c0_7] : memref<776x16xf32, #tpu.memory_space<vmem>>, vector<1x8xf32>
    %25 = arith.addf %21, %22 : vector<4x8xf32>
    %cst_8 = arith.constant dense<0.000000e+00> : vector<8xf32>
    %26 = vector.multi_reduction <add>, %25, %cst_8 [0] : vector<4x8xf32> to vector<8xf32>
    %27 = vector.shape_cast %26 : vector<8xf32> to vector<1x8xf32>
    %cst_9 = arith.constant 1.250000e-01 : f32
    %28 = vector.broadcast %cst_9 : f32 to vector<1x8xf32>
    %29 = arith.mulf %27, %28 : vector<1x8xf32>
    %30 = vector.broadcast %29 : vector<1x8xf32> to vector<4x8xf32>
    %31 = arith.subf %21, %30 : vector<4x8xf32>
    %32 = vector.broadcast %29 : vector<1x8xf32> to vector<4x8xf32>
    %33 = arith.subf %22, %32 : vector<4x8xf32>
    %34 = arith.mulf %31, %31 : vector<4x8xf32>
    %35 = arith.mulf %33, %33 : vector<4x8xf32>
    %36 = arith.addf %34, %35 : vector<4x8xf32>
    %cst_10 = arith.constant dense<0.000000e+00> : vector<8xf32>
    %37 = vector.multi_reduction <add>, %36, %cst_10 [0] : vector<4x8xf32> to vector<8xf32>
    %38 = vector.shape_cast %37 : vector<8xf32> to vector<1x8xf32>
    %cst_11 = arith.constant 1.250000e-01 : f32
    %39 = vector.broadcast %cst_11 : f32 to vector<1x8xf32>
    %40 = arith.mulf %38, %39 : vector<1x8xf32>
    %cst_12 = arith.constant 9.99999974E-6 : f32
    %41 = vector.broadcast %cst_12 : f32 to vector<1x8xf32>
    %42 = arith.addf %40, %41 : vector<1x8xf32>
    %43 = math.rsqrt %42 : vector<1x8xf32>
    %44 = arith.mulf %43, %23 : vector<1x8xf32>
    %45 = vector.broadcast %44 : vector<1x8xf32> to vector<4x8xf32>
    %46 = arith.mulf %31, %45 : vector<4x8xf32>
    %47 = vector.broadcast %24 : vector<1x8xf32> to vector<4x8xf32>
    %48 = arith.addf %46, %47 : vector<4x8xf32>
    %c0_13 = arith.constant 0 : index
    %c0_14 = arith.constant 0 : index
    %49 = vector.load %arg3[%c0_13, %c0_14] : memref<4x8xf32, #tpu.memory_space<vmem>>, vector<4x8xf32>
    tpu.vector_store %arg3[%c0_13, %c0_14], %48 {strides = array<i32>} : memref<4x8xf32, #tpu.memory_space<vmem>>, vector<4x8xf32>,
    return
  }
}

</mosaic_0001>

<bundles_post_ra>
// kernel: lin_poly_leakage.1
= control target key start
LH: loop header
LB: loop body
LE: loop exit
PB: predicated region body
PF: predicated region fallthrough
CT: control target
= control target key end

     0   :  { %s5722_s22 = smov 120   ;;  %vm4068_vm0 = vcmask 60416   ;;  %s5723_s23 = smov 8   ;;  %s8791_s1 = inlined_call_operand.vmem [shape: f32[256,256], index: 1, kind: input, shape index: {}]   ;;  %s8792_s0 = inlined_call_operand.vmem [shape: f32[4,256], index: 0, kind: input, shape index: {}]   ;;  %s8793_s2 = inlined_call_operand.vmem [shape: f32[776,16], index: 2, kind: input, shape index: {}]   ;;  %s8794_s3 = inlined_call_operand.vmem [shape: f32[4,8], index: 3, kind: output, shape index: {}]  }
   0x1   :  { %v5747_v0 = vld [vmem:[%s8791_s1 + $0x8] sm:$0xff]  ;;  %v5752_v1 = vld [vmem:[%s8791_s1 + $0x18] sm:$0xff]  ;;  %v5757_v2 = vld [vmem:[%s8791_s1] sm:$0xff] }
   0x2   :  { %v82_v3 = vand.u32 4294901760, %v5747_v0  ;;  %v86_v4 = vand.u32 4294901760, %v5752_v1  ;;  %v5764_v5 = vld [vmem:[%s8791_s1 + $0x10] sm:$0xff]  ;;  %v84_v6 = vand.u32 4294901760, %v5757_v2  ;;  %v5770_v7 = vld [vmem:[%s8791_s1 + $0x28] sm:$0xff]  ;;  %v5775_v8 = vld [vmem:[%s8791_s1 + $0x38] sm:$0xff] }
   0x3   :  { %v88_v9 = vand.u32 4294901760, %v5764_v5  ;;  %v90_v10 = vand.u32 4294901760, %v5770_v7  ;;  %v94_v11 = vand.u32 4294901760, %v5775_v8  ;;  %v5783_v12 = vld [vmem:[%s8791_s1 + $0x20] sm:$0xff]  ;;  %v5788_v13 = vld [vmem:[%s8791_s1 + $0x30] sm:$0xff]  ;;  %v5793_v14 = vld [vmem:[%s8791_s1 + $0x48] sm:$0xff] }
   0x4   :  { %v5799_v15 = vpack.c.bf16 %v86_v4, %v82_v3  ;;  %v5804_v16 = vld [vmem:[%s8791_s1 + $0x58] sm:$0xff]  ;;  %v5809_v17 = vld [vmem:[%s8791_s1 + $0x40] sm:$0xff]  ;;  %v5814_v18 = vld [vmem:[%s8791_s1 + $0x50] sm:$0xff]  ;;  %v92_v22 = vand.u32 4294901760, %v5783_v12  ;;  %v8800_v23 = vand.u32 4294901760, %v5788_v13  ;;  %v8799_v24 = vand.u32 4294901760, %v5793_v14 }
   0x5   :  { %v5820_v19 = vpack.c.bf16 %v88_v9, %v84_v6  ;;  %v5826_v20 = vpack.c.bf16 %v94_v11, %v90_v10  ;;  %v5831_v21 = vld [vmem:[%s8791_s1 + $0x68] sm:$0xff]  ;;  %v8798_v25 = vand.u32 4294901760, %v5804_v16  ;;  %v8797_v26 = vand.u32 4294901760, %v5809_v17  ;;  %v5844_v28 = vld [vmem:[%s8791_s1 + $0x78] sm:$0xff]  ;;  %v5855_v31 = vld [vmem:[%s8791_s1 + $0x60] sm:$0xff] }
   0x6   :  { %9280 = vst [vmem:[#allocation2_spill] sm:$0xff] %v5799_v15  ;;  %4748 = vmatprep.subr.bf16.mxu0 %v5799_v15  ;;  %v8796_v27 = vand.u32 4294901760, %v5814_v18  ;;  %v5849_v29 = vpack.c.bf16 %v8800_v23, %v92_v22  ;;  %v8795_v30 = vand.u32 4294901760, %v5831_v21  ;;  %v5860_v32 = vld [vmem:[%s8791_s1 + $0x70] sm:$0xff]  ;;  %v5871_v34 = vld [vmem:[%s8791_s1 + $0x88] sm:$0xff]  ;;  %v5876_v35 = vld [vmem:[%s8791_s1 + $0x98] sm:$0xff]  ;;  %v5990_v23 = vsub.f32 %v5783_v12, %v92_v22 }
   0x7   :  { %9281 = vst [vmem:[#allocation3_spill] sm:$0xff] %v5820_v19  ;;  %9282 = vst [vmem:[#allocation4_spill] sm:$0xff] %v5826_v20  ;;  %4750 = vmatpush1.bf16.msra.mxu0 %v5820_v19  ;;  %v5866_v33 = vpack.c.bf16 %v8798_v25, %v8799_v24  ;;  %v110_v36 = vand.u32 4294901760, %v5844_v28  ;;  %v108_v38 = vand.u32 4294901760, %v5855_v31  ;;  %v112_v39 = vand.u32 4294901760, %v5860_v32  ;;  %v5898_v43 = vld [vmem:[%s8791_s1 + $0x80] sm:$0xff] }
   0x8   :  { %4752 = vmatprep.subr.bf16.mxu0 %v5826_v20  ;;  %9283 = vst [vmem:[#allocation5_spill] sm:$0xff] %v5849_v29  ;;  %v5884_v37 = vpack.c.bf16 %v8796_v27, %v8797_v26  ;;  %v114_v41 = vand.u32 4294901760, %v5871_v34  ;;  %v118_v42 = vand.u32 4294901760, %v5876_v35  ;;  %v5903_v44 = vld [vmem:[%s8791_s1 + $0x90] sm:$0xff]  ;;  %v5908_v45 = vld [vmem:[%s8791_s1 + $0xa8] sm:$0xff]  ;;  %v5913_v46 = vld [vmem:[%s8791_s1 + $0xb8] sm:$0xff]  ;;  %v5952_v27 = vsub.f32 %v5747_v0, %v82_v3 }
   0x9   :  { %9284 = vst [vmem:[#allocation6_spill] sm:$0xff] %v5866_v33  ;;  %v5891_v40 = vpack.c.bf16 %v110_v36, %v8795_v30  ;;  %v5916_v47 = vpack.c.bf16 %v112_v39, %v108_v38  ;;  %v116_v48 = vand.u32 4294901760, %v5898_v43  ;;  %v120_v49 = vand.u32 4294901760, %v5903_v44  ;;  %v35_v53 = vld [vmem:[%s8791_s1 + $0xa0] sm:$0xff]  ;;  %v37_v54 = vld [vmem:[%s8791_s1 + $0xb0] sm:$0xff]  ;;  %v40_v55 = vld [vmem:[%s8791_s1 + $0xc8] sm:$0xff] }
   0xa   :  { %9285 = vst [vmem:[#allocation7_spill] sm:$0xff] %v5884_v37  ;;  %v5921_v50 = vpack.c.bf16 %v118_v42, %v114_v41  ;;  %v122_v51 = vand.u32 4294901760, %v5908_v45  ;;  %v126_v52 = vand.u32 4294901760, %v5913_v46  ;;  %v42_v56 = vld [vmem:[%s8791_s1 + $0xd8] sm:$0xff]  ;;  %v124_v58 = vand.u32 4294901760, %v35_v53  ;;  %v39_v63 = vld [vmem:[%s8791_s1 + $0xc0] sm:$0xff] }
   0xb   :  { %4754 = vmatpush1.bf16.msra.mxu0 %v5849_v29  ;;  %9286 = vst [vmem:[#allocation8_spill] sm:$0xff] %v5891_v40  ;;  %9287 = vst [vmem:[#allocation9_spill] sm:$0xff] %v5916_v47  ;;  %v5938_v57 = vpack.c.bf16 %v120_v49, %v116_v48  ;;  %v128_v59 = vand.u32 4294901760, %v37_v54  ;;  %v130_v61 = vand.u32 4294901760, %v40_v55  ;;  %v134_v62 = vand.u32 4294901760, %v42_v56  ;;  %v41_v30 = vld [vmem:[%s8791_s1 + $0xd0] sm:$0xff] }
   0xc   :  { %4756 = vmatprep.subr.bf16.mxu0 %v5866_v33  ;;  %9288 = vst [vmem:[#allocation10_spill] sm:$0xff] %v5921_v50  ;;  %v5941_v60 = vpack.c.bf16 %v126_v52, %v122_v51  ;;  %v5957_v26 = vsub.f32 %v5752_v1, %v86_v4  ;;  %v5962_v25 = vld [vmem:[%s8791_s1 + $0xe8] sm:$0xff]  ;;  %v5967_v24 = vld [vmem:[%s8791_s1 + $0xf8] sm:$0xff]  ;;  %v5972_v0 = vsub.f32 %v5757_v2, %v84_v6  ;;  %9292 = vst [vmem:[#allocation14_spill] sm:$0xff] %v5990_v23 }
   0xd   :  { %9289 = vst [vmem:[#allocation11_spill] sm:$0xff] %v5938_v57  ;;  %v5977_v1 = vsub.f32 %v5764_v5, %v88_v9  ;;  %v5982_v3 = vsub.f32 %v5770_v7, %v90_v10  ;;  %v5987_v4 = vsub.f32 %v5775_v8, %v94_v11  ;;  %v5993_v2 = vpack.c.bf16 %v128_v59, %v124_v58  ;;  %v43_v11 = vld [vmem:[%s8791_s1 + $0xe0] sm:$0xff]  ;;  %v45_v12 = vld [vmem:[%s8791_s1 + $0xf0] sm:$0xff] }
   0xe   :  { %9290 = vst [vmem:[#allocation12_spill] sm:$0xff] %v5941_v60  ;;  %v132_v6 = vand.u32 4294901760, %v39_v63  ;;  %v136_v5 = vand.u32 4294901760, %v41_v30  ;;  %v9294_v9 = vand.u32 4294901760, %v5788_v13  ;;  %v6001_v7 = vpack.c.bf16 %v134_v62, %v130_v61 }
   0xf   :  { %4758 = vmatpush1.bf16.msra.mxu0 %v5884_v37  ;;  %9291 = vst [vmem:[#allocation13_spill] sm:$0xff] %v5987_v4  ;;  %9293 = vst [vmem:[#allocation15_spill] sm:$0xff] %v5993_v2  ;;  %v138_v8 = vand.u32 4294901760, %v5962_v25  ;;  %v142_v10 = vand.u32 4294901760, %v5967_v24  ;;  %v9297_v22 = vand.u32 4294901760, %v5793_v14  ;;  %v140_v29 = vand.u32 4294901760, %v43_v11 }
  0x10   :  { %4760 = vmatprep.subr.bf16.mxu0 %v5891_v40  ;;  %9296 = vst [vmem:[#allocation17_spill] sm:$0xff] %v6001_v7  ;;  %v9301_v40 = vand.u32 4294901760, %v5814_v18  ;;  %v6055_v33 = vpack.c.bf16 %v136_v5, %v132_v6  ;;  %v144_v20 = vand.u32 4294901760, %v45_v12 }
  0x12   :  { %v6029_v37 = vsub.f32 %v5814_v18, %v9301_v40  ;;  %v6049_v18 = vsub.f32 %v5860_v32, %v112_v39  ;;  %v6052_v40 = vsub.f32 %v5871_v34, %v114_v41  ;;  %9306 = vst [vmem:[#allocation22_spill] sm:$0xff] %v6055_v33  ;;  %v47_v32 = vld [vmem:[%s8791_s1 + $0x100] sm:$0xff]  ;;  %v49_v34 = vld [vmem:[%s8791_s1 + $0x110] sm:$0xff]  ;;  %v6076_v39 = vsub.f32 %v5908_v45, %v122_v51 }
  0x13   :  { %4762 = vmatpush1.bf16.msra.mxu0 %v5916_v47  ;;  %v6079_v41 = vsub.f32 %v5913_v46, %v126_v52  ;;  %v51_v45 = vld [vmem:[%s8791_s1 + $0x120] sm:$0xff]  ;;  %v53_v46 = vld [vmem:[%s8791_s1 + $0x130] sm:$0xff]  ;;  %v6104_v51 = vpack.c.bf16 %v144_v20, %v140_v29  ;;  %v148_v52 = vand.u32 4294901760, %v47_v32 }
  0x14   :  { %4764 = vmatprep.subr.bf16.mxu0 %v5921_v50  ;;  %v5998_v50 = vsub.f32 %v5788_v13, %v9294_v9  ;;  %v6014_v13 = vsub.f32 %v5793_v14, %v9297_v22  ;;  %v9299_v9 = vand.u32 4294901760, %v5804_v16  ;;  %v48_v14 = vld [vmem:[%s8791_s1 + $0x108] sm:$0xff]  ;;  %v50_v22 = vld [vmem:[%s8791_s1 + $0x118] sm:$0xff]  ;;  %9305 = vst [vmem:[#allocation21_spill] sm:$0xff] %v6052_v40  ;;  %9310 = vst [vmem:[#allocation26_spill] sm:$0xff] %v6076_v39 }
  0x15   :  { %9311 = vst [vmem:[#allocation27_spill] sm:$0xff] %v6079_v41  ;;  %9317 = vst [vmem:[#allocation33_spill] sm:$0xff] %v6104_v51 }
  0x16   :  { %9295 = vst [vmem:[#allocation16_spill] sm:$0xff] %v5998_v50  ;;  %9298 = vst [vmem:[#allocation18_spill] sm:$0xff] %v6014_v13 }
  0x17   :  { %4766 = vmatpush1.bf16.msra.mxu0 %v5938_v57  ;;  %v9300_v57 = vand.u32 4294901760, %v5809_v17 }
  0x18   :  { %4768 = vmatprep.subr.bf16.mxu0 %v5941_v60  ;;  %v6019_v60 = vsub.f32 %v5804_v16, %v9299_v9  ;;  %v9302_v16 = vand.u32 4294901760, %v5831_v21 }
  0x19   :  { %v6024_v47 = vsub.f32 %v5809_v17, %v9300_v57  ;;  %v6043_v17 = vsub.f32 %v5844_v28, %v110_v36  ;;  %v6046_v57 = vsub.f32 %v5855_v31, %v108_v38  ;;  %v6061_v28 = vpack.c.bf16 %v142_v10, %v138_v8 }
  0x1a   :  { %v6040_v9 = vsub.f32 %v5831_v21, %v9302_v16  ;;  %v6058_v21 = vsub.f32 %v5876_v35, %v118_v42  ;;  %v146_v31 = vand.u32 4294901760, %v48_v14  ;;  %v150_v36 = vand.u32 4294901760, %v50_v22  ;;  %v52_v42 = vld [vmem:[%s8791_s1 + $0x128] sm:$0xff]  ;;  %v54_v16 = vld [vmem:[%s8791_s1 + $0x138] sm:$0xff] }
  0x1b   :  { %9304 = vst [vmem:[#allocation20_spill] sm:$0xff] %v6043_v17  ;;  %4770 = vmatpush1.bf16.msra.mxu0 %v5993_v2  ;;  %9307 = vst [vmem:[#allocation23_spill] sm:$0xff] %v6061_v28  ;;  %v6070_v38 = vsub.f32 %v5898_v43, %v116_v48  ;;  %v6073_v35 = vsub.f32 %v5903_v44, %v120_v49  ;;  %v6089_v43 = vsub.f32 %v37_v54, %v128_v59  ;;  %v56_v59 = vld [vmem:[%s8791_s1 + $0x148] sm:$0xff] }
  0x1c   :  { %9303 = vst [vmem:[#allocation19_spill] sm:$0xff] %v6040_v9  ;;  %4772 = vmatprep.subr.bf16.mxu0 %v6001_v7  ;;  %v6087_v7 = vsub.f32 %v35_v53, %v124_v58  ;;  %v6091_v44 = vsub.f32 %v40_v55, %v130_v61  ;;  %v6093_v48 = vsub.f32 %v42_v56, %v134_v62  ;;  %v152_v53 = vand.u32 4294901760, %v49_v34  ;;  %v58_v61 = vld [vmem:[%s8791_s1 + $0x158] sm:$0xff] }
  0x1d   :  { %9308 = vst [vmem:[#allocation24_spill] sm:$0xff] %v6070_v38  ;;  %9309 = vst [vmem:[#allocation25_spill] sm:$0xff] %v6073_v35  ;;  %v6102_v49 = vsub.f32 %v39_v63, %v132_v6  ;;  %v6106_v54 = vsub.f32 %v41_v30, %v136_v5  ;;  %v6109_v55 = vpack.c.bf16 %v150_v36, %v146_v31  ;;  %v154_v56 = vand.u32 4294901760, %v52_v42  ;;  %v55_v5 = vld [vmem:[%s8791_s1 + $0x140] sm:$0xff] }
  0x1e   :  { %9312 = vst [vmem:[#allocation28_spill] sm:$0xff] %v6087_v7  ;;  %9313 = vst [vmem:[#allocation29_spill] sm:$0xff] %v6089_v43  ;;  %v158_v58 = vand.u32 4294901760, %v54_v16  ;;  %v6118_v62 = vsub.f32 %v5962_v25, %v138_v8  ;;  %v6121_v30 = vsub.f32 %v5967_v24, %v142_v10  ;;  %v156_v63 = vand.u32 4294901760, %v51_v45  ;;  %v60_v24 = vld [vmem:[%s8791_s1 + $0x168] sm:$0xff] }
  0x1f   :  { %9314 = vst [vmem:[#allocation30_spill] sm:$0xff] %v6091_v44  ;;  %9315 = vst [vmem:[#allocation31_spill] sm:$0xff] %v6093_v48  ;;  %4774 = vmatpush1.bf16.msra.mxu0 %v6055_v33  ;;  %v160_v6 = vand.u32 4294901760, %v53_v46  ;;  %v6129_v33 = vsub.f32 %v43_v11, %v140_v29  ;;  %v6131_v2 = vsub.f32 %v45_v12, %v144_v20  ;;  %v162_v15 = vand.u32 4294901760, %v56_v59  ;;  %v62_v20 = vld [vmem:[%s8791_s1 + $0x178] sm:$0xff]  ;;  %v59_v29 = vld [vmem:[%s8791_s1 + $0x160] sm:$0xff] }
  0x20   :  { %9316 = vst [vmem:[#allocation32_spill] sm:$0xff] %v6102_v49  ;;  %9318 = vst [vmem:[#allocation34_spill] sm:$0xff] %v6106_v54  ;;  %4776 = vmatprep.subr.bf16.mxu0 %v6061_v28  ;;  %v57_v28 = vld [vmem:[%s8791_s1 + $0x150] sm:$0xff]  ;;  %v6133_v19 = vsub.f32 %v48_v14, %v146_v31  ;;  %v6135_v25 = vsub.f32 %v50_v22, %v150_v36  ;;  %v6141_v8 = vpack.c.bf16 %v152_v53, %v148_v52  ;;  %v64_v36 = vld [vmem:[%s8791_s1 + $0x188] sm:$0xff] }
  0x21   :  { %9319 = vst [vmem:[#allocation35_spill] sm:$0xff] %v6109_v55  ;;  %9320 = vst [vmem:[#allocation36_spill] sm:$0xff] %v6118_v62  ;;  %v6143_v10 = vsub.f32 %v47_v32, %v148_v52  ;;  %v61_v11 = vld [vmem:[%s8791_s1 + $0x170] sm:$0xff]  ;;  %v6155_v12 = vsub.f32 %v49_v34, %v152_v53  ;;  %v6157_v14 = vpack.c.bf16 %v158_v58, %v154_v56  ;;  %v164_v22 = vand.u32 4294901760, %v55_v5  ;;  %v66_v32 = vld [vmem:[%s8791_s1 + $0x198] sm:$0xff] }
  0x22   :  { %9321 = vst [vmem:[#allocation37_spill] sm:$0xff] %v6121_v30  ;;  %9322 = vst [vmem:[#allocation38_spill] sm:$0xff] %v6129_v33  ;;  %v166_v30 = vand.u32 4294901760, %v58_v61  ;;  %v168_v31 = vand.u32 4294901760, %v57_v28  ;;  %v6165_v52 = vsub.f32 %v52_v42, %v154_v56  ;;  %v6171_v34 = vsub.f32 %v51_v45, %v156_v63  ;;  %v63_v53 = vld [vmem:[%s8791_s1 + $0x180] sm:$0xff] }
  0x23   :  { %9323 = vst [vmem:[#allocation39_spill] sm:$0xff] %v6131_v2  ;;  %9324 = vst [vmem:[#allocation40_spill] sm:$0xff] %v6133_v19  ;;  %4778 = vmatpush1.bf16.msra.mxu0 %v6104_v51  ;;  %v6167_v51 = vsub.f32 %v54_v16, %v158_v58  ;;  %v176_v19 = vand.u32 4294901760, %v61_v11  ;;  %v65_v2 = vld [vmem:[%s8791_s1 + $0x190] sm:$0xff]  ;;  %v6182_v42 = vld [vmem:[%s8792_s0] sm:$0xff]  ;;  %v6185_v16 = vsub.f32 %v53_v46, %v160_v6  ;;  %v178_v56 = vand.u32 4294901760, %v64_v36 }
  0x24   :  { %9325 = vst [vmem:[#allocation41_spill] sm:$0xff] %v6135_v25  ;;  %9326 = vst [vmem:[#allocation42_spill] sm:$0xff] %v6141_v8  ;;  %4780 = vmatprep.subr.bf16.mxu0 %v6109_v55  ;;  %v170_v55 = vand.u32 4294901760, %v60_v24  ;;  %v172_v25 = vand.u32 4294901760, %v59_v29  ;;  %v6187_v45 = vpack.c.bf16 %v166_v30, %v162_v15  ;;  %v182_v58 = vand.u32 4294901760, %v66_v32 }
  0x25   :  { %9327 = vst [vmem:[#allocation43_spill] sm:$0xff] %v6143_v10  ;;  %9328 = vst [vmem:[#allocation44_spill] sm:$0xff] %v6155_v12  ;;  %v6169_v10 = vpack.c.bf16 %v160_v6, %v156_v63  ;;  %v174_v12 = vand.u32 4294901760, %v62_v20  ;;  %v6190_v63 = vsub.f32 %v56_v59, %v162_v15  ;;  %v6201_v46 = vsub.f32 %v57_v28, %v168_v31  ;;  %v67_v15 = vld [vmem:[%s8791_s1 + $0x1a0] sm:$0xff]  ;;  %v69_v59 = vld [vmem:[%s8791_s1 + $0x1b0] sm:$0xff] }
  0x26   :  { %9329 = vst [vmem:[#allocation45_spill] sm:$0xff] %v6157_v14  ;;  %9330 = vst [vmem:[#allocation46_spill] sm:$0xff] %v6165_v52  ;;  %v6196_v52 = vsub.f32 %v55_v5, %v164_v22  ;;  %v180_v6 = vand.u32 4294901760, %v63_v53  ;;  %v6216_v28 = vsub.f32 %v60_v24, %v170_v55 }
  0x27   :  { %9331 = vst [vmem:[#allocation47_spill] sm:$0xff] %v6167_v51  ;;  %9332 = vst [vmem:[#allocation48_spill] sm:$0xff] %v6169_v10  ;;  %4782 = vmatpush1.bf16.msra.mxu0 %v6141_v8  ;;  %v6194_v51 = vpack.c.bf16 %v168_v31, %v164_v22  ;;  %v68_v8 = vld [vmem:[%s8791_s1 + $0x1a8] sm:$0xff]  ;;  %v6218_v5 = vsub.f32 %v62_v20, %v174_v12  ;;  %v6220_v22 = vpack.c.bf16 %v176_v19, %v172_v25 }
  0x28   :  { %9333 = vst [vmem:[#allocation49_spill] sm:$0xff] %v6171_v34  ;;  %9334 = vst [vmem:[#allocation50_spill] sm:$0xff] %v6185_v16  ;;  %4784 = vmatprep.subr.bf16.mxu0 %v6157_v14  ;;  %v6192_v34 = vsub.f32 %v58_v61, %v166_v30  ;;  %v184_v16 = vand.u32 4294901760, %v65_v2  ;;  %v70_v14 = vld [vmem:[%s8791_s1 + $0x1b8] sm:$0xff]  ;;  %v80_v61 = vcombine.high %v6182_v42, %v6182_v42  ;;  %v72_v31 = vld [vmem:[%s8791_s1 + $0x1c8] sm:$0xff]  ;;  %v186_v20 = vand.u32 4294901760, %v68_v8 }
  0x29   :  { %9335 = vst [vmem:[#allocation51_spill] sm:$0xff] %v6187_v45  ;;  %9336 = vst [vmem:[#allocation52_spill] sm:$0xff] %v6190_v63  ;;  %v6214_v30 = vpack.c.bf16 %v174_v12, %v170_v55  ;;  %v6233_v55 = vpack.c.bf16 %v182_v58, %v178_v56  ;;  %v190_v12 = vand.u32 4294901760, %v70_v14  ;;  %v71_v63 = vld [vmem:[%s8791_s1 + $0x1c0] sm:$0xff] }
  0x2a   :  { %9337 = vst [vmem:[#allocation53_spill] sm:$0xff] %v6192_v34  ;;  %9338 = vst [vmem:[#allocation54_spill] sm:$0xff] %v6194_v51  ;;  %v6231_v34 = vsub.f32 %v61_v11, %v176_v19  ;;  %v6235_v24 = vand.u32 4294901760, %v80_v61  ;;  %v6246_v19 = vsub.f32 %v64_v36, %v178_v56  ;;  %v6257_v33 = vsub.f32 %v65_v2, %v184_v16 }
  0x2b   :  { %9339 = vst [vmem:[#allocation55_spill] sm:$0xff] %v6196_v52  ;;  %9340 = vst [vmem:[#allocation56_spill] sm:$0xff] %v6201_v46  ;;  %v74_v46 = vld [vmem:[%s8791_s1 + $0x1d8] sm:$0xff]  ;;  %4786 = vmatpush1.bf16.msra.mxu0 %v6169_v10  ;;  %v6229_v52 = vsub.f32 %v59_v29, %v172_v25  ;;  %v6244_v25 = vld [vmem:[%s8791_s1 + $0x1d0] sm:$0xff]  ;;  %v194_v29 = vand.u32 4294901760, %v72_v31  ;;  %v196_v62 = vand.u32 4294901760, %v71_v63 }
  0x2c   :  { %9341 = vst [vmem:[#allocation57_spill] sm:$0xff] %v6214_v30  ;;  %9342 = vst [vmem:[#allocation58_spill] sm:$0xff] %v6216_v28  ;;  %4788 = vmatprep.subr.bf16.mxu0 %v6187_v45  ;;  %v192_v28 = vand.u32 4294901760, %v69_v59  ;;  %v198_v11 = vand.u32 4294901760, %v74_v46  ;;  %v6249_v10 = vsub.f32 %v80_v61, %v6235_v24  ;;  %v6251_v45 = vsub.f32 %v66_v32, %v182_v58 }
  0x2d   :  { %9343 = vst [vmem:[#allocation59_spill] sm:$0xff] %v6218_v5  ;;  %9344 = vst [vmem:[#allocation60_spill] sm:$0xff] %v6220_v22  ;;  %v188_v5 = vand.u32 4294901760, %v67_v15  ;;  %v6263_v56 = vand.u32 4294901760, %v6182_v42  ;;  %v6266_v32 = vpack.c.bf16 %v190_v12, %v186_v20  ;;  %v6268_v58 = vsub.f32 %v68_v8, %v186_v20  ;;  %v6288_v8 = vld [vmem:[%s8791_s1 + $0x1f8] sm:$0xff] }
  0x2e   :  { %9345 = vst [vmem:[#allocation61_spill] sm:$0xff] %v6229_v52  ;;  %9346 = vst [vmem:[#allocation62_spill] sm:$0xff] %v6231_v34  ;;  %v6253_v34 = vpack.c.bf16 %v184_v16, %v180_v6  ;;  %v6255_v52 = vsub.f32 %v63_v53, %v180_v6  ;;  %v8864_v36 = vand.u32 4294901760, %v6249_v10  ;;  %v6270_v53 = vsub.f32 %v70_v14, %v190_v12  ;;  %v6277_v16 = vld [vmem:[%s8791_s1 + $0x1e8] sm:$0xff] }
  0x2f   :  { %9347 = vst [vmem:[#allocation63_spill] sm:$0xff] %v6233_v55  ;;  %9348 = vst [vmem:[#allocation64_spill] sm:$0xff] %v6235_v24  ;;  %4790 = vmatpush1.bf16.msra.mxu0 %v6194_v51  ;;  %v6272_v2 = vpack.c.bf16 %v192_v28, %v188_v5  ;;  %v6279_v6 = vsub.f32 %v67_v15, %v188_v5  ;;  %v6281_v61 = vsub.f32 %v69_v59, %v192_v28  ;;  %v6304_v5 = vld [vmem:[%s8791_s1 + $0x1e0] sm:$0xff] }
  0x30   :  { %9349 = vst [vmem:[#allocation65_spill] sm:$0xff] %v6246_v19  ;;  %9350 = vst [vmem:[#allocation66_spill] sm:$0xff] %v6249_v10  ;;  %4792 = vmatprep.subr.bf16.mxu0 %v6214_v30  ;;  %v6283_v54 = vpack.c.bf16 %v198_v11, %v194_v29  ;;  %v213_v14 = vsub.f32 %v6249_v10, %v8864_v36  ;;  %v6293_v20 = vsub.f32 %v72_v31, %v194_v29  ;;  %v6309_v31 = vld [vmem:[%s8791_s1 + $0x1f0] sm:$0xff] }
  0x31   :  { %9351 = vst [vmem:[#allocation67_spill] sm:$0xff] %v6251_v45  ;;  %9352 = vst [vmem:[#allocation68_spill] sm:$0xff] %v6253_v34  ;;  %v6295_v12 = vsub.f32 %v74_v46, %v198_v11  ;;  %v202_v28 = vand.u32 4294901760, %v6277_v16  ;;  %v6313_v29 = vsub.f32 %v6182_v42, %v6263_v56  ;;  %v9365_v30 = vand.u32 4294901760, %v6244_v25 }
  0x32   :  { %9353 = vst [vmem:[#allocation69_spill] sm:$0xff] %v6255_v52  ;;  %9354 = vst [vmem:[#allocation70_spill] sm:$0xff] %v6257_v33  ;;  %v214_v46 = vand.u32 4294901760, %v213_v14  ;;  %v6325_v14 = vsub.f32 %v71_v63, %v196_v62  ;;  %v9368_v59 = vand.u32 4294901760, %v5952_v27  ;;  %v9370_v63 = vand.u32 4294901760, %v5972_v0 }
  0x33   :  { %9355 = vst [vmem:[#allocation71_spill] sm:$0xff] %v6263_v56  ;;  %9356 = vst [vmem:[#allocation72_spill] sm:$0xff] %v6266_v32  ;;  %4794 = vmatpush1.bf16.msra.mxu0 %v6220_v22  ;;  %v6323_v51 = vpack.c.bf16 %v9365_v30, %v196_v62  ;;  %v9369_v22 = vand.u32 4294901760, %v5957_v26  ;;  %v9374_v62 = vand.u32 4294901760, %v5982_v3  ;;  %v9376_v36 = vand.u32 4294901760, %v5990_v23 }
  0x34   :  { %9357 = vst [vmem:[#allocation73_spill] sm:$0xff] %v6268_v58  ;;  %9358 = vst [vmem:[#allocation74_spill] sm:$0xff] %v6270_v53  ;;  %4796 = vmatprep.subr.bf16.mxu0 %v6233_v55  ;;  %215 = vmatprep.mubr.f32.mxu0 %v214_v46  ;;  %v230_v15 = vsub.f32 %v5952_v27, %v9368_v59  ;;  %v236_v46 = vsub.f32 %v5972_v0, %v9370_v63  ;;  %v9371_v59 = vand.u32 4294901760, %v6288_v8 }
  0x35   :  { %9359 = vst [vmem:[#allocation75_spill] sm:$0xff] %v6272_v2  ;;  %9360 = vst [vmem:[#allocation76_spill] sm:$0xff] %v6281_v61  ;;  %v242_v30 = vsub.f32 %v5957_v26, %v9369_v22  ;;  %v9373_v22 = vand.u32 4294901760, %v5977_v1  ;;  %v9375_v63 = vand.u32 4294901760, %v5987_v4  ;;  %v9377_v10 = vand.u32 4294901760, %v5998_v50 }
  0x36   :  { %9361 = vst [vmem:[#allocation77_spill] sm:$0xff] %v6283_v54  ;;  %9362 = vst [vmem:[#allocation78_spill] sm:$0xff] %v6293_v20  ;;  %v6347_v11 = vpack.c.bf16 %v9371_v59, %v202_v28  ;;  %v9380_v56 = vand.u32 4294901760, %v6019_v60 }
  0x37   :  { %9363 = vst [vmem:[#allocation79_spill] sm:$0xff] %v6295_v12  ;;  %9364 = vst [vmem:[#allocation80_spill] sm:$0xff] %v6313_v29  ;;  %4798 = vmatpush1.bf16.msra.mxu0 %v6253_v34  ;;  %v248_v42 = vsub.f32 %v5977_v1, %v9373_v22  ;;  %v254_v34 = vsub.f32 %v5982_v3, %v9374_v62  ;;  %v266_v55 = vsub.f32 %v5987_v4, %v9375_v63 }
  0x38   :  { %9366 = vst [vmem:[#allocation81_spill] sm:$0xff] %v6323_v51  ;;  %9367 = vst [vmem:[#allocation82_spill] sm:$0xff] %v6325_v14  ;;  %4800 = vmatprep.subr.bf16.mxu0 %v6266_v32  ;;  %v260_v32 = vsub.f32 %v5990_v23, %v9376_v36  ;;  %v272_v59 = vsub.f32 %v5998_v50, %v9377_v10  ;;  %v231_v14 = vand.u32 4294901760, %v230_v15  ;;  %v243_v12 = vand.u32 4294901760, %v242_v30 }
  0x39   :  { %9372 = vst [vmem:[#allocation83_spill] sm:$0xff] %v6347_v11  ;;  %v9378_v63 = vand.u32 4294901760, %v6313_v29  ;;  %v237_v23 = vand.u32 4294901760, %v236_v46  ;;  %v9379_v4 = vand.u32 4294901760, %v6014_v13  ;;  %v290_v15 = vsub.f32 %v6019_v60, %v9380_v56 }
  0x3a   :  { %v249_v30 = vand.u32 4294901760, %v248_v42  ;;  %v255_v62 = vand.u32 4294901760, %v254_v34  ;;  %v267_v20 = vand.u32 4294901760, %v266_v55  ;;  %v273_v50 = vand.u32 4294901760, %v272_v59 }
  0x3b   :  { %4802 = vmatpush1.bf16.msra.mxu0 %v6272_v2  ;;  %v219_v36 = vsub.f32 %v6313_v29, %v9378_v63  ;;  %v278_v10 = vsub.f32 %v6014_v13, %v9379_v4  ;;  %v261_v2 = vand.u32 4294901760, %v260_v32  ;;  %v9381_v63 = vand.u32 4294901760, %v6024_v47 }
  0x3c   :  { %4804 = vmatprep.subr.bf16.mxu0 %v6283_v54  ;;  %v9382_v29 = vand.u32 4294901760, %v6029_v37  ;;  %v9383_v13 = vand.u32 4294901760, %v6244_v25  ;;  %v6392_v34 = vsub.f32 %v6277_v16, %v202_v28  ;;  %v9386_v55 = vand.u32 4294901760, %v6040_v9 }
  0x3d   :  { %v284_v46 = vsub.f32 %v6024_v47, %v9381_v63  ;;  %v9387_v42 = vand.u32 4294901760, %v6043_v17  ;;  %v9389_v63 = vand.u32 4294901760, %v6309_v31  ;;  %v291_v16 = vand.u32 4294901760, %v290_v15 }
  0x3e   :  { %v296_v4 = vsub.f32 %v6029_v37, %v9382_v29  ;;  %v6389_v56 = vsub.f32 %v6244_v25, %v9383_v13  ;;  %9385 = vst [vmem:[#allocation85_spill] sm:$0xff] %v6392_v34  ;;  %v302_v32 = vsub.f32 %v6040_v9, %v9386_v55  ;;  %v9388_v29 = vand.u32 4294901760, %v6304_v5 }
  0x3f   :  { %v314_v59 = vsub.f32 %v6043_v17, %v9387_v42  ;;  %4806 = vmatpush1.bf16.msra.mxu0 %v6323_v51  ;;  %v4811_v13 = vpack.c.bf16 %v243_v12, %v231_v14  ;;  %v279_v25 = vand.u32 4294901760, %v278_v10  ;;  %v220_v28 = vand.u32 4294901760, %v219_v36 }
  0x40   :  { %9384 = vst [vmem:[#allocation84_spill] sm:$0xff] %v6389_v56  ;;  %v6405_v22 = vpack.c.bf16 %v9389_v63, %v9388_v29  ;;  %4808 = vmatprep.subr.bf16.mxu0 %v6347_v11  ;;  %v4813_v54 = vpack.c.bf16 %v249_v30, %v237_v23  ;;  %v4815_v55 = vpack.c.bf16 %v267_v20, %v255_v62  ;;  %v9391_v34 = vand.u32 4294901760, %v6046_v57 }
  0x41   :  { %v4817_v51 = vpack.c.bf16 %v273_v50, %v261_v2  ;;  %v285_v56 = vand.u32 4294901760, %v284_v46  ;;  %v297_v17 = vand.u32 4294901760, %v296_v4  ;;  %v8913_v9 = vand.u32 4294901760, %v6049_v18 }
  0x42   :  { %9390 = vst [vmem:[#allocation86_spill] sm:$0xff] %v6405_v22  ;;  %v6411_v42 = vsub.f32 %v6046_v57, %v9391_v34  ;;  %v303_v29 = vand.u32 4294901760, %v302_v32  ;;  %v315_v63 = vand.u32 4294901760, %v314_v59  ;;  %v8912_v12 = vand.u32 4294901760, %v6052_v40 }
  0x43   :  { %v8910_v14 = vand.u32 4294901760, %v6058_v21  ;;  %4810 = vmatpush1.bf16.msra.mxu0 %v6405_v22  ;;  %v4819_v23 = vpack.c.bf16 %v291_v16, %v279_v25  ;;  %v8909_v20 = vand.u32 4294901760, %v6070_v38  ;;  %v8906_v62 = vand.u32 4294901760, %v6073_v35  ;;  %v9392_v25 = vld [vmem:[#allocation34_spill] sm:$0xff] }
  0x44   :  { %v8908_v36 = vand.u32 4294901760, %v6076_v39  ;;  %4812 = vmatprep.subr.bf16.mxu0 %v4811_v13  ;;  %v8907_v50 = vand.u32 4294901760, %v6079_v41  ;;  %v8911_v2 = vand.u32 4294901760, %v6087_v7  ;;  %v8914_v10 = vand.u32 4294901760, %v6089_v43 }
  0x45   :  { %v8917_v15 = vand.u32 4294901760, %v6091_v44  ;;  %v4821_v30 = vpack.c.bf16 %v297_v17, %v285_v56  ;;  %v320_v46 = vsub.f32 %v6049_v18, %v8913_v9  ;;  %v8922_v4 = vand.u32 4294901760, %v6093_v48 }
  0x46   :  { %v8927_v34 = vand.u32 4294901760, %v6102_v49  ;;  %221 = vmatmul.mubr.f32.vlgmr.msra.gmra.mrb[0].mxu0 %v220_v28  ;;  %v4823_v32 = vpack.c.bf16 %v315_v63, %v303_v29  ;;  %v326_v59 = vsub.f32 %v6052_v40, %v8912_v12  ;;  %v338_v13 = vsub.f32 %v6058_v21, %v8910_v14  ;;  %v9394_v14 = vld [vmem:[#allocation37_spill] sm:$0xff]  ;;  %v9451_v40 = vld [vmem:[#allocation38_spill] sm:$0xff] }
  0x47   :  { %v8932_v17 = vand.u32 4294901760, %v9392_v25  ;;  %4814 = vmatpush1.bf16.msra.mxu0 %v4813_v54  ;;  %v309_v56 = vand.u32 4294901760, %v6411_v42  ;;  %v332_v16 = vsub.f32 %v6070_v38, %v8909_v20  ;;  %v344_v28 = vsub.f32 %v6073_v35, %v8906_v62  ;;  %612 = vmatprep.mubr.f32.mxu0 %v6235_v24  ;;  %v9395_v24 = vld [vmem:[#allocation38_spill] sm:$0xff]  ;;  %v9452_v38 = vld [vmem:[#allocation40_spill] sm:$0xff]  ;;  %v9458_v35 = vld [vmem:[#allocation49_spill] sm:$0xff] }
  0x48   :  { %v350_v29 = vsub.f32 %v6076_v39, %v8908_v36  ;;  %4816 = vmatprep.subr.bf16.mxu0 %v4815_v55  ;;  %v362_v54 = vsub.f32 %v6079_v41, %v8907_v50  ;;  %v356_v42 = vsub.f32 %v6087_v7, %v8911_v2  ;;  %v368_v63 = vsub.f32 %v6089_v43, %v8914_v10  ;;  %v9393_v36 = vld [vmem:[#allocation36_spill] sm:$0xff]  ;;  %v9454_v41 = vld [vmem:[#allocation43_spill] sm:$0xff]  ;;  %v9456_v7 = vld [vmem:[#allocation46_spill] sm:$0xff] }
  0x49   :  { %v374_v62 = vsub.f32 %v6091_v44, %v8917_v15  ;;  %v386_v55 = vsub.f32 %v6093_v48, %v8922_v4  ;;  %v380_v50 = vsub.f32 %v6102_v49, %v8927_v34  ;;  %v321_v12 = vand.u32 4294901760, %v320_v46  ;;  %v9467_v39 = vld [vmem:[#allocation85_spill] sm:$0xff] }
  0x4a   :  { %v327_v9 = vand.u32 4294901760, %v326_v59  ;;  %v392_v10 = vsub.f32 %v9392_v25, %v8932_v17  ;;  %v339_v22 = vand.u32 4294901760, %v338_v13  ;;  %v333_v11 = vand.u32 4294901760, %v332_v16  ;;  %v9462_v25 = vld [vmem:[#allocation55_spill] sm:$0xff] }
  0x4b   :  { %4818 = vmatpush1.bf16.msra.mxu0 %v4817_v51  ;;  %v345_v4 = vand.u32 4294901760, %v344_v28  ;;  %v351_v48 = vand.u32 4294901760, %v350_v29  ;;  %v363_v44 = vand.u32 4294901760, %v362_v54  ;;  %v357_v34 = vand.u32 4294901760, %v356_v42  ;;  %v9400_v29 = vld [vmem:[#allocation40_spill] sm:$0xff]  ;;  %v9407_v28 = vld [vmem:[#allocation41_spill] sm:$0xff] }
  0x4c   :  { %4820 = vmatprep.subr.bf16.mxu0 %v4819_v23  ;;  %v369_v49 = vand.u32 4294901760, %v368_v63  ;;  %v375_v20 = vand.u32 4294901760, %v374_v62  ;;  %v387_v43 = vand.u32 4294901760, %v386_v55  ;;  %v381_v2 = vand.u32 4294901760, %v380_v50  ;;  %v9399_v23 = vld [vmem:[#allocation39_spill] sm:$0xff] }
  0x4d   :  { %v9396_v46 = vand.u32 4294901760, %v9393_v36  ;;  %v9397_v17 = vand.u32 4294901760, %v9394_v14  ;;  %v393_v51 = vand.u32 4294901760, %v392_v10  ;;  %v9398_v13 = vand.u32 4294901760, %v9395_v24 }
  0x4e   :  { %v9401_v50 = vand.u32 4294901760, %v6288_v8  ;;  %v9403_v42 = vand.u32 4294901760, %v6304_v5  ;;  %v9405_v10 = vand.u32 4294901760, %v6309_v31  ;;  %v4825_v55 = vpack.c.bf16 %v321_v12, %v309_v56  ;;  %v9416_v56 = vld [vmem:[#allocation52_spill] sm:$0xff] }
  0x4f   :  { %v398_v59 = vsub.f32 %v9393_v36, %v9396_v46  ;;  %v410_v15 = vsub.f32 %v9394_v14, %v9397_v17  ;;  %v6480_v16 = vsub.f32 %v9395_v24, %v9398_v13  ;;  %4822 = vmatpush1.bf16.msra.mxu0 %v4821_v30  ;;  %v4827_v46 = vpack.c.bf16 %v339_v22, %v327_v9  ;;  %v9410_v9 = vld [vmem:[#allocation43_spill] sm:$0xff] }
  0x50   :  { %v6487_v54 = vsub.f32 %v6288_v8, %v9401_v50  ;;  %v6492_v63 = vsub.f32 %v6304_v5, %v9403_v42  ;;  %v6497_v17 = vsub.f32 %v6309_v31, %v9405_v10  ;;  %4824 = vmatprep.subr.bf16.mxu0 %v4823_v32  ;;  %v4829_v13 = vpack.c.bf16 %v345_v4, %v333_v11  ;;  %v9413_v22 = vld [vmem:[#allocation47_spill] sm:$0xff] }
  0x51   :  { %v4831_v62 = vpack.c.bf16 %v363_v44, %v351_v48  ;;  %v8939_v24 = vand.u32 4294901760, %v9407_v28  ;;  %v4833_v8 = vpack.c.bf16 %v369_v49, %v357_v34  ;;  %v4835_v50 = vpack.c.bf16 %v387_v43, %v375_v20  ;;  %v9411_v48 = vld [vmem:[#allocation44_spill] sm:$0xff]  ;;  %v9412_v49 = vld [vmem:[#allocation46_spill] sm:$0xff] }
  0x52   :  { %9402 = vst [vmem:[#allocation39_spill] sm:$0xff] %v6487_v54  ;;  %9404 = vst [vmem:[#allocation87_spill] sm:$0xff] %v6492_v63  ;;  %v399_v54 = vand.u32 4294901760, %v398_v59  ;;  %v411_v14 = vand.u32 4294901760, %v410_v15  ;;  %v4837_v36 = vpack.c.bf16 %v393_v51, %v381_v2  ;;  %v405_v5 = vand.u32 4294901760, %v6480_v16  ;;  %v9414_v15 = vld [vmem:[#allocation49_spill] sm:$0xff] }
  0x53   :  { %9406 = vst [vmem:[#allocation88_spill] sm:$0xff] %v6497_v17  ;;  %v9408_v42 = vand.u32 4294901760, %v9399_v23  ;;  %v9409_v30 = vand.u32 4294901760, %v9400_v29  ;;  %4826 = vmatpush1.bf16.msra.mxu0 %v4825_v55  ;;  %v434_v2 = vsub.f32 %v9407_v28, %v8939_v24  ;;  %v8940_v4 = vand.u32 4294901760, %v9414_v15  ;;  %v9415_v34 = vld [vmem:[#allocation50_spill] sm:$0xff]  ;;  %v9417_v16 = vld [vmem:[#allocation53_spill] sm:$0xff] }
  0x54   :  { %4828 = vmatprep.subr.bf16.mxu0 %v4827_v46  ;;  %v4839_v51 = vpack.c.bf16 %v411_v14, %v399_v54  ;;  %v8946_v10 = vand.u32 4294901760, %v9417_v16  ;;  %v9418_v55 = vld [vmem:[#allocation55_spill] sm:$0xff]  ;;  %v9420_v46 = vld [vmem:[#allocation58_spill] sm:$0xff]  ;;  %v9422_v24 = vand.u32 4294901760, %v9410_v9  ;;  %v9423_v59 = vand.u32 4294901760, %v9411_v48 }
  0x55   :  { %v416_v31 = vsub.f32 %v9399_v23, %v9408_v42  ;;  %v422_v12 = vsub.f32 %v9400_v29, %v9409_v30  ;;  %v9419_v30 = vld [vmem:[#allocation56_spill] sm:$0xff]  ;;  %v9421_v17 = vld [vmem:[#allocation59_spill] sm:$0xff]  ;;  %v9424_v54 = vand.u32 4294901760, %v9412_v49  ;;  %v435_v44 = vand.u32 4294901760, %v434_v2 }
  0x56   :  { %v428_v32 = vsub.f32 %v9410_v9, %v9422_v24  ;;  %v440_v14 = vsub.f32 %v9411_v48, %v9423_v59  ;;  %v9426_v24 = vand.u32 4294901760, %v9415_v34  ;;  %v9427_v59 = vand.u32 4294901760, %v9416_v56 }
  0x57   :  { %v417_v11 = vand.u32 4294901760, %v416_v31  ;;  %v423_v20 = vand.u32 4294901760, %v422_v12  ;;  %4830 = vmatpush1.bf16.msra.mxu0 %v4829_v13  ;;  %v446_v42 = vsub.f32 %v9412_v49, %v9424_v54  ;;  %v9425_v31 = vand.u32 4294901760, %v9413_v22  ;;  %v9433_v49 = vld [vmem:[#allocation62_spill] sm:$0xff] }
  0x58   :  { %4832 = vmatprep.subr.bf16.mxu0 %v4831_v62  ;;  %v452_v13 = vsub.f32 %v9414_v15, %v8940_v4  ;;  %v464_v63 = vsub.f32 %v9415_v34, %v9426_v24  ;;  %v470_v43 = vsub.f32 %v9416_v56, %v9427_v59  ;;  %v482_v54 = vsub.f32 %v9417_v16, %v8946_v10  ;;  %v9430_v15 = vld [vmem:[#allocation61_spill] sm:$0xff] }
  0x59   :  { %v458_v12 = vsub.f32 %v9413_v22, %v9425_v31  ;;  %v9428_v31 = vand.u32 4294901760, %v9418_v55  ;;  %v9429_v2 = vand.u32 4294901760, %v9419_v30  ;;  %v9431_v24 = vand.u32 4294901760, %v9420_v46 }
  0x5a   :  { %v9432_v59 = vand.u32 4294901760, %v9421_v17  ;;  %v447_v48 = vand.u32 4294901760, %v446_v42  ;;  %v465_v22 = vand.u32 4294901760, %v464_v63  ;;  %v8959_v28 = vand.u32 4294901760, %v6251_v45 }
  0x5b   :  { %v476_v62 = vsub.f32 %v9418_v55, %v9428_v31  ;;  %v488_v4 = vsub.f32 %v9419_v30, %v9429_v2  ;;  %v494_v34 = vsub.f32 %v9420_v46, %v9431_v24  ;;  %4834 = vmatpush1.bf16.msra.mxu0 %v4833_v8  ;;  %v429_v31 = vand.u32 4294901760, %v428_v32 }
  0x5c   :  { %v506_v56 = vsub.f32 %v9421_v17, %v9432_v59  ;;  %v441_v55 = vand.u32 4294901760, %v440_v14  ;;  %v459_v9 = vand.u32 4294901760, %v458_v12  ;;  %4836 = vmatprep.subr.bf16.mxu0 %v4835_v50  ;;  %v453_v2 = vand.u32 4294901760, %v452_v13 }
  0x5d   :  { %v471_v30 = vand.u32 4294901760, %v470_v43  ;;  %v483_v24 = vand.u32 4294901760, %v482_v54  ;;  %v477_v46 = vand.u32 4294901760, %v476_v62  ;;  %v489_v29 = vand.u32 4294901760, %v488_v4 }
  0x5e   :  { %v9434_v59 = vand.u32 4294901760, %v9430_v15  ;;  %v495_v16 = vand.u32 4294901760, %v494_v34  ;;  %v507_v8 = vand.u32 4294901760, %v506_v56  ;;  %v9435_v32 = vand.u32 4294901760, %v9433_v49 }
  0x5f   :  { %v9436_v63 = vand.u32 4294901760, %v6246_v19  ;;  %4838 = vmatpush1.bf16.msra.mxu0 %v4837_v36  ;;  %v4841_v43 = vpack.c.bf16 %v417_v11, %v405_v5  ;;  %v4843_v4 = vpack.c.bf16 %v435_v44, %v423_v20  ;;  %v8958_v14 = vand.u32 4294901760, %v6255_v52 }
  0x60   :  { %v6565_v10 = vsub.f32 %v9430_v15, %v9434_v59  ;;  %v6570_v42 = vsub.f32 %v9433_v49, %v9435_v32  ;;  %v8957_v12 = vand.u32 4294901760, %v6257_v33  ;;  %4840 = vmatprep.subr.bf16.mxu0 %v4839_v51  ;;  %v4845_v34 = vpack.c.bf16 %v441_v55, %v429_v31  ;;  %v9437_v31 = vld [vmem:[#allocation13_spill] sm:$0xff]  ;;  %v9468_v15 = vld [vmem:[#allocation39_spill] sm:$0xff] }
  0x61   :  { %v6575_v50 = vsub.f32 %v6246_v19, %v9436_v63  ;;  %v6582_v56 = vsub.f32 %v6251_v45, %v8959_v28  ;;  %v8956_v13 = vand.u32 4294901760, %v6268_v58  ;;  %v8955_v54 = vand.u32 4294901760, %v6270_v53  ;;  %v9453_v63 = vld [vmem:[#allocation41_spill] sm:$0xff]  ;;  %v9469_v32 = vld [vmem:[#allocation87_spill] sm:$0xff] }
  0x62   :  { %v4847_v62 = vpack.c.bf16 %v459_v9, %v447_v48  ;;  %v4849_v59 = vpack.c.bf16 %v465_v22, %v453_v2  ;;  %v4851_v36 = vpack.c.bf16 %v483_v24, %v471_v30  ;;  %v4853_v5 = vpack.c.bf16 %v489_v29, %v477_v46  ;;  %v9438_v24 = vld [vmem:[#allocation14_spill] sm:$0xff]  ;;  %v9455_v2 = vld [vmem:[#allocation44_spill] sm:$0xff]  ;;  %v9457_v30 = vld [vmem:[#allocation47_spill] sm:$0xff] }
  0x63   :  { %v4855_v44 = vpack.c.bf16 %v507_v8, %v495_v16  ;;  %v501_v11 = vand.u32 4294901760, %v6565_v10  ;;  %v513_v20 = vand.u32 4294901760, %v6570_v42  ;;  %v519_v51 = vand.u32 4294901760, %v6575_v50  ;;  %4842 = vmatpush1.bf16.msra.mxu0 %v4841_v43  ;;  %v9439_v8 = vld [vmem:[#allocation16_spill] sm:$0xff]  ;;  %v9440_v42 = vld [vmem:[#allocation18_spill] sm:$0xff] }
  0x64   :  { %v6592_v55 = vsub.f32 %v6255_v52, %v8958_v14  ;;  %v536_v9 = vsub.f32 %v6257_v33, %v8957_v12  ;;  %4844 = vmatprep.subr.bf16.mxu0 %v4843_v4  ;;  %v531_v22 = vand.u32 4294901760, %v6582_v56  ;;  %v542_v16 = vsub.f32 %v6268_v58, %v8956_v13  ;;  %v9441_v50 = vld [vmem:[#allocation78_spill] sm:$0xff]  ;;  %v9442_v56 = vld [vmem:[#allocation19_spill] sm:$0xff]  ;;  %v9460_v29 = vld [vmem:[#allocation52_spill] sm:$0xff] }
  0x65   :  { %v554_v10 = vsub.f32 %v6270_v53, %v8955_v54  ;;  %v9443_v54 = vld [vmem:[#allocation20_spill] sm:$0xff]  ;;  %v9445_v4 = vld [vmem:[#allocation79_spill] sm:$0xff]  ;;  %v9459_v43 = vld [vmem:[#allocation50_spill] sm:$0xff]  ;;  %v9471_v58 = vand.u32 4294901760, %v6279_v6  ;;  %v9472_v28 = vand.u32 4294901760, %v6281_v61  ;;  %v4857_v14 = vpack.c.bf16 %v513_v20, %v501_v11 }
  0x66   :  { %v9463_v48 = vld [vmem:[#allocation56_spill] sm:$0xff]  ;;  %v537_v19 = vand.u32 4294901760, %v536_v9  ;;  %v543_v13 = vand.u32 4294901760, %v542_v16  ;;  %v4859_v45 = vpack.c.bf16 %v531_v22, %v519_v51  ;;  %v9473_v9 = vand.u32 4294901760, %v9441_v50 }
  0x67   :  { %4846 = vmatpush1.bf16.msra.mxu0 %v4845_v34  ;;  %v9461_v34 = vld [vmem:[#allocation53_spill] sm:$0xff]  ;;  %v9466_v12 = vld [vmem:[#allocation84_spill] sm:$0xff]  ;;  %v548_v46 = vsub.f32 %v6279_v6, %v9471_v58  ;;  %v560_v53 = vsub.f32 %v6281_v61, %v9472_v28 }
  0x68   :  { %4848 = vmatprep.subr.bf16.mxu0 %v4847_v62  ;;  %v525_v62 = vand.u32 4294901760, %v6592_v55  ;;  %v9470_v52 = vld [vmem:[#allocation88_spill] sm:$0xff]  ;;  %v8987_v55 = vand.u32 4294901760, %v9466_v12  ;;  %v566_v16 = vsub.f32 %v9441_v50, %v9473_v9  ;;  %v8991_v9 = vand.u32 4294901760, %v9469_v32 }
  0x69   :  { %v549_v20 = vand.u32 4294901760, %v548_v46  ;;  %v561_v51 = vand.u32 4294901760, %v560_v53 }
  0x6a   :  { %v584_v22 = vsub.f32 %v9466_v12, %v8987_v55  ;;  %v567_v33 = vand.u32 4294901760, %v566_v16  ;;  %v596_v55 = vsub.f32 %v9469_v32, %v8991_v9  ;;  %v9517_v9 = vld [vmem:[#allocation61_spill] sm:$0xff] }
  0x6b   :  { %4850 = vmatpush1.bf16.msra.mxu0 %v4849_v59  ;;  %v9465_v59 = vld [vmem:[#allocation82_spill] sm:$0xff]  ;;  %v4865_v46 = vpack.c.bf16 %v561_v51, %v549_v20  ;;  %v9477_v51 = vpack.c.bf16 %v5957_v26, %v5952_v27 }
  0x6c   :  { %4852 = vmatprep.subr.bf16.mxu0 %v4851_v36  ;;  %v555_v36 = vand.u32 4294901760, %v554_v10  ;;  %v8988_v49 = vand.u32 4294901760, %v9465_v59  ;;  %v9474_v10 = vand.u32 4294901760, %v9445_v4 }
  0x6e   :  { %v578_v58 = vsub.f32 %v9445_v4, %v9474_v10  ;;  %v4863_v11 = vpack.c.bf16 %v555_v36, %v543_v13  ;;  %v8990_v10 = vand.u32 4294901760, %v9470_v52  ;;  %v585_v36 = vand.u32 4294901760, %v584_v22 }
  0x6f   :  { %4854 = vmatpush1.bf16.msra.mxu0 %v4853_v5  ;;  %v4861_v5 = vpack.c.bf16 %v537_v19, %v525_v62  ;;  %v9475_v19 = vand.u32 4294901760, %v9467_v39  ;;  %v9485_v22 = vpack.c.bf16 %v9443_v54, %v9442_v56 }
  0x70   :  { %4856 = vmatprep.subr.bf16.mxu0 %v4855_v44  ;;  %v572_v44 = vsub.f32 %v9465_v59, %v8988_v49  ;;  %v579_v28 = vand.u32 4294901760, %v578_v58 }
  0x71   :  { %v590_v53 = vsub.f32 %v9467_v39, %v9475_v19  ;;  %v597_v39 = vand.u32 4294901760, %v596_v55  ;;  %v9481_v55 = vpack.c.bf16 %v9437_v31, %v5982_v3 }
  0x72   :  { %v573_v62 = vand.u32 4294901760, %v572_v44  ;;  %v4867_v16 = vpack.c.bf16 %v579_v28, %v567_v33  ;;  %v9478_v44 = vld [vmem:[#allocation71_spill] sm:$0xff]  ;;  %v9479_v33 = vpack.c.bf16 %v5977_v1, %v5972_v0  ;;  %v9480_v28 = vld [vmem:[#allocation66_spill] sm:$0xff] }
  0x73   :  { %4858 = vmatpush1.bf16.msra.mxu0 %v4857_v14  ;;  %v9476_v14 = vand.u32 4294901760, %v9468_v15  ;;  %v591_v58 = vand.u32 4294901760, %v590_v53  ;;  %v9486_v53 = vpack.c.bf16 %v6049_v18, %v6046_v57 }
  0x74   :  { %4860 = vmatprep.subr.bf16.mxu0 %v4859_v45  ;;  %v608_v45 = vsub.f32 %v9470_v52, %v8990_v10  ;;  %v4869_v49 = vpack.c.bf16 %v585_v36, %v573_v62  ;;  %v9489_v62 = vld [vmem:[#allocation25_spill] sm:$0xff]  ;;  %v9490_v36 = vld [vmem:[#allocation24_spill] sm:$0xff] }
  0x75   :  { %v602_v13 = vsub.f32 %v9468_v15, %v9476_v14 }
  0x76   :  { %v609_v14 = vand.u32 4294901760, %v608_v45  ;;  %v9491_v45 = vpack.c.bf16 %v9489_v62, %v9490_v36 }
  0x77   :  { %4862 = vmatpush1.bf16.msra.mxu0 %v4861_v5  ;;  %v603_v19 = vand.u32 4294901760, %v602_v13  ;;  %v9487_v13 = vld [vmem:[#allocation21_spill] sm:$0xff] }
  0x78   :  { %4864 = vmatprep.subr.bf16.mxu0 %v4863_v11  ;;  %v4873_v20 = vpack.c.bf16 %v609_v14, %v597_v39  ;;  %v9482_v39 = vpack.c.bf16 %v9439_v8, %v9438_v24  ;;  %v9484_v11 = vpack.c.bf16 %v6029_v37, %v6024_v47  ;;  %v9495_v14 = vld [vmem:[#allocation29_spill] sm:$0xff] }
  0x79   :  { %v4871_v5 = vpack.c.bf16 %v603_v19, %v591_v58  ;;  %v9493_v58 = vld [vmem:[#allocation26_spill] sm:$0xff] }
  0x7b   :  { %4866 = vmatpush1.bf16.msra.mxu0 %v4865_v46  ;;  %v9488_v46 = vpack.c.bf16 %v6058_v21, %v9487_v13 }
  0x7c   :  { %4868 = vmatprep.subr.bf16.mxu0 %v4867_v16  ;;  %v9492_v16 = vld [vmem:[#allocation27_spill] sm:$0xff] }
  0x7d   :  { %v9494_v19 = vpack.c.bf16 %v9492_v16, %v9493_v58 }
  0x7f   :  { %4870 = vmatpush1.bf16.msra.mxu0 %v4869_v49  ;;  %v9483_v49 = vpack.c.bf16 %v6019_v60, %v9440_v42 }
  0x80   :  { %4872 = vmatprep.subr.bf16.mxu0 %v4871_v5  ;;  %v9496_v5 = vld [vmem:[#allocation28_spill] sm:$0xff] }
  0x83   :  { %4874 = vmatpush1.bf16.msra.mxu0 %v4873_v20  ;;  %v9497_v20 = vpack.c.bf16 %v9495_v14, %v9496_v5 }
  0x84   :  { %4876 = vmatprep.subr.bf16.mxu0 %v9477_v51  ;;  %v9498_v51 = vld [vmem:[#allocation31_spill] sm:$0xff] }
  0x86   :  { %614 = vmatmul.mubr.f32.vlgmr.msra.gmra.mrb[0].mxu0 %v9478_v44 }
  0x87   :  { %4878 = vmatpush1.bf16.msra.mxu0 %v9479_v33  ;;  %814 = vmatprep.mubr.f32.mxu0 %v9480_v28  ;;  %v9499_v33 = vld [vmem:[#allocation30_spill] sm:$0xff] }
  0x88   :  { %4880 = vmatprep.subr.bf16.mxu0 %v9481_v55  ;;  %v9500_v55 = vpack.c.bf16 %v9498_v51, %v9499_v33 }
  0x8b   :  { %4882 = vmatpush1.bf16.msra.mxu0 %v9482_v39  ;;  %v9501_v39 = vld [vmem:[#allocation34_spill] sm:$0xff] }
  0x8c   :  { %4884 = vmatprep.subr.bf16.mxu0 %v9483_v49  ;;  %v9502_v49 = vld [vmem:[#allocation32_spill] sm:$0xff] }
  0x8f   :  { %4886 = vmatpush1.bf16.msra.mxu0 %v9484_v11  ;;  %v9503_v11 = vpack.c.bf16 %v9501_v39, %v9502_v49 }
  0x90   :  { %4888 = vmatprep.subr.bf16.mxu0 %v9485_v22  ;;  %v9504_v22 = vld [vmem:[#allocation37_spill] sm:$0xff] }
  0x93   :  { %4890 = vmatpush1.bf16.msra.mxu0 %v9486_v53  ;;  %v9505_v53 = vld [vmem:[#allocation36_spill] sm:$0xff] }
  0x94   :  { %4892 = vmatprep.subr.bf16.mxu0 %v9488_v46  ;;  %v9506_v46 = vpack.c.bf16 %v9504_v22, %v9505_v53 }
  0x97   :  { %4894 = vmatpush1.bf16.msra.mxu0 %v9491_v45  ;;  %v9507_v45 = vpack.c.bf16 %v9399_v23, %v9451_v40 }
  0x98   :  { %4896 = vmatprep.subr.bf16.mxu0 %v9494_v19  ;;  %v9508_v19 = vpack.c.bf16 %v9453_v63, %v9452_v38 }
  0x9b   :  { %4898 = vmatpush1.bf16.msra.mxu0 %v9497_v20  ;;  %v9509_v20 = vpack.c.bf16 %v9455_v2, %v9454_v41 }
  0x9c   :  { %4900 = vmatprep.subr.bf16.mxu0 %v9500_v55  ;;  %v9510_v55 = vpack.c.bf16 %v9457_v30, %v9456_v7  ;;  %v9520_v30 = vld [vmem:[#allocation65_spill] sm:$0xff] }
  0x9f   :  { %4902 = vmatpush1.bf16.msra.mxu0 %v9503_v11  ;;  %v9511_v11 = vpack.c.bf16 %v9459_v43, %v9458_v35  ;;  %v9523_v35 = vld [vmem:[#allocation69_spill] sm:$0xff] }
  0xa0   :  { %4904 = vmatprep.subr.bf16.mxu0 %v9506_v46  ;;  %v9512_v46 = vpack.c.bf16 %v9461_v34, %v9460_v29  ;;  %v9526_v29 = vld [vmem:[#allocation73_spill] sm:$0xff] }
  0xa3   :  { %4906 = vmatpush1.bf16.msra.mxu0 %v9507_v45  ;;  %v9513_v45 = vpack.c.bf16 %v9463_v48, %v9462_v25 }
  0xa4   :  { %4908 = vmatprep.subr.bf16.mxu0 %v9508_v19  ;;  %v9514_v19 = vld [vmem:[#allocation58_spill] sm:$0xff] }
  0xa5   :  { %v9515_v10 = vpack.c.bf16 %v9421_v17, %v9514_v19 }
  0xa7   :  { %4910 = vmatpush1.bf16.msra.mxu0 %v9509_v20  ;;  %v9516_v20 = vld [vmem:[#allocation62_spill] sm:$0xff] }
  0xa8   :  { %4912 = vmatprep.subr.bf16.mxu0 %v9510_v55  ;;  %v9518_v44 = vpack.c.bf16 %v9516_v20, %v9517_v9  ;;  %v9519_v55 = vld [vmem:[#allocation67_spill] sm:$0xff] }
  0xa9   :  { %v9521_v43 = vpack.c.bf16 %v9519_v55, %v9520_v30 }
  0xab   :  { %4914 = vmatpush1.bf16.msra.mxu0 %v9511_v11  ;;  %v9522_v11 = vld [vmem:[#allocation70_spill] sm:$0xff] }
  0xac   :  { %4916 = vmatprep.subr.bf16.mxu0 %v9512_v46  ;;  %v9524_v34 = vpack.c.bf16 %v9522_v11, %v9523_v35  ;;  %v9525_v46 = vld [vmem:[#allocation74_spill] sm:$0xff] }
  0xad   :  { %v9527_v48 = vpack.c.bf16 %v9525_v46, %v9526_v29 }
  0xaf   :  { %4918 = vmatpush1.bf16.msra.mxu0 %v9513_v45  ;;  %v9528_v45 = vpack.c.bf16 %v6281_v61, %v6279_v6  ;;  %v9535_v61 = vld [vmem:[#allocation80_spill] sm:$0xff] }
  0xb0   :  { %4920 = vmatprep.subr.bf16.mxu0 %v9515_v10  ;;  %v9529_v10 = vpack.c.bf16 %v9445_v4, %v9441_v50  ;;  %v9538_v4 = vld [vmem:[#allocation4_spill] sm:$0xff] }
  0xb3   :  { %4922 = vmatpush1.bf16.msra.mxu0 %v9518_v44  ;;  %v9530_v44 = vpack.c.bf16 %v9466_v12, %v9465_v59  ;;  %v9540_v12 = vld [vmem:[#allocation6_spill] sm:$0xff] }
  0xb4   :  { %4924 = vmatprep.subr.bf16.mxu0 %v9521_v43  ;;  %v9531_v43 = vld [vmem:[#allocation85_spill] sm:$0xff] }
  0xb5   :  { %v9532_v11 = vpack.c.bf16 %v9468_v15, %v9531_v43  ;;  %v9542_v15 = vld [vmem:[#allocation8_spill] sm:$0xff] }
  0xb7   :  { %4926 = vmatpush1.bf16.msra.mxu0 %v9524_v34  ;;  %v9533_v34 = vpack.c.bf16 %v9470_v52, %v9469_v32  ;;  %v9545_v52 = vld [vmem:[#allocation11_spill] sm:$0xff] }
  0xb8   :  { %4928 = vmatprep.subr.bf16.mxu0 %v9527_v48  ;;  %v9534_v48 = vld [vmem:[#allocation2_spill] sm:$0xff] }
  0xbb   :  { %4930 = vmatpush1.bf16.msra.mxu0 %v9528_v45  ;;  %v9536_v45 = vld [vmem:[#allocation3_spill] sm:$0xff] }
  0xbc   :  { %4932 = vmatprep.subr.bf16.mxu0 %v9529_v10  ;;  %v9537_v10 = vand.u32 4294901760, %v9480_v28  ;;  %v9547_v28 = vld [vmem:[#allocation15_spill] sm:$0xff] }
  0xbf   :  { %4934 = vmatpush1.bf16.msra.mxu0 %v9530_v44  ;;  %v9539_v44 = vld [vmem:[#allocation5_spill] sm:$0xff] }
  0xc0   :  { %4936 = vmatprep.subr.bf16.mxu0 %v9532_v11  ;;  %v9541_v11 = vld [vmem:[#allocation7_spill] sm:$0xff] }
  0xc3   :  { %4938 = vmatpush1.bf16.msra.mxu0 %v9533_v34  ;;  %v9543_v34 = vld [vmem:[#allocation9_spill] sm:$0xff] }
  0xc4   :  { %4940 = vmatprep.subr.bf16.mxu0 %v9534_v48  ;;  %v9544_v48 = vld [vmem:[#allocation10_spill] sm:$0xff] }
  0xc6   :  { %817 = vmatmul.mubr.f32.vlgmr.msra.gmra.mrb[0].mxu0 %v9535_v61 }
  0xc7   :  { %4942 = vmatpush1.bf16.msra.mxu0 %v9536_v45  ;;  %954 = vmatprep.mubr.f32.mxu0 %v9537_v10  ;;  %v9546_v45 = vld [vmem:[#allocation12_spill] sm:$0xff]  ;;  %v9548_v10 = vld [vmem:[#allocation17_spill] sm:$0xff] }
  0xc8   :  { %4944 = vmatprep.subr.bf16.mxu0 %v9538_v4  ;;  %v9549_v4 = vld [vmem:[#allocation22_spill] sm:$0xff] }
  0xcb   :  { %4946 = vmatpush1.bf16.msra.mxu0 %v9539_v44  ;;  %v9550_v44 = vld [vmem:[#allocation23_spill] sm:$0xff] }
  0xcc   :  { %4948 = vmatprep.subr.bf16.mxu0 %v9540_v12  ;;  %v9551_v12 = vld [vmem:[#allocation33_spill] sm:$0xff] }
  0xcf   :  { %4950 = vmatpush1.bf16.msra.mxu0 %v9541_v11  ;;  %v9552_v11 = vld [vmem:[#allocation35_spill] sm:$0xff] }
  0xd0   :  { %4952 = vmatprep.subr.bf16.mxu0 %v9542_v15  ;;  %v9553_v15 = vld [vmem:[#allocation42_spill] sm:$0xff] }
  0xd3   :  { %4954 = vmatpush1.bf16.msra.mxu0 %v9543_v34  ;;  %v9554_v34 = vld [vmem:[#allocation45_spill] sm:$0xff] }
  0xd4   :  { %4956 = vmatprep.subr.bf16.mxu0 %v9544_v48  ;;  %v9555_v48 = vld [vmem:[#allocation48_spill] sm:$0xff] }
  0xd7   :  { %4958 = vmatpush1.bf16.msra.mxu0 %v9545_v52  ;;  %v9556_v52 = vld [vmem:[#allocation51_spill] sm:$0xff] }
  0xd8   :  { %4960 = vmatprep.subr.bf16.mxu0 %v9546_v45  ;;  %v9557_v45 = vld [vmem:[#allocation54_spill] sm:$0xff] }
  0xdb   :  { %4962 = vmatpush1.bf16.msra.mxu0 %v9547_v28  ;;  %v9558_v28 = vld [vmem:[#allocation57_spill] sm:$0xff] }
  0xdc   :  { %4964 = vmatprep.subr.bf16.mxu0 %v9548_v10  ;;  %v9559_v10 = vld [vmem:[#allocation60_spill] sm:$0xff] }
  0xdf   :  { %4966 = vmatpush1.bf16.msra.mxu0 %v9549_v4  ;;  %v9560_v4 = vld [vmem:[#allocation63_spill] sm:$0xff] }
  0xe0   :  { %4968 = vmatprep.subr.bf16.mxu0 %v9550_v44  ;;  %v9561_v44 = vld [vmem:[#allocation68_spill] sm:$0xff] }
  0xe3   :  { %4970 = vmatpush1.bf16.msra.mxu0 %v9551_v12  ;;  %v9562_v12 = vld [vmem:[#allocation72_spill] sm:$0xff] }
  0xe4   :  { %4972 = vmatprep.subr.bf16.mxu0 %v9552_v11  ;;  %v9563_v11 = vld [vmem:[#allocation75_spill] sm:$0xff] }
  0xe7   :  { %4974 = vmatpush1.bf16.msra.mxu0 %v9553_v15  ;;  %v9564_v15 = vld [vmem:[#allocation77_spill] sm:$0xff] }
  0xe8   :  { %4976 = vmatprep.subr.bf16.mxu0 %v9554_v34  ;;  %v9565_v34 = vld [vmem:[#allocation81_spill] sm:$0xff] }
  0xeb   :  { %4978 = vmatpush1.bf16.msra.mxu0 %v9555_v48  ;;  %v9566_v48 = vld [vmem:[#allocation83_spill] sm:$0xff] }
  0xec   :  { %4980 = vmatprep.subr.bf16.mxu0 %v9556_v52 }
  0xef   :  { %4982 = vmatpush1.bf16.msra.mxu0 %v9557_v45  ;;  %v9567_v45 = vand.u32 4294901760, %v5952_v27  ;;  %v9576_v27 = vand.u32 4294901760, %v9439_v8 }
  0xf0   :  { %4984 = vmatprep.subr.bf16.mxu0 %v9558_v28  ;;  %v9568_v28 = vand.u32 4294901760, %v5957_v26  ;;  %v9575_v26 = vand.u32 4294901760, %v9438_v24 }
  0xf2   :  { %v5003_v52 = vpack.c.bf16 %v9568_v28, %v9567_v45  ;;  %v5009_v45 = vpack.c.bf16 %v9576_v27, %v9575_v26 }
  0xf3   :  { %4986 = vmatpush1.bf16.msra.mxu0 %v9559_v10  ;;  %v9569_v10 = vld [vmem:[#allocation86_spill] sm:$0xff] }
  0xf4   :  { %4988 = vmatprep.subr.bf16.mxu0 %v9560_v4  ;;  %v9570_v4 = vand.u32 4294901760, %v5972_v0  ;;  %v9577_v0 = vand.u32 4294901760, %v9440_v42 }
  0xf7   :  { %4990 = vmatpush1.bf16.msra.mxu0 %v9561_v44  ;;  %v9571_v44 = vand.u32 4294901760, %v5977_v1  ;;  %v9578_v1 = vand.u32 4294901760, %v6019_v60  ;;  %v1379_v60 = vld [vmem:[%s8793_s2] sm:$0xff] }
  0xf8   :  { %4992 = vmatprep.subr.bf16.mxu0 %v9562_v12 }
  0xf9   :  { %v5005_v12 = vpack.c.bf16 %v9571_v44, %v9570_v4  ;;  %v5011_v4 = vpack.c.bf16 %v9578_v1, %v9577_v0  ;;  %v1476_v44 = vand.u32 4294901760, %v1379_v60  ;;  %v6900_v1 = vld [vmem:[%s8793_s2 + $0x280] sm:$0xff] }
  0xfb   :  { %4994 = vmatpush1.bf16.msra.mxu0 %v9563_v11  ;;  %v9572_v11 = vand.u32 4294901760, %v5982_v3  ;;  %v9580_v3 = vand.u32 4294901760, %v6029_v37  ;;  %v9583_v37 = vand.u32 4294901760, %v9443_v54  ;;  %v9585_v54 = vand.u32 4294901760, %v6049_v18 }
  0xfc   :  { %4996 = vmatprep.subr.bf16.mxu0 %v9564_v15  ;;  %v9573_v15 = vand.u32 4294901760, %v9437_v31 }
  0xff   :  { %4998 = vmatpush1.bf16.msra.mxu0 %v9565_v34  ;;  %v5007_v34 = vpack.c.bf16 %v9573_v15, %v9572_v11  ;;  %v9581_v15 = vld [vmem:[#allocation64_spill] sm:$0xff] }
 0x100   :  { %5000 = vmatprep.subr.bf16.mxu0 %v9566_v48  ;;  %v9574_v48 = vand.u32 4294901760, %v9535_v61  ;;  %v1395_v61 = vld [vmem:[%s8793_s2 + $0x80] sm:$0xff]  ;;  %v1397_v11 = vld [vmem:[%s8793_s2 + $0x90] sm:$0xff] }
 0x101   :  { %v1524_v8 = vand.u32 4294901760, %v1395_v61  ;;  %v1530_v27 = vand.u32 4294901760, %v1397_v11 }
 0x103   :  { %5002 = vmatpush1.bf16.msra.mxu0 %v9569_v10  ;;  %v6929_v10 = vld [vmem:[%s8793_s2 + $0x208] sm:$0xff] }
 0x104   :  { %5004 = vmatprep.subr.bf16.mxu0 %v5003_v52  ;;  %v9579_v52 = vand.u32 4294901760, %v6024_v47  ;;  %v9582_v47 = vand.u32 4294901760, %v9442_v56  ;;  %v9584_v56 = vand.u32 4294901760, %v6046_v57  ;;  %v1381_v57 = vld [vmem:[%s8793_s2 + $0x10] sm:$0xff] }
 0x106   :  { %958 = vmatmul.mubr.f32.vlgmr.msra.gmra.mrb[0].mxu0 %v9574_v48  ;;  %v5013_v31 = vpack.c.bf16 %v9580_v3, %v9579_v52  ;;  %v5015_v24 = vpack.c.bf16 %v9583_v37, %v9582_v47  ;;  %v1380_v48 = vld [vmem:[%s8793_s2 + $0x8] sm:$0xff]  ;;  %v6895_v28 = vpack.c.bf16 %v9585_v54, %v9584_v56  ;;  %v6912_v3 = vsub.f32 %v1395_v61, %v1524_v8  ;;  %v1382_v56 = vld [vmem:[%s8793_s2 + $0x18] sm:$0xff]  ;;  %v6924_v54 = vld [vmem:[%s8793_s2 + $0x200] sm:$0xff] }
 0x107   :  { %5006 = vmatpush1.bf16.msra.mxu0 %v5005_v12  ;;  %1221 = vmatprep.mubr.f32.mxu0 %v9581_v15  ;;  %v1396_v12 = vld [vmem:[%s8793_s2 + $0x88] sm:$0xff]  ;;  %v1479_v26 = vand.u32 4294901760, %v1380_v48  ;;  %v6916_v37 = vsub.f32 %v1379_v60, %v1476_v44 }
 0x108   :  { %5008 = vmatprep.subr.bf16.mxu0 %v5007_v34  ;;  %v1527_v42 = vand.u32 4294901760, %v1396_v12  ;;  %v1398_v34 = vld [vmem:[%s8793_s2 + $0x98] sm:$0xff]  ;;  %v6905_v52 = vld [vmem:[%s8793_s2 + $0x288] sm:$0xff] }
 0x109   :  { %v1533_v0 = vand.u32 4294901760, %v1398_v34  ;;  %9588 = vst [vmem:[#allocation14_spill] sm:$0xff] %v6916_v37  ;;  %v6931_v61 = vpack.c.bf16 %v1479_v26, %v1476_v44  ;;  %v1482_v44 = vand.u32 4294901760, %v1381_v57 }
 0x10a   :  { %v6910_v18 = vpack.c.bf16 %v1527_v42, %v1524_v8  ;;  %v6914_v47 = vsub.f32 %v1396_v12, %v1527_v42  ;;  %v6933_v12 = vsub.f32 %v1380_v48, %v1479_v26  ;;  %v6937_v8 = vsub.f32 %v1397_v11, %v1530_v27  ;;  %v1399_v42 = vld [vmem:[%s8793_s2 + $0xa0] sm:$0xff] }
 0x10b   :  { %5010 = vmatpush1.bf16.msra.mxu0 %v5009_v45  ;;  %9589 = vst [vmem:[#allocation16_spill] sm:$0xff] %v6931_v61  ;;  %v6935_v60 = vpack.c.bf16 %v1533_v0, %v1530_v27  ;;  %v6943_v37 = vsub.f32 %v1398_v34, %v1533_v0  ;;  %v9007_v45 = vand.u32 4294901760, %v6905_v52  ;;  %v9592_v48 = vand.u32 4294901760, %v9487_v13  ;;  %v1400_v34 = vld [vmem:[%s8793_s2 + $0xa8] sm:$0xff]  ;;  %v6960_v0 = vld [vmem:[%s8793_s2 + $0x290] sm:$0xff] }
 0x10c   :  { %9586 = vst [vmem:[#allocation59_spill] sm:$0xff] %v6910_v18  ;;  %9587 = vst [vmem:[#allocation13_spill] sm:$0xff] %v6914_v47  ;;  %5012 = vmatprep.subr.bf16.mxu0 %v5011_v4  ;;  %5132 = vmatprep.subr.bf16.mxu1 %v6910_v18  ;;  %v9006_v47 = vand.u32 4294901760, %v6900_v1  ;;  %v9593_v26 = vand.u32 4294901760, %v6058_v21  ;;  %v1485_v27 = vand.u32 4294901760, %v1382_v56  ;;  %v6978_v4 = vld [vmem:[%s8793_s2 + $0x298] sm:$0xff] }
 0x10d   :  { %9590 = vst [vmem:[#allocation18_spill] sm:$0xff] %v6935_v60  ;;  %9591 = vst [vmem:[#allocation78_spill] sm:$0xff] %v6937_v8  ;;  %5134 = vmatpush3.bf16.msra.mxu1 %v6931_v61  ;;  %v6971_v13 = vsub.f32 %v6905_v52, %v9007_v45  ;;  %v1383_v8 = vld [vmem:[%s8793_s2 + $0x20] sm:$0xff]  ;;  %v9597_v45 = vand.u32 4294901760, %v9490_v36  ;;  %v9602_v36 = vand.u32 4294901760, %v6929_v10 }
 0x10e   :  { %v5019_v11 = vpack.c.bf16 %v9593_v26, %v9592_v48  ;;  %5136 = vmatprep.subr.bf16.mxu1 %v6935_v60  ;;  %v6966_v21 = vsub.f32 %v6900_v1, %v9006_v47  ;;  %v6973_v48 = vsub.f32 %v1381_v57, %v1482_v44  ;;  %v1536_v26 = vand.u32 4294901760, %v1399_v42  ;;  %v1384_v47 = vld [vmem:[%s8793_s2 + $0x28] sm:$0xff] }
 0x10f   :  { %9595 = vst [vmem:[#allocation20_spill] sm:$0xff] %v6971_v13  ;;  %5014 = vmatpush1.bf16.msra.mxu0 %v5013_v31  ;;  %v9598_v57 = vand.u32 4294901760, %v9489_v62  ;;  %v6990_v61 = vpack.c.bf16 %v1485_v27, %v1482_v44  ;;  %v6992_v18 = vsub.f32 %v1382_v56, %v1485_v27  ;;  %v7007_v62 = vsub.f32 %v6929_v10, %v9602_v36  ;;  %v7015_v44 = vld [vmem:[%s8793_s2 + $0x218] sm:$0xff] }
 0x110   :  { %9594 = vst [vmem:[#allocation19_spill] sm:$0xff] %v6966_v21  ;;  %9596 = vst [vmem:[#allocation38_spill] sm:$0xff] %v6973_v48  ;;  %v9600_v48 = vand.u32 4294901760, %v6924_v54  ;;  %v7002_v21 = vld [vmem:[%s8793_s2 + $0x210] sm:$0xff]  ;;  %5016 = vmatprep.subr.bf16.mxu0 %v5015_v24  ;;  %v1539_v31 = vand.u32 4294901760, %v1400_v34  ;;  %v9605_v27 = vand.u32 4294901760, %v9493_v58 }
 0x111   :  { %v5021_v60 = vpack.c.bf16 %v9598_v57, %v9597_v45  ;;  %9599 = vst [vmem:[#allocation40_spill] sm:$0xff] %v6990_v61  ;;  %9603 = vst [vmem:[#allocation43_spill] sm:$0xff] %v7007_v62  ;;  %v7009_v45 = vsub.f32 %v1399_v42, %v1536_v26  ;;  %5138 = vmatpush3.bf16.msra.mxu1 %v6990_v61  ;;  %v9020_v57 = vand.u32 4294901760, %v6978_v4  ;;  %v1488_v36 = vand.u32 4294901760, %v1383_v8  ;;  %v1401_v42 = vld [vmem:[%s8793_s2 + $0xb0] sm:$0xff] }
 0x112   :  { %v6997_v13 = vsub.f32 %v6924_v54, %v9600_v48  ;;  %v9606_v48 = vand.u32 4294901760, %v9492_v16  ;;  %v1491_v62 = vand.u32 4294901760, %v1384_v47  ;;  %v7026_v56 = vpack.c.bf16 %v1539_v31, %v1536_v26  ;;  %v7058_v16 = vld [vmem:[%s8793_s2 + $0x2a8] sm:$0xff] }
 0x113   :  { %9604 = vst [vmem:[#allocation44_spill] sm:$0xff] %v7009_v45  ;;  %v9609_v45 = vand.u32 4294901760, %v6960_v0  ;;  %5018 = vmatpush1.bf16.msra.mxu0 %v6895_v28  ;;  %v1385_v28 = vld [vmem:[%s8793_s2 + $0x30] sm:$0xff]  ;;  %v9614_v61 = vand.u32 4294901760, %v9496_v5  ;;  %v9619_v5 = vand.u32 4294901760, %v9499_v33 }
 0x114   :  { %9601 = vst [vmem:[#allocation41_spill] sm:$0xff] %v6997_v13  ;;  %v5023_v24 = vpack.c.bf16 %v9606_v48, %v9605_v27  ;;  %9607 = vst [vmem:[#allocation46_spill] sm:$0xff] %v7026_v56  ;;  %v7028_v13 = vsub.f32 %v1400_v34, %v1539_v31  ;;  %v1402_v27 = vld [vmem:[%s8793_s2 + $0xb8] sm:$0xff]  ;;  %v7042_v48 = vld [vmem:[%s8793_s2 + $0x2a0] sm:$0xff]  ;;  %v7048_v34 = vsub.f32 %v6978_v4, %v9020_v57  ;;  %5020 = vmatprep.subr.bf16.mxu0 %v5019_v11 }
 0x115   :  { %v7033_v58 = vsub.f32 %v6960_v0, %v9609_v45  ;;  %v7050_v26 = vpack.c.bf16 %v1491_v62, %v1488_v36  ;;  %v7052_v31 = vsub.f32 %v1383_v8, %v1488_v36  ;;  %v1386_v57 = vld [vmem:[%s8793_s2 + $0x38] sm:$0xff]  ;;  %v9615_v8 = vand.u32 4294901760, %v9495_v14  ;;  %5140 = vmatprep.subr.bf16.mxu1 %v7026_v56 }
 0x116   :  { %9608 = vst [vmem:[#allocation55_spill] sm:$0xff] %v7028_v13  ;;  %9611 = vst [vmem:[#allocation87_spill] sm:$0xff] %v7048_v34  ;;  %v7071_v45 = vsub.f32 %v1384_v47, %v1491_v62  ;;  %v9617_v34 = vand.u32 4294901760, %v7002_v21  ;;  %v7081_v13 = vld [vmem:[%s8793_s2 + $0x220] sm:$0xff]  ;;  %v9620_v14 = vand.u32 4294901760, %v9498_v51  ;;  %v9621_v47 = vand.u32 4294901760, %v7015_v44 }
 0x117   :  { %9610 = vst [vmem:[#allocation82_spill] sm:$0xff] %v7033_v58  ;;  %9612 = vst [vmem:[#allocation66_spill] sm:$0xff] %v7050_v26  ;;  %v5025_v36 = vpack.c.bf16 %v9615_v8, %v9614_v61  ;;  %5142 = vmatpush3.bf16.msra.mxu1 %v7050_v26  ;;  %v1545_v62 = vand.u32 4294901760, %v1402_v27  ;;  %v9033_v56 = vand.u32 4294901760, %v7058_v16  ;;  %v7100_v51 = vld [vmem:[%s8793_s2 + $0x228] sm:$0xff]  ;;  %5022 = vmatpush1.bf16.msra.mxu0 %v5021_v60 }
 0x118   :  { %9613 = vst [vmem:[#allocation21_spill] sm:$0xff] %v7052_v31  ;;  %9616 = vst [vmem:[#allocation25_spill] sm:$0xff] %v7071_v45  ;;  %v7076_v58 = vsub.f32 %v7002_v21, %v9617_v34  ;;  %v1542_v31 = vand.u32 4294901760, %v1401_v42  ;;  %v5027_v61 = vpack.c.bf16 %v9620_v14, %v9619_v5  ;;  %v7091_v11 = vsub.f32 %v7015_v44, %v9621_v47 }
 0x119   :  { %v9035_v34 = vand.u32 4294901760, %v7042_v48  ;;  %v1497_v45 = vand.u32 4294901760, %v1386_v57  ;;  %v7104_v5 = vsub.f32 %v1402_v27, %v1545_v62  ;;  %5024 = vmatprep.subr.bf16.mxu0 %v5023_v24  ;;  %v7115_v47 = vsub.f32 %v7058_v16, %v9033_v56 }
 0x11a   :  { %9618 = vst [vmem:[#allocation24_spill] sm:$0xff] %v7076_v58  ;;  %9622 = vst [vmem:[#allocation27_spill] sm:$0xff] %v7091_v11  ;;  %v7094_v8 = vsub.f32 %v1401_v42, %v1542_v31  ;;  %v1494_v58 = vand.u32 4294901760, %v1385_v28  ;;  %v7102_v33 = vpack.c.bf16 %v1545_v62, %v1542_v31  ;;  %v9034_v42 = vand.u32 4294901760, %v7081_v13 }
 0x11b   :  { %v7109_v14 = vsub.f32 %v7042_v48, %v9035_v34  ;;  %9625 = vst [vmem:[#allocation28_spill] sm:$0xff] %v7115_v47  ;;  %v7121_v31 = vsub.f32 %v1386_v57, %v1497_v45  ;;  %v9036_v27 = vand.u32 4294901760, %v7100_v51  ;;  %5026 = vmatpush1.bf16.msra.mxu0 %v5025_v36  ;;  %v9628_v24 = vand.u32 4294901760, %v9502_v49 }
 0x11c   :  { %9623 = vst [vmem:[#allocation26_spill] sm:$0xff] %v7102_v33  ;;  %v7117_v26 = vpack.c.bf16 %v1497_v45, %v1494_v58  ;;  %v7119_v60 = vsub.f32 %v1385_v28, %v1494_v58  ;;  %5144 = vmatprep.subr.bf16.mxu1 %v7102_v33  ;;  %v7128_v62 = vsub.f32 %v7081_v13, %v9034_v42  ;;  %v9629_v56 = vand.u32 4294901760, %v9501_v39 }
 0x11d   :  { %9624 = vst [vmem:[#allocation29_spill] sm:$0xff] %v7109_v14  ;;  %v7138_v57 = vsub.f32 %v7100_v51, %v9036_v27  ;;  %5028 = vmatprep.subr.bf16.mxu0 %v5027_v61  ;;  %v9631_v45 = vand.u32 4294901760, %v9505_v53  ;;  %v9632_v28 = vand.u32 4294901760, %v9504_v22  ;;  %v9633_v34 = vand.u32 4294901760, %v9451_v40 }
 0x11e   :  { %9626 = vst [vmem:[#allocation31_spill] sm:$0xff] %v7117_v26  ;;  %9627 = vst [vmem:[#allocation30_spill] sm:$0xff] %v7128_v62  ;;  %5146 = vmatpush3.bf16.msra.mxu1 %v7117_v26  ;;  %v5029_v58 = vpack.c.bf16 %v9629_v56, %v9628_v24  ;;  %v9634_v36 = vand.u32 4294901760, %v9399_v23  ;;  %v9635_v39 = vand.u32 4294901760, %v9452_v38  ;;  %v9636_v56 = vand.u32 4294901760, %v9453_v63  ;;  %v9642_v23 = vld [vmem:[#allocation49_spill] sm:$0xff] }
 0x11f   :  { %9630 = vst [vmem:[#allocation34_spill] sm:$0xff] %v7138_v57  ;;  %v5031_v42 = vpack.c.bf16 %v9632_v28, %v9631_v45  ;;  %v9637_v61 = vand.u32 4294901760, %v9454_v41  ;;  %v9638_v53 = vand.u32 4294901760, %v9455_v2  ;;  %v9639_v22 = vand.u32 4294901760, %v9456_v7  ;;  %v9646_v63 = vld [vmem:[#allocation52_spill] sm:$0xff]  ;;  %v9773_v26 = vld [vmem:[#allocation14_spill] sm:$0xff] }
 0x120   :  { %5030 = vmatpush1.bf16.msra.mxu0 %v5029_v58  ;;  %v5033_v49 = vpack.c.bf16 %v9634_v36, %v9633_v34  ;;  %v5035_v24 = vpack.c.bf16 %v9636_v56, %v9635_v39  ;;  %v9640_v58 = vld [vmem:[#allocation47_spill] sm:$0xff]  ;;  %v9643_v34 = vand.u32 4294901760, %v9642_v23  ;;  %v9647_v36 = vand.u32 4294901760, %v9646_v63  ;;  %v9651_v56 = vld [vmem:[#allocation56_spill] sm:$0xff] }
 0x121   :  { %5032 = vmatprep.subr.bf16.mxu0 %v5031_v42  ;;  %v5037_v27 = vpack.c.bf16 %v9638_v53, %v9637_v61  ;;  %v9641_v40 = vand.u32 4294901760, %v9640_v58  ;;  %v9644_v42 = vld [vmem:[#allocation50_spill] sm:$0xff]  ;;  %v9650_v2 = vand.u32 4294901760, %v9462_v25  ;;  %v9652_v7 = vand.u32 4294901760, %v9651_v56  ;;  %v9665_v63 = vld [vmem:[#allocation76_spill] sm:$0xff] }
 0x122   :  { %v9645_v38 = vand.u32 4294901760, %v9644_v42  ;;  %v9654_v61 = vand.u32 4294901760, %v9421_v17  ;;  %v9656_v58 = vand.u32 4294901760, %v9516_v20  ;;  %v9658_v25 = vand.u32 4294901760, %v9519_v55  ;;  %v9660_v42 = vld [vmem:[#allocation70_spill] sm:$0xff] }
 0x123   :  { %v5039_v45 = vpack.c.bf16 %v9641_v40, %v9639_v22  ;;  %v9655_v22 = vand.u32 4294901760, %v9517_v9  ;;  %v9662_v17 = vand.u32 4294901760, %v9526_v29  ;;  %v9663_v9 = vand.u32 4294901760, %v9525_v46 }
 0x124   :  { %5034 = vmatpush1.bf16.msra.mxu0 %v5033_v49  ;;  %v5041_v28 = vpack.c.bf16 %v9645_v38, %v9643_v34  ;;  %v9648_v49 = vld [vmem:[#allocation53_spill] sm:$0xff]  ;;  %v9659_v34 = vand.u32 4294901760, %v9523_v35  ;;  %v9664_v20 = vand.u32 4294901760, %v6279_v6  ;;  %v9667_v55 = vand.u32 4294901760, %v9441_v50 }
 0x125   :  { %5036 = vmatprep.subr.bf16.mxu0 %v5035_v24  ;;  %v9649_v41 = vand.u32 4294901760, %v9648_v49  ;;  %v5045_v24 = vpack.c.bf16 %v9652_v7, %v9650_v2  ;;  %v5049_v40 = vpack.c.bf16 %v9656_v58, %v9655_v22  ;;  %v9668_v49 = vld [vmem:[#allocation79_spill] sm:$0xff]  ;;  %v9671_v2 = vld [vmem:[#allocation84_spill] sm:$0xff]  ;;  %v9673_v46 = vand.u32 4294901760, %v9531_v43  ;;  %v9679_v22 = vld [vmem:[#allocation2_spill] sm:$0xff] }
 0x126   :  { %v9669_v35 = vand.u32 4294901760, %v9668_v49  ;;  %v9672_v29 = vand.u32 4294901760, %v9671_v2  ;;  %v9674_v7 = vld [vmem:[#allocation39_spill] sm:$0xff]  ;;  %v9682_v43 = vld [vmem:[#allocation4_spill] sm:$0xff]  ;;  %v9701_v49 = vld [vmem:[#allocation54_spill] sm:$0xff] }
 0x127   :  { %v5043_v39 = vpack.c.bf16 %v9649_v41, %v9647_v36  ;;  %v9675_v6 = vand.u32 4294901760, %v9674_v7  ;;  %v9681_v58 = vld [vmem:[#allocation3_spill] sm:$0xff]  ;;  %v9705_v2 = vld [vmem:[#allocation68_spill] sm:$0xff]  ;;  %v9709_v7 = vld [vmem:[#allocation81_spill] sm:$0xff] }
 0x128   :  { %5038 = vmatpush1.bf16.msra.mxu0 %v5037_v27  ;;  %v9653_v27 = vand.u32 4294901760, %v9514_v19  ;;  %v9661_v19 = vand.u32 4294901760, %v9660_v42  ;;  %v5059_v41 = vpack.c.bf16 %v9669_v35, %v9667_v55  ;;  %v9689_v42 = vld [vmem:[#allocation11_spill] sm:$0xff]  ;;  %v9702_v35 = vld [vmem:[#allocation57_spill] sm:$0xff] }
 0x129   :  { %5040 = vmatprep.subr.bf16.mxu0 %v5039_v45  ;;  %v9657_v45 = vand.u32 4294901760, %v9520_v30  ;;  %v9666_v30 = vand.u32 4294901760, %v9665_v63  ;;  %v9697_v63 = vld [vmem:[#allocation42_spill] sm:$0xff]  ;;  %v9700_v55 = vld [vmem:[#allocation51_spill] sm:$0xff] }
 0x12a   :  { %v5047_v53 = vpack.c.bf16 %v9654_v61, %v9653_v27  ;;  %v5053_v38 = vpack.c.bf16 %v9661_v19, %v9659_v34  ;;  %v9676_v27 = vand.u32 4294901760, %v9469_v32  ;;  %v9677_v61 = vld [vmem:[#allocation88_spill] sm:$0xff]  ;;  %v9685_v32 = vld [vmem:[#allocation7_spill] sm:$0xff]  ;;  %v9688_v34 = vld [vmem:[#allocation10_spill] sm:$0xff] }
 0x12b   :  { %v5051_v23 = vpack.c.bf16 %v9658_v25, %v9657_v45  ;;  %v5057_v36 = vpack.c.bf16 %v9666_v30, %v9664_v20  ;;  %v9678_v50 = vand.u32 4294901760, %v9677_v61  ;;  %v9684_v45 = vld [vmem:[#allocation6_spill] sm:$0xff]  ;;  %v9686_v25 = vld [vmem:[#allocation8_spill] sm:$0xff]  ;;  %v9696_v20 = vld [vmem:[#allocation35_spill] sm:$0xff] }
 0x12c   :  { %5042 = vmatpush1.bf16.msra.mxu0 %v5041_v28  ;;  %v5055_v28 = vpack.c.bf16 %v9663_v9, %v9662_v17  ;;  %v9690_v19 = vld [vmem:[#allocation12_spill] sm:$0xff]  ;;  %v9693_v17 = vld [vmem:[#allocation22_spill] sm:$0xff]  ;;  %v9694_v9 = vld [vmem:[#allocation23_spill] sm:$0xff] }
 0x12d   :  { %5044 = vmatprep.subr.bf16.mxu0 %v5043_v39  ;;  %v9670_v39 = vand.u32 4294901760, %v9465_v59  ;;  %v9680_v59 = vld [vmem:[#allocation71_spill] sm:$0xff]  ;;  %v9698_v30 = vld [vmem:[#allocation45_spill] sm:$0xff] }
 0x12f   :  { %v5061_v56 = vpack.c.bf16 %v9672_v29, %v9670_v39  ;;  %v9704_v39 = vld [vmem:[#allocation63_spill] sm:$0xff]  ;;  %v9706_v29 = vld [vmem:[#allocation72_spill] sm:$0xff] }
 0x130   :  { %5046 = vmatpush1.bf16.msra.mxu0 %v5045_v24  ;;  %v5063_v24 = vpack.c.bf16 %v9675_v6, %v9673_v46  ;;  %v9708_v46 = vld [vmem:[#allocation77_spill] sm:$0xff]  ;;  %v9710_v6 = vld [vmem:[#allocation83_spill] sm:$0xff] }
 0x131   :  { %5048 = vmatprep.subr.bf16.mxu0 %v5047_v53  ;;  %v5065_v53 = vpack.c.bf16 %v9678_v50, %v9676_v27  ;;  %v9712_v27 = vand.u32 4294901760, %v6905_v52  ;;  %v9714_v50 = vld [vmem:[#allocation86_spill] sm:$0xff]  ;;  %v9722_v52 = vand.u32 4294901760, %v7015_v44  ;;  %v1404_v44 = vld [vmem:[%s8793_s2 + $0xc8] sm:$0xff] }
 0x134   :  { %5050 = vmatpush1.bf16.msra.mxu0 %v5049_v40  ;;  %v9683_v40 = vld [vmem:[#allocation5_spill] sm:$0xff] }
 0x135   :  { %5052 = vmatprep.subr.bf16.mxu0 %v5051_v23  ;;  %v9687_v23 = vld [vmem:[#allocation9_spill] sm:$0xff] }
 0x138   :  { %5054 = vmatpush1.bf16.msra.mxu0 %v5053_v38  ;;  %v9691_v38 = vld [vmem:[#allocation15_spill] sm:$0xff] }
 0x139   :  { %5056 = vmatprep.subr.bf16.mxu0 %v5055_v28  ;;  %v9695_v28 = vld [vmem:[#allocation33_spill] sm:$0xff] }
 0x13c   :  { %5058 = vmatpush1.bf16.msra.mxu0 %v5057_v36  ;;  %v9699_v36 = vld [vmem:[#allocation48_spill] sm:$0xff] }
 0x13d   :  { %5060 = vmatprep.subr.bf16.mxu0 %v5059_v41  ;;  %v9703_v41 = vld [vmem:[#allocation60_spill] sm:$0xff] }
 0x140   :  { %5062 = vmatpush1.bf16.msra.mxu0 %v5061_v56  ;;  %v9707_v56 = vld [vmem:[#allocation75_spill] sm:$0xff] }
 0x141   :  { %5064 = vmatprep.subr.bf16.mxu0 %v5063_v24  ;;  %v9711_v24 = vand.u32 4294901760, %v6900_v1  ;;  %v9721_v1 = vand.u32 4294901760, %v7002_v21  ;;  %v1403_v21 = vld [vmem:[%s8793_s2 + $0xc0] sm:$0xff] }
 0x143   :  { %v7249_v61 = vpack.c.bf16 %v9712_v27, %v9711_v24  ;;  %v1451_v27 = vld [vmem:[%s8793_s2 + $0x240] sm:$0xff] }
 0x144   :  { %5066 = vmatpush1.bf16.msra.mxu0 %v5065_v53  ;;  %v9715_v53 = vand.u32 4294901760, %v6924_v54  ;;  %v7271_v54 = vpack.c.bf16 %v9722_v52, %v9721_v1 }
 0x145   :  { %5068 = vmatprep.subr.bf16.mxu0 %v9679_v22  ;;  %9713 = vst [vmem:[#allocation32_spill] sm:$0xff] %v7249_v61  ;;  %v9716_v22 = vand.u32 4294901760, %v6929_v10  ;;  %v9724_v10 = vand.u32 4294901760, %v7042_v48  ;;  %v1551_v48 = vand.u32 4294901760, %v1404_v44 }
 0x146   :  { %9723 = vst [vmem:[#allocation58_spill] sm:$0xff] %v7271_v54 }
 0x147   :  { %1223 = vmatmul.mubr.f32.vlgmr.msra.gmra.mrb[0].mxu0 %v9680_v59  ;;  %v7353_v52 = vsub.f32 %v1404_v44, %v1551_v48  ;;  %v1408_v44 = vld [vmem:[%s8793_s2 + $0xe8] sm:$0xff] }
 0x148   :  { %5070 = vmatpush1.bf16.msra.mxu0 %v9681_v58  ;;  %1358 = vmatprep.mubr.f32.mxu0 %v9581_v15  ;;  %v9692_v15 = vld [vmem:[#allocation17_spill] sm:$0xff]  ;;  %v7256_v58 = vpack.c.bf16 %v9716_v22, %v9715_v53 }
 0x149   :  { %5072 = vmatprep.subr.bf16.mxu0 %v9682_v43  ;;  %v9718_v43 = vand.u32 4294901760, %v6960_v0  ;;  %v9725_v0 = vand.u32 4294901760, %v7058_v16  ;;  %v1548_v16 = vand.u32 4294901760, %v1403_v21 }
 0x14a   :  { %9717 = vst [vmem:[#allocation37_spill] sm:$0xff] %v7256_v58 }
 0x14b   :  { %v7351_v1 = vsub.f32 %v1403_v21, %v1548_v16  ;;  %v1407_v21 = vld [vmem:[%s8793_s2 + $0xe0] sm:$0xff] }
 0x14c   :  { %5074 = vmatpush1.bf16.msra.mxu0 %v9683_v40  ;;  %v9719_v40 = vand.u32 4294901760, %v6978_v4  ;;  %v9727_v4 = vand.u32 4294901760, %v7081_v13  ;;  %v1465_v13 = vld [vmem:[%s8793_s2 + $0x2b0] sm:$0xff] }
 0x14d   :  { %5076 = vmatprep.subr.bf16.mxu0 %v9684_v45 }
 0x14e   :  { %v7263_v45 = vpack.c.bf16 %v9719_v40, %v9718_v43  ;;  %v3224_v43 = vand.u32 4294901760, %v1451_v27 }
 0x150   :  { %5078 = vmatpush1.bf16.msra.mxu0 %v9685_v32  ;;  %9720 = vst [vmem:[#allocation36_spill] sm:$0xff] %v7263_v45  ;;  %v7278_v32 = vpack.c.bf16 %v9725_v0, %v9724_v10 }
 0x151   :  { %5080 = vmatprep.subr.bf16.mxu0 %v9686_v25 }
 0x152   :  { %9726 = vst [vmem:[#allocation62_spill] sm:$0xff] %v7278_v32 }
 0x154   :  { %5082 = vmatpush1.bf16.msra.mxu0 %v9687_v23  ;;  %v3266_v23 = vand.u32 4294901760, %v1465_v13 }
 0x155   :  { %5084 = vmatprep.subr.bf16.mxu0 %v9688_v34  ;;  %v1387_v34 = vld [vmem:[%s8793_s2 + $0x40] sm:$0xff] }
 0x156   :  { %v7355_v10 = vsub.f32 %v1465_v13, %v3266_v23 }
 0x158   :  { %5086 = vmatpush1.bf16.msra.mxu0 %v9689_v42  ;;  %v1388_v42 = vld [vmem:[%s8793_s2 + $0x48] sm:$0xff]  ;;  %9735 = vst [vmem:[#allocation85_spill] sm:$0xff] %v7355_v10 }
 0x159   :  { %5088 = vmatprep.subr.bf16.mxu0 %v9690_v19 }
 0x15c   :  { %5090 = vmatpush1.bf16.msra.mxu0 %v9691_v38  ;;  %v1500_v38 = vand.u32 4294901760, %v1387_v34 }
 0x15d   :  { %5092 = vmatprep.subr.bf16.mxu0 %v9692_v15  ;;  %v1503_v15 = vand.u32 4294901760, %v1388_v42 }
 0x160   :  { %5094 = vmatpush1.bf16.msra.mxu0 %v9693_v17  ;;  %v1449_v17 = vld [vmem:[%s8793_s2 + $0x230] sm:$0xff] }
 0x161   :  { %5096 = vmatprep.subr.bf16.mxu0 %v9694_v9  ;;  %v1450_v9 = vld [vmem:[%s8793_s2 + $0x238] sm:$0xff] }
 0x164   :  { %5098 = vmatpush1.bf16.msra.mxu0 %v9695_v28  ;;  %v7313_v28 = vpack.c.bf16 %v1551_v48, %v1548_v16 }
 0x165   :  { %5100 = vmatprep.subr.bf16.mxu0 %v9696_v20  ;;  %v3218_v20 = vand.u32 4294901760, %v1449_v17 }
 0x166   :  { %9730 = vst [vmem:[#allocation67_spill] sm:$0xff] %v7313_v28  ;;  %5148 = vmatprep.subr.bf16.mxu1 %v7313_v28 }
 0x168   :  { %5102 = vmatpush1.bf16.msra.mxu0 %v9697_v63  ;;  %v3221_v63 = vand.u32 4294901760, %v1450_v9 }
 0x169   :  { %5104 = vmatprep.subr.bf16.mxu0 %v9698_v30 }
 0x16c   :  { %5106 = vmatpush1.bf16.msra.mxu0 %v9699_v36  ;;  %v7317_v36 = vpack.c.bf16 %v1503_v15, %v1500_v38 }
 0x16d   :  { %5108 = vmatprep.subr.bf16.mxu0 %v9700_v55  ;;  %v1405_v55 = vld [vmem:[%s8793_s2 + $0xd0] sm:$0xff] }
 0x16e   :  { %9732 = vst [vmem:[#allocation69_spill] sm:$0xff] %v7317_v36  ;;  %5150 = vmatpush3.bf16.msra.mxu1 %v7317_v36 }
 0x170   :  { %5110 = vmatpush1.bf16.msra.mxu0 %v9701_v49  ;;  %v1406_v49 = vld [vmem:[%s8793_s2 + $0xd8] sm:$0xff] }
 0x171   :  { %5112 = vmatprep.subr.bf16.mxu0 %v9702_v35  ;;  %v1467_v35 = vld [vmem:[%s8793_s2 + $0x2c0] sm:$0xff] }
 0x174   :  { %5114 = vmatpush1.bf16.msra.mxu0 %v9703_v41  ;;  %v7329_v41 = vpack.c.bf16 %v3221_v63, %v3218_v20 }
 0x175   :  { %5116 = vmatprep.subr.bf16.mxu0 %v9704_v39  ;;  %v1554_v39 = vand.u32 4294901760, %v1405_v55 }
 0x176   :  { %9733 = vst [vmem:[#allocation74_spill] sm:$0xff] %v7329_v41 }
 0x177   :  { %v7374_v13 = vsub.f32 %v1405_v55, %v1554_v39 }
 0x178   :  { %5118 = vmatpush1.bf16.msra.mxu0 %v9705_v2  ;;  %v1557_v2 = vand.u32 4294901760, %v1406_v49 }
 0x179   :  { %5120 = vmatprep.subr.bf16.mxu0 %v9706_v29  ;;  %v1468_v29 = vld [vmem:[%s8793_s2 + $0x2c8] sm:$0xff] }
 0x17a   :  { %v7349_v53 = vpack.c.bf16 %v1557_v2, %v1554_v39  ;;  %v7376_v16 = vsub.f32 %v1406_v49, %v1557_v2  ;;  %v7411_v49 = vsub.f32 %v1451_v27, %v3224_v43  ;;  %v1560_v39 = vand.u32 4294901760, %v1407_v21  ;;  %v1409_v27 = vld [vmem:[%s8793_s2 + $0xf0] sm:$0xff] }
 0x17b   :  { %v1563_v2 = vand.u32 4294901760, %v1408_v44 }
 0x17c   :  { %5122 = vmatpush1.bf16.msra.mxu0 %v9707_v56  ;;  %v1389_v56 = vld [vmem:[%s8793_s2 + $0x50] sm:$0xff]  ;;  %9734 = vst [vmem:[#allocation73_spill] sm:$0xff] %v7349_v53  ;;  %5152 = vmatprep.subr.bf16.mxu1 %v7349_v53  ;;  %9746 = vst [vmem:[#allocation79_spill] sm:$0xff] %v7411_v49  ;;  %v9123_v49 = vand.u32 4294901760, %v7374_v13 }
 0x17d   :  { %5124 = vmatprep.subr.bf16.mxu0 %v9708_v46  ;;  %v1390_v46 = vld [vmem:[%s8793_s2 + $0x58] sm:$0xff]  ;;  %v1506_v24 = vand.u32 4294901760, %v1389_v56 }
 0x17e   :  { %v1509_v22 = vand.u32 4294901760, %v1390_v46 }
 0x180   :  { %5126 = vmatpush1.bf16.msra.mxu0 %v9709_v7  ;;  %v3272_v7 = vand.u32 4294901760, %v1467_v35 }
 0x181   :  { %5128 = vmatprep.subr.bf16.mxu0 %v9710_v6  ;;  %v3275_v6 = vand.u32 4294901760, %v1468_v29 }
 0x183   :  { %v7378_v48 = vpack.c.bf16 %v3275_v6, %v3272_v7 }
 0x184   :  { %5130 = vmatpush1.bf16.msra.mxu0 %v9714_v50  ;;  %v1452_v50 = vld [vmem:[%s8793_s2 + $0x248] sm:$0xff] }
 0x185   :  { %5516 = vmatprep.subr.bf16.mxu0 %v7249_v61  ;;  %v3227_v40 = vand.u32 4294901760, %v1452_v50  ;;  %9739 = vst [vmem:[#allocation49_spill] sm:$0xff] %v7378_v48 }
 0x187   :  { %1360 = vmatmul.mubr.f32.vlgmr.msra.gmra.mrb[0].mxu0 %v9680_v59  ;;  %v9728_v59 = vand.u32 4294901760, %v7100_v51  ;;  %v1466_v51 = vld [vmem:[%s8793_s2 + $0x2b8] sm:$0xff]  ;;  %v7409_v55 = vpack.c.bf16 %v3227_v40, %v3224_v43  ;;  %v7425_v43 = vpack.c.bf16 %v1563_v2, %v1560_v39 }
 0x188   :  { %5518 = vmatpush3.bf16.msra.mxu0 %v7256_v58  ;;  %v3269_v19 = vand.u32 4294901760, %v1466_v51 }
 0x189   :  { %5520 = vmatprep.subr.bf16.mxu0 %v7263_v45  ;;  %v7285_v25 = vpack.c.bf16 %v9728_v59, %v9727_v4  ;;  %v7359_v4 = vsub.f32 %v1387_v34, %v1500_v38  ;;  %v7361_v59 = vsub.f32 %v1388_v42, %v1503_v15  ;;  %v1470_v34 = vld [vmem:[%s8793_s2 + $0x2d8] sm:$0xff]  ;;  %v1391_v42 = vld [vmem:[%s8793_s2 + $0x60] sm:$0xff]  ;;  %v7393_v38 = vpack.c.bf16 %v1509_v22, %v1506_v24  ;;  %v1456_v45 = vld [vmem:[%s8793_s2 + $0x268] sm:$0xff] }
 0x18a   :  { %v7315_v30 = vpack.c.bf16 %v3269_v19, %v3266_v23  ;;  %v7357_v0 = vsub.f32 %v1466_v51, %v3269_v19  ;;  %v7380_v51 = vsub.f32 %v1467_v35, %v3272_v7  ;;  %v1469_v23 = vld [vmem:[%s8793_s2 + $0x2d0] sm:$0xff]  ;;  %v7391_v19 = vsub.f32 %v1468_v29, %v3275_v6  ;;  %9745 = vst [vmem:[#allocation76_spill] sm:$0xff] %v7409_v55 }
 0x18b   :  { %9729 = vst [vmem:[#allocation61_spill] sm:$0xff] %v7285_v25  ;;  %9742 = vst [vmem:[#allocation53_spill] sm:$0xff] %v7393_v38  ;;  %v7395_v15 = vsub.f32 %v1389_v56, %v1506_v24  ;;  %v7413_v35 = vsub.f32 %v1452_v50, %v3227_v40  ;;  %5154 = vmatpush3.bf16.msra.mxu1 %v7393_v38  ;;  %v3278_v29 = vand.u32 4294901760, %v1469_v23  ;;  %v3281_v56 = vand.u32 4294901760, %v1470_v34  ;;  %v1410_v50 = vld [vmem:[%s8793_s2 + $0xf8] sm:$0xff] }
 0x18c   :  { %5522 = vmatpush3.bf16.msra.mxu0 %v7271_v54  ;;  %9731 = vst [vmem:[#allocation65_spill] sm:$0xff] %v7315_v30  ;;  %9736 = vst [vmem:[#allocation80_spill] sm:$0xff] %v7357_v0  ;;  %v7417_v7 = vsub.f32 %v1407_v21, %v1560_v39  ;;  %v7427_v40 = vsub.f32 %v1408_v44, %v1563_v2  ;;  %v1471_v21 = vld [vmem:[%s8793_s2 + $0x2e0] sm:$0xff]  ;;  %5156 = vmatprep.subr.bf16.mxu1 %v7425_v43 }
 0x18d   :  { %5524 = vmatprep.subr.bf16.mxu0 %v7278_v32  ;;  %9740 = vst [vmem:[#allocation50_spill] sm:$0xff] %v7380_v51  ;;  %9741 = vst [vmem:[#allocation52_spill] sm:$0xff] %v7391_v19  ;;  %v1393_v32 = vld [vmem:[%s8793_s2 + $0x70] sm:$0xff]  ;;  %v7442_v39 = vsub.f32 %v1470_v34, %v3281_v56  ;;  %v1455_v54 = vld [vmem:[%s8793_s2 + $0x260] sm:$0xff] }
 0x18e   :  { %9743 = vst [vmem:[#allocation56_spill] sm:$0xff] %v7395_v15  ;;  %9747 = vst [vmem:[#allocation84_spill] sm:$0xff] %v7413_v35  ;;  %v1518_v61 = vand.u32 4294901760, %v1393_v32  ;;  %v3236_v53 = vand.u32 4294901760, %v1455_v54 }
 0x18f   :  { %9748 = vst [vmem:[#allocation39_spill] sm:$0xff] %v7417_v7  ;;  %9749 = vst [vmem:[#allocation88_spill] sm:$0xff] %v7425_v43 }
 0x190   :  { %5526 = vmatpush3.bf16.msra.mxu0 %v7285_v25  ;;  %9750 = vst [vmem:[#allocation2_spill] sm:$0xff] %v7427_v40  ;;  %v1472_v25 = vld [vmem:[%s8793_s2 + $0x2e8] sm:$0xff]  ;;  %9753 = vst [vmem:[#allocation4_spill] sm:$0xff] %v7442_v39 }
 0x191   :  { %5528 = vmatprep.subr.bf16.mxu0 %v7315_v30  ;;  %v7363_v30 = vsub.f32 %v1449_v17, %v3218_v20  ;;  %v7397_v17 = vsub.f32 %v1390_v46, %v1509_v22  ;;  %v1453_v20 = vld [vmem:[%s8793_s2 + $0x250] sm:$0xff]  ;;  %v1512_v46 = vand.u32 4294901760, %v1391_v42  ;;  %v3287_v58 = vand.u32 4294901760, %v1472_v25 }
 0x192   :  { %v3230_v24 = vand.u32 4294901760, %v1453_v20 }
 0x193   :  { %9737 = vst [vmem:[#allocation64_spill] sm:$0xff] %v7363_v30  ;;  %9744 = vst [vmem:[#allocation70_spill] sm:$0xff] %v7397_v17  ;;  %v7446_v2 = vsub.f32 %v1391_v42, %v1512_v46 }
 0x194   :  { %5530 = vmatpush3.bf16.msra.mxu0 %v7329_v41  ;;  %v7365_v41 = vsub.f32 %v1450_v9, %v3221_v63  ;;  %v1392_v9 = vld [vmem:[%s8793_s2 + $0x68] sm:$0xff]  ;;  %v1454_v63 = vld [vmem:[%s8793_s2 + $0x258] sm:$0xff]  ;;  %v7463_v42 = vsub.f32 %v1453_v20, %v3230_v24 }
 0x195   :  { %5532 = vmatprep.subr.bf16.mxu0 %v7378_v48  ;;  %v1515_v6 = vand.u32 4294901760, %v1392_v9  ;;  %v3233_v22 = vand.u32 4294901760, %v1454_v63  ;;  %v7429_v48 = vpack.c.bf16 %v3281_v56, %v3278_v29  ;;  %9755 = vst [vmem:[#allocation6_spill] sm:$0xff] %v7446_v2  ;;  %v1566_v56 = vand.u32 4294901760, %v1409_v27 }
 0x196   :  { %9738 = vst [vmem:[#allocation47_spill] sm:$0xff] %v7365_v41  ;;  %9758 = vst [vmem:[#allocation9_spill] sm:$0xff] %v7463_v42  ;;  %v9131_v51 = vand.u32 4294901760, %v7446_v2 }
 0x197   :  { %9751 = vst [vmem:[#allocation71_spill] sm:$0xff] %v7429_v48  ;;  %v7444_v44 = vpack.c.bf16 %v1515_v6, %v1512_v46  ;;  %v7461_v34 = vpack.c.bf16 %v3233_v22, %v3230_v24  ;;  %v1569_v46 = vand.u32 4294901760, %v1410_v50  ;;  %v7469_v38 = vsub.f32 %v1409_v27, %v1566_v56  ;;  %v1474_v27 = vld [vmem:[%s8793_s2 + $0x2f8] sm:$0xff] }
 0x198   :  { %5534 = vmatpush3.bf16.msra.mxu0 %v7409_v55  ;;  %v7431_v55 = vsub.f32 %v1469_v23, %v3278_v29  ;;  %v7448_v23 = vsub.f32 %v1392_v9, %v1515_v6  ;;  %v1394_v29 = vld [vmem:[%s8793_s2 + $0x78] sm:$0xff]  ;;  %v7465_v9 = vsub.f32 %v1454_v63, %v3233_v22  ;;  %v3284_v6 = vand.u32 4294901760, %v1471_v21  ;;  %v1473_v22 = vld [vmem:[%s8793_s2 + $0x2f0] sm:$0xff] }
 0x199   :  { %9754 = vst [vmem:[#allocation5_spill] sm:$0xff] %v7444_v44  ;;  %5536 = vmatprep.subr.bf16.mxu0 %v7429_v48  ;;  %9757 = vst [vmem:[#allocation8_spill] sm:$0xff] %v7461_v34  ;;  %5158 = vmatpush3.bf16.msra.mxu1 %v7444_v44  ;;  %v1521_v43 = vand.u32 4294901760, %v1394_v29  ;;  %v3239_v48 = vand.u32 4294901760, %v1456_v45  ;;  %v7471_v36 = vpack.c.bf16 %v1569_v46, %v1566_v56  ;;  %v3293_v28 = vand.u32 4294901760, %v1474_v27 }
 0x19a   :  { %9752 = vst [vmem:[#allocation3_spill] sm:$0xff] %v7431_v55  ;;  %9756 = vst [vmem:[#allocation7_spill] sm:$0xff] %v7448_v23  ;;  %v7473_v20 = vsub.f32 %v1410_v50, %v1569_v46  ;;  %v7475_v63 = vpack.c.bf16 %v3287_v58, %v3284_v6  ;;  %v7477_v24 = vsub.f32 %v1471_v21, %v3284_v6  ;;  %v1457_v21 = vld [vmem:[%s8793_s2 + $0x270] sm:$0xff]  ;;  %v1458_v46 = vld [vmem:[%s8793_s2 + $0x278] sm:$0xff]  ;;  %v3290_v6 = vand.u32 4294901760, %v1473_v22 }
 0x19b   :  { %9759 = vst [vmem:[#allocation10_spill] sm:$0xff] %v7465_v9  ;;  %9760 = vst [vmem:[#allocation11_spill] sm:$0xff] %v7469_v38  ;;  %v7487_v44 = vpack.c.bf16 %v1521_v43, %v1518_v61  ;;  %v7489_v56 = vsub.f32 %v1393_v32, %v1518_v61  ;;  %v7491_v50 = vsub.f32 %v1394_v29, %v1521_v43  ;;  %5160 = vmatprep.subr.bf16.mxu1 %v7471_v36  ;;  %v9772_v43 = vld [vmem:[#allocation13_spill] sm:$0xff] }
 0x19c   :  { %5538 = vmatpush3.bf16.msra.mxu0 %v7461_v34  ;;  %9761 = vst [vmem:[#allocation12_spill] sm:$0xff] %v7471_v36  ;;  %9762 = vst [vmem:[#allocation15_spill] sm:$0xff] %v7473_v20  ;;  %v7485_v34 = vsub.f32 %v1472_v25, %v3287_v58  ;;  %v7501_v58 = vpack.c.bf16 %v3239_v48, %v3236_v53  ;;  %v7503_v25 = vsub.f32 %v1455_v54, %v3236_v53 }
 0x19d   :  { %9763 = vst [vmem:[#allocation17_spill] sm:$0xff] %v7475_v63  ;;  %9764 = vst [vmem:[#allocation22_spill] sm:$0xff] %v7477_v24  ;;  %5540 = vmatprep.subr.bf16.mxu0 %v7475_v63  ;;  %v7505_v61 = vsub.f32 %v1456_v45, %v3239_v48  ;;  %v9087_v32 = vand.u32 4294901760, %v6912_v3  ;;  %5162 = vmatpush3.bf16.msra.mxu1 %v7487_v44  ;;  %v9090_v29 = vand.u32 4294901760, %v9772_v43  ;;  %v9093_v54 = vand.u32 4294901760, %v6933_v12 }
 0x19e   :  { %9765 = vst [vmem:[#allocation23_spill] sm:$0xff] %v7485_v34  ;;  %9766 = vst [vmem:[#allocation33_spill] sm:$0xff] %v7487_v44  ;;  %v3242_v45 = vand.u32 4294901760, %v1457_v21  ;;  %v3245_v53 = vand.u32 4294901760, %v1458_v46  ;;  %v7519_v44 = vpack.c.bf16 %v3293_v28, %v3290_v6  ;;  %v7521_v36 = vsub.f32 %v1473_v22, %v3290_v6 }
 0x19f   :  { %9767 = vst [vmem:[#allocation35_spill] sm:$0xff] %v7489_v56  ;;  %9768 = vst [vmem:[#allocation42_spill] sm:$0xff] %v7491_v50  ;;  %v1703_v63 = vsub.f32 %v6912_v3, %v9087_v32  ;;  %v1710_v48 = vsub.f32 %v9772_v43, %v9090_v29  ;;  %v1598_v32 = vsub.f32 %v6933_v12, %v9093_v54 }
 0x1a0   :  { %9769 = vst [vmem:[#allocation45_spill] sm:$0xff] %v7501_v58  ;;  %9770 = vst [vmem:[#allocation48_spill] sm:$0xff] %v7503_v25  ;;  %5542 = vmatpush3.bf16.msra.mxu0 %v7501_v58  ;;  %v9777_v58 = vand.u32 4294901760, %v9773_v26  ;;  %v7531_v34 = vpack.c.bf16 %v3245_v53, %v3242_v45  ;;  %v7534_v29 = vsub.f32 %v1457_v21, %v3242_v45  ;;  %v9784_v21 = vld [vmem:[#allocation38_spill] sm:$0xff] }
 0x1a1   :  { %9771 = vst [vmem:[#allocation51_spill] sm:$0xff] %v7505_v61  ;;  %9774 = vst [vmem:[#allocation54_spill] sm:$0xff] %v7519_v44  ;;  %v7523_v61 = vsub.f32 %v1474_v27, %v3293_v28  ;;  %v1704_v33 = vand.u32 4294901760, %v1703_v63  ;;  %v1711_v24 = vand.u32 4294901760, %v1710_v48  ;;  %5544 = vmatprep.subr.bf16.mxu0 %v7519_v44  ;;  %v7536_v22 = vsub.f32 %v1458_v46, %v3245_v53  ;;  %v9781_v28 = vld [vmem:[#allocation78_spill] sm:$0xff] }
 0x1a2   :  { %9775 = vst [vmem:[#allocation57_spill] sm:$0xff] %v7521_v36  ;;  %v1591_v25 = vsub.f32 %v9773_v26, %v9777_v58  ;;  %9778 = vst [vmem:[#allocation63_spill] sm:$0xff] %v7531_v34  ;;  %v9099_v27 = vand.u32 4294901760, %v9781_v28  ;;  %v1599_v6 = vand.u32 4294901760, %v1598_v32  ;;  %v9100_v58 = vand.u32 4294901760, %v6943_v37  ;;  %v9783_v36 = vld [vmem:[#allocation20_spill] sm:$0xff] }
 0x1a3   :  { %9776 = vst [vmem:[#allocation60_spill] sm:$0xff] %v7523_v61  ;;  %9779 = vst [vmem:[#allocation68_spill] sm:$0xff] %v7534_v29  ;;  %v9782_v61 = vld [vmem:[#allocation19_spill] sm:$0xff]  ;;  %v5163_v9 = vpack.c.bf16 %v1711_v24, %v1704_v33  ;;  %v9103_v45 = vand.u32 4294901760, %v9784_v21  ;;  %v9104_v46 = vand.u32 4294901760, %v6992_v18  ;;  %v9785_v32 = vld [vmem:[#allocation44_spill] sm:$0xff] }
 0x1a4   :  { %9780 = vst [vmem:[#allocation72_spill] sm:$0xff] %v7536_v22  ;;  %v1592_v63 = vand.u32 4294901760, %v1591_v25  ;;  %5546 = vmatpush3.bf16.msra.mxu0 %v7531_v34  ;;  %v5579_v54 = vpack.c.bf16 %v9783_v36, %v9782_v61  ;;  %v1717_v48 = vsub.f32 %v9781_v28, %v9099_v27  ;;  %v1724_v25 = vsub.f32 %v6943_v37, %v9100_v58  ;;  %v9786_v27 = vld [vmem:[#allocation55_spill] sm:$0xff] }
 0x1a5   :  { %v9106_v34 = vand.u32 4294901760, %v9785_v32  ;;  %5164 = vmatprep.subr.bf16.mxu1 %v5163_v9  ;;  %v1605_v33 = vsub.f32 %v9784_v21, %v9103_v45  ;;  %v1612_v24 = vsub.f32 %v6992_v18, %v9104_v46  ;;  %v9788_v45 = vld [vmem:[#allocation25_spill] sm:$0xff] }
 0x1a6   :  { %v7548_v53 = vpack.c.bf16 %v1599_v6, %v1592_v63  ;;  %5580 = vmatprep.subr.bf16.mxu0 %v5579_v54  ;;  %v1718_v44 = vand.u32 4294901760, %v1717_v48  ;;  %v9108_v63 = vand.u32 4294901760, %v9786_v27  ;;  %v1725_v6 = vand.u32 4294901760, %v1724_v25  ;;  %v9787_v54 = vld [vmem:[#allocation21_spill] sm:$0xff] }
 0x1a7   :  { %v1731_v58 = vsub.f32 %v9785_v32, %v9106_v34  ;;  %v9110_v22 = vand.u32 4294901760, %v9787_v54  ;;  %v1606_v29 = vand.u32 4294901760, %v1605_v33  ;;  %v1613_v9 = vand.u32 4294901760, %v1612_v24 }
 0x1a8   :  { %v1738_v48 = vsub.f32 %v9786_v27, %v9108_v63  ;;  %v9109_v36 = vand.u32 4294901760, %v9788_v45  ;;  %v7569_v61 = vpack.c.bf16 %v1725_v6, %v1718_v44  ;;  %v9111_v24 = vand.u32 4294901760, %v7094_v8 }
 0x1a9   :  { %v1732_v46 = vand.u32 4294901760, %v1731_v58  ;;  %v1619_v25 = vsub.f32 %v9787_v54, %v9110_v22  ;;  %v7574_v42 = vpack.c.bf16 %v1613_v9, %v1606_v29  ;;  %v9113_v63 = vand.u32 4294901760, %v7104_v5 }
 0x1aa   :  { %v1739_v34 = vand.u32 4294901760, %v1738_v48  ;;  %v1626_v33 = vsub.f32 %v9788_v45, %v9109_v36  ;;  %v9115_v44 = vand.u32 4294901760, %v7119_v60  ;;  %v1745_v29 = vsub.f32 %v7094_v8, %v9111_v24 }
 0x1ab   :  { %v1620_v39 = vand.u32 4294901760, %v1619_v25  ;;  %v9116_v9 = vand.u32 4294901760, %v7121_v31  ;;  %v1752_v48 = vsub.f32 %v7104_v5, %v9113_v63  ;;  %v9119_v36 = vand.u32 4294901760, %v7351_v1 }
 0x1ac   :  { %v7582_v6 = vpack.c.bf16 %v1739_v34, %v1732_v46  ;;  %v1627_v58 = vand.u32 4294901760, %v1626_v33  ;;  %v1633_v25 = vsub.f32 %v7119_v60, %v9115_v44  ;;  %v1746_v34 = vand.u32 4294901760, %v1745_v29 }
 0x1ad   :  { %v1640_v46 = vsub.f32 %v7121_v31, %v9116_v9  ;;  %v9118_v33 = vand.u32 4294901760, %v7353_v52  ;;  %v1753_v24 = vand.u32 4294901760, %v1752_v48  ;;  %v1759_v63 = vsub.f32 %v7351_v1, %v9119_v36 }
 0x1ae   :  { %v7595_v22 = vpack.c.bf16 %v1627_v58, %v1620_v39  ;;  %v1634_v55 = vand.u32 4294901760, %v1633_v25  ;;  %v9121_v39 = vand.u32 4294901760, %v7359_v4  ;;  %v9122_v58 = vand.u32 4294901760, %v7361_v59 }
 0x1af   :  { %v1641_v35 = vand.u32 4294901760, %v1640_v46  ;;  %v1766_v44 = vsub.f32 %v7353_v52, %v9118_v33  ;;  %v7609_v29 = vpack.c.bf16 %v1753_v24, %v1746_v34  ;;  %v1760_v9 = vand.u32 4294901760, %v1759_v63 }
 0x1b0   :  { %v1647_v46 = vsub.f32 %v7359_v4, %v9121_v39  ;;  %v1654_v33 = vsub.f32 %v7361_v59, %v9122_v58  ;;  %v1773_v36 = vsub.f32 %v7374_v13, %v9123_v49  ;;  %v9125_v24 = vand.u32 4294901760, %v7376_v16 }
 0x1b1   :  { %v7612_v48 = vpack.c.bf16 %v1641_v35, %v1634_v55  ;;  %v1767_v25 = vand.u32 4294901760, %v1766_v44  ;;  %v9127_v63 = vand.u32 4294901760, %v7395_v15  ;;  %v9126_v44 = vand.u32 4294901760, %v7397_v17 }
 0x1b2   :  { %v1648_v55 = vand.u32 4294901760, %v1647_v46  ;;  %v1655_v35 = vand.u32 4294901760, %v1654_v33  ;;  %v1774_v19 = vand.u32 4294901760, %v1773_v36  ;;  %v1780_v39 = vsub.f32 %v7376_v16, %v9125_v24 }
 0x1b3   :  { %v7625_v34 = vpack.c.bf16 %v1767_v25, %v1760_v9  ;;  %v1661_v58 = vsub.f32 %v7395_v15, %v9127_v63  ;;  %v1668_v9 = vsub.f32 %v7397_v17, %v9126_v44  ;;  %v9128_v25 = vand.u32 4294901760, %v7417_v7 }
 0x1b4   :  { %v7634_v49 = vpack.c.bf16 %v1655_v35, %v1648_v55  ;;  %v9130_v33 = vand.u32 4294901760, %v7427_v40  ;;  %v1781_v46 = vand.u32 4294901760, %v1780_v39  ;;  %v9134_v35 = vand.u32 4294901760, %v7448_v23 }
 0x1b5   :  { %9789 = vst [vmem:[#allocation75_spill] sm:$0xff] %v7625_v34  ;;  %v1662_v36 = vand.u32 4294901760, %v1661_v58  ;;  %v1669_v34 = vand.u32 4294901760, %v1668_v9  ;;  %v1787_v24 = vsub.f32 %v7417_v7, %v9128_v25  ;;  %v1675_v39 = vsub.f32 %v7446_v2, %v9131_v51 }
 0x1b6   :  { %9790 = vst [vmem:[#allocation77_spill] sm:$0xff] %v7634_v49  ;;  %v1794_v55 = vsub.f32 %v7427_v40, %v9130_v33  ;;  %v7649_v44 = vpack.c.bf16 %v1781_v46, %v1774_v19  ;;  %v9133_v58 = vand.u32 4294901760, %v7469_v38  ;;  %v1682_v25 = vsub.f32 %v7448_v23, %v9134_v35  ;;  %v9823_v40 = vld [vmem:[#allocation19_spill] sm:$0xff] }
 0x1b7   :  { %v7655_v63 = vpack.c.bf16 %v1669_v34, %v1662_v36  ;;  %v1788_v9 = vand.u32 4294901760, %v1787_v24  ;;  %v1676_v41 = vand.u32 4294901760, %v1675_v39  ;;  %v9132_v46 = vand.u32 4294901760, %v7473_v20 }
 0x1b8   :  { %9791 = vst [vmem:[#allocation81_spill] sm:$0xff] %v7649_v44  ;;  %v1795_v49 = vand.u32 4294901760, %v1794_v55  ;;  %v1801_v19 = vsub.f32 %v7469_v38, %v9133_v58  ;;  %v1683_v51 = vand.u32 4294901760, %v1682_v25  ;;  %v9135_v44 = vand.u32 4294901760, %v7489_v56 }
 0x1b9   :  { %v9136_v34 = vand.u32 4294901760, %v7491_v50  ;;  %v1808_v36 = vsub.f32 %v7473_v20, %v9132_v46 }
 0x1ba   :  { %v7664_v33 = vpack.c.bf16 %v1795_v49, %v1788_v9  ;;  %v1802_v24 = vand.u32 4294901760, %v1801_v19  ;;  %v7673_v39 = vpack.c.bf16 %v1683_v51, %v1676_v41  ;;  %v1689_v49 = vsub.f32 %v7489_v56, %v9135_v44 }
 0x1bb   :  { %v1696_v25 = vsub.f32 %v7491_v50, %v9136_v34  ;;  %v1809_v9 = vand.u32 4294901760, %v1808_v36 }
 0x1bc   :  { %v1690_v58 = vand.u32 4294901760, %v1689_v49 }
 0x1bd   :  { %v1697_v35 = vand.u32 4294901760, %v1696_v25  ;;  %v7685_v55 = vpack.c.bf16 %v1809_v9, %v1802_v24 }
 0x1bf   :  { %v7689_v51 = vpack.c.bf16 %v1697_v35, %v1690_v58 }
 0x25a   :  { %v1361_v36 = vpop.f32.mrb[0].mxu0 }
 0x25b   :  { %v1369_v25 = vmul.f32 %v1361_v36, %v1361_v36  ;;  %v1363_v44 = vpop.f32.mrb[1].mxu0 }
 0x25c   :  { %v1370_v41 = vmul.f32 %v1363_v44, %v1363_v44  ;;  %v1366_v35 = vadd.f32 %v1363_v44, %v1361_v36 }
 0x25d   :  { %v1374_v46 = vmul.f32 %v1369_v25, %v1361_v36 }
 0x25e   :  { %v1375_v19 = vmul.f32 %v1370_v41, %v1363_v44  ;;  %v1368_v58 = vmul.f32 %v1366_v35, %v1363_v44  ;;  %v1367_v15 = vmul.f32 %v1366_v35, %v1361_v36  ;;  %v1371_v17 = vadd.f32 %v1370_v41, %v1369_v25 }
 0x260   :  { %v7715_v9 = vand.u32 4294901760, %v1368_v58  ;;  %v7717_v7 = vand.u32 4294901760, %v1367_v15  ;;  %v1376_v34 = vadd.f32 %v1375_v19, %v1374_v46  ;;  %v7719_v2 = vmul.f32 %v1371_v17, %v1363_v44 }
 0x261   :  { %v7721_v49 = vmul.f32 %v1371_v17, %v1361_v36 }
 0x262   :  { %9792 = vst [vmem:[#allocation83_spill] sm:$0xff] %v7715_v9  ;;  %9793 = vst [vmem:[#allocation86_spill] sm:$0xff] %v7719_v2  ;;  %v7724_v24 = vsub.f32 %v1368_v58, %v7715_v9  ;;  %v7727_v56 = vsub.f32 %v1367_v15, %v7717_v7  ;;  %v1378_v50 = vmul.f32 %v1376_v34, %v1363_v44  ;;  %v9803_v2 = vld [vmem:[#allocation87_spill] sm:$0xff] }
 0x263   :  { %9794 = vst [vmem:[#allocation13_spill] sm:$0xff] %v7721_v49  ;;  %v1377_v38 = vmul.f32 %v1376_v34, %v1361_v36 }
 0x264   :  { %9795 = vst [vmem:[#allocation14_spill] sm:$0xff] %v7727_v56  ;;  %v9153_v35 = vand.u32 4294901760, %v7724_v24  ;;  %v9154_v41 = vand.u32 4294901760, %v7727_v56  ;;  %v7731_v25 = vand.u32 4294901760, %v1378_v50 }
 0x265   :  { %v7733_v20 = vand.u32 4294901760, %v1377_v38 }
 0x266   :  { %9796 = vst [vmem:[#allocation78_spill] sm:$0xff] %v7731_v25  ;;  %v1574_v17 = vsub.f32 %v7724_v24, %v9153_v35  ;;  %v1580_v46 = vsub.f32 %v7727_v56, %v9154_v41  ;;  %v7742_v15 = vsub.f32 %v1378_v50, %v7731_v25 }
 0x267   :  { %9797 = vst [vmem:[#allocation38_spill] sm:$0xff] %v7733_v20  ;;  %v7745_v44 = vsub.f32 %v1377_v38, %v7733_v20 }
 0x268   :  { %9798 = vst [vmem:[#allocation44_spill] sm:$0xff] %v7742_v15  ;;  %v1575_v34 = vand.u32 4294901760, %v1574_v17  ;;  %v1581_v19 = vand.u32 4294901760, %v1580_v46  ;;  %v9157_v36 = vand.u32 4294901760, %v7742_v15  ;;  %v9800_v17 = vld [vmem:[#allocation41_spill] sm:$0xff]  ;;  %v9801_v46 = vld [vmem:[#allocation43_spill] sm:$0xff] }
 0x269   :  { %9799 = vst [vmem:[#allocation55_spill] sm:$0xff] %v7745_v44  ;;  %v9158_v58 = vand.u32 4294901760, %v7745_v44  ;;  %v5581_v49 = vpack.c.bf16 %v9801_v46, %v9800_v17 }
 0x26a   :  { %1576 = vmatprep.mubr.f32.mxu1 %v1575_v34  ;;  %v3298_v35 = vsub.f32 %v7742_v15, %v9157_v36  ;;  %v9802_v34 = vld [vmem:[#allocation82_spill] sm:$0xff] }
 0x26b   :  { %v3304_v41 = vsub.f32 %v7745_v44, %v9158_v58  ;;  %1582 = vmatmul.mubr.f32.vlgmr.msra.gmra.mrb[0].mxu1 %v1581_v19  ;;  %v5583_v36 = vpack.c.bf16 %v9803_v2, %v9802_v34  ;;  %v9804_v19 = vld [vmem:[#allocation24_spill] sm:$0xff]  ;;  %v9812_v58 = vld [vmem:[#allocation81_spill] sm:$0xff] }
 0x26c   :  { %5166 = vmatpush3.bf16.msra.mxu1 %v7548_v53  ;;  %1812 = vmatprep.mubr.f32.mxu1 %v7715_v9  ;;  %v3299_v38 = vand.u32 4294901760, %v3298_v35  ;;  %v5585_v53 = vpack.c.bf16 %v7091_v11, %v9804_v19  ;;  %v5587_v35 = vpack.c.bf16 %v7115_v47, %v7109_v14 }
 0x26d   :  { %v3305_v50 = vand.u32 4294901760, %v3304_v41  ;;  %5168 = vmatprep.subr.bf16.mxu1 %v7569_v61  ;;  %v5589_v61 = vpack.c.bf16 %v7138_v57, %v7128_v62  ;;  %v9806_v41 = vld [vmem:[#allocation75_spill] sm:$0xff] }
 0x26e   :  { %3300 = vmatprep.mubr.f32.mxu0 %v3299_v38 }
 0x26f   :  { %3306 = vmatmul.mubr.f32.vlgmr.msra.gmra.mrb[2].mxu0 %v3305_v50  ;;  %v9809_v50 = vld [vmem:[#allocation77_spill] sm:$0xff] }
 0x270   :  { %5170 = vmatpush3.bf16.msra.mxu1 %v7574_v42  ;;  %5582 = vmatpush3.bf16.msra.mxu0 %v5581_v49  ;;  %v5591_v42 = vpack.c.bf16 %v7357_v0, %v7355_v10 }
 0x271   :  { %3673 = vmatprep.mubr.f32.mxu0 %v7742_v15  ;;  %5172 = vmatprep.subr.bf16.mxu1 %v7582_v6  ;;  %v9805_v6 = vld [vmem:[#allocation47_spill] sm:$0xff] }
 0x272   :  { %5584 = vmatprep.subr.bf16.mxu0 %v5583_v36  ;;  %v5593_v49 = vpack.c.bf16 %v9805_v6, %v7363_v30  ;;  %v9808_v36 = vld [vmem:[#allocation52_spill] sm:$0xff] }
 0x274   :  { %5174 = vmatpush3.bf16.msra.mxu1 %v7595_v22  ;;  %5586 = vmatpush3.bf16.msra.mxu0 %v5585_v53  ;;  %v9807_v22 = vld [vmem:[#allocation50_spill] sm:$0xff]  ;;  %v9811_v53 = vld [vmem:[#allocation84_spill] sm:$0xff] }
 0x275   :  { %5176 = vmatprep.subr.bf16.mxu1 %v7609_v29  ;;  %5588 = vmatprep.subr.bf16.mxu0 %v5587_v35  ;;  %v5595_v38 = vpack.c.bf16 %v9808_v36, %v9807_v22  ;;  %v9810_v29 = vld [vmem:[#allocation79_spill] sm:$0xff] }
 0x276   :  { %v5597_v35 = vpack.c.bf16 %v9811_v53, %v9810_v29 }
 0x278   :  { %5178 = vmatpush3.bf16.msra.mxu1 %v7612_v48  ;;  %5590 = vmatpush3.bf16.msra.mxu0 %v5589_v61  ;;  %v9813_v48 = vld [vmem:[#allocation3_spill] sm:$0xff]  ;;  %v9814_v61 = vld [vmem:[#allocation4_spill] sm:$0xff] }
 0x279   :  { %5180 = vmatprep.subr.bf16.mxu1 %v9806_v41  ;;  %5592 = vmatprep.subr.bf16.mxu0 %v5591_v42  ;;  %v5599_v15 = vpack.c.bf16 %v9814_v61, %v9813_v48  ;;  %v9815_v41 = vld [vmem:[#allocation9_spill] sm:$0xff]  ;;  %v9816_v42 = vld [vmem:[#allocation10_spill] sm:$0xff] }
 0x27a   :  { %v5601_v9 = vpack.c.bf16 %v9816_v42, %v9815_v41  ;;  %v9171_v42 = vand.u32 4294901760, %v9823_v40  ;;  %v9824_v41 = vld [vmem:[#allocation20_spill] sm:$0xff]  ;;  %v9179_v40 = vand.u32 4294901760, %v7115_v47  ;;  %v9887_v47 = vand.u32 4294901760, %v9781_v28 }
 0x27c   :  { %5182 = vmatpush3.bf16.msra.mxu1 %v9809_v50  ;;  %5594 = vmatpush3.bf16.msra.mxu0 %v5593_v49  ;;  %v9817_v50 = vld [vmem:[#allocation22_spill] sm:$0xff]  ;;  %v9818_v49 = vld [vmem:[#allocation23_spill] sm:$0xff] }
 0x27d   :  { %5184 = vmatprep.subr.bf16.mxu1 %v9812_v58  ;;  %5596 = vmatprep.subr.bf16.mxu0 %v5595_v38  ;;  %v5603_v20 = vpack.c.bf16 %v9818_v49, %v9817_v50  ;;  %v9819_v58 = vld [vmem:[#allocation48_spill] sm:$0xff]  ;;  %v9820_v38 = vld [vmem:[#allocation51_spill] sm:$0xff] }
 0x27e   :  { %v5605_v56 = vpack.c.bf16 %v9820_v38, %v9819_v58 }
 0x280   :  { %5186 = vmatpush3.bf16.msra.mxu1 %v7655_v63  ;;  %5598 = vmatpush3.bf16.msra.mxu0 %v5597_v35  ;;  %v9821_v63 = vld [vmem:[#allocation57_spill] sm:$0xff]  ;;  %v9822_v35 = vld [vmem:[#allocation60_spill] sm:$0xff] }
 0x281   :  { %5188 = vmatprep.subr.bf16.mxu1 %v7664_v33  ;;  %5600 = vmatprep.subr.bf16.mxu0 %v5599_v15  ;;  %v5607_v23 = vpack.c.bf16 %v9822_v35, %v9821_v63  ;;  %v9170_v33 = vand.u32 4294901760, %v9824_v41  ;;  %v9827_v15 = vld [vmem:[#allocation72_spill] sm:$0xff] }
 0x283   :  { %v5643_v35 = vpack.c.bf16 %v9170_v33, %v9171_v42  ;;  %v9178_v42 = vand.u32 4294901760, %v9804_v19 }
 0x284   :  { %5190 = vmatpush3.bf16.msra.mxu1 %v7673_v39  ;;  %5602 = vmatpush3.bf16.msra.mxu0 %v5601_v9  ;;  %v9825_v39 = vpack.c.bf16 %v9772_v43, %v6912_v3  ;;  %v9826_v9 = vld [vmem:[#allocation68_spill] sm:$0xff] }
 0x285   :  { %5192 = vmatprep.subr.bf16.mxu1 %v7685_v55  ;;  %5604 = vmatprep.subr.bf16.mxu0 %v5603_v20  ;;  %v5609_v38 = vpack.c.bf16 %v9827_v15, %v9826_v9  ;;  %v9176_v20 = vand.u32 4294901760, %v9800_v17  ;;  %v9175_v55 = vand.u32 4294901760, %v9801_v46 }
 0x287   :  { %v5645_v33 = vpack.c.bf16 %v9175_v55, %v9176_v20  ;;  %v9832_v55 = vpack.c.bf16 %v9786_v27, %v9785_v32  ;;  %v9182_v20 = vand.u32 4294901760, %v7357_v0  ;;  %v9884_v0 = vld [vmem:[#allocation33_spill] sm:$0xff] }
 0x288   :  { %5194 = vmatpush3.bf16.msra.mxu1 %v7689_v51  ;;  %5606 = vmatpush3.bf16.msra.mxu0 %v5605_v56  ;;  %v9174_v51 = vand.u32 4294901760, %v9802_v34  ;;  %v9177_v56 = vand.u32 4294901760, %v7091_v11 }
 0x289   :  { %5196 = vmatprep.subr.bf16.mxu1 %v9825_v39  ;;  %5608 = vmatprep.subr.bf16.mxu0 %v5607_v23  ;;  %v9828_v23 = vpack.c.bf16 %v6933_v12, %v9773_v26  ;;  %v9829_v39 = vpack.c.bf16 %v6943_v37, %v9781_v28 }
 0x28b   :  { %1814 = vmatmul.mubr.f32.vlgmr.msra.gmra.mrb[2].mxu1 %v7717_v7 }
 0x28c   :  { %5198 = vmatpush3.bf16.msra.mxu1 %v9828_v23  ;;  %1949 = vmatprep.mubr.f32.mxu1 %v7724_v24  ;;  %v9830_v23 = vand.u32 4294901760, %v9803_v2 }
 0x28d   :  { %5610 = vmatpush3.bf16.msra.mxu0 %v5609_v38  ;;  %5200 = vmatprep.subr.bf16.mxu1 %v9829_v39  ;;  %v9180_v38 = vand.u32 4294901760, %v7109_v14  ;;  %v9831_v39 = vpack.c.bf16 %v6992_v18, %v9784_v21  ;;  %v9888_v14 = vand.u32 4294901760, %v6943_v37  ;;  %v9895_v37 = vand.u32 4294901760, %v9787_v54 }
 0x28e   :  { %5644 = vmatprep.subr.bf16.mxu0 %v5643_v35  ;;  %v5647_v41 = vpack.c.bf16 %v9830_v23, %v9174_v51  ;;  %v5649_v35 = vpack.c.bf16 %v9177_v56, %v9178_v42  ;;  %v9184_v23 = vand.u32 4294901760, %v7128_v62  ;;  %v9181_v51 = vand.u32 4294901760, %v7138_v57 }
 0x28f   :  { %v9833_v56 = vpack.c.bf16 %v9788_v45, %v9787_v54  ;;  %v9834_v42 = vpack.c.bf16 %v7104_v5, %v7094_v8  ;;  %v9886_v57 = vand.u32 4294901760, %v6933_v12  ;;  %v5263_v11 = vpack.c.bf16 %v9888_v14, %v9887_v47 }
 0x290   :  { %3676 = vmatmul.mubr.f32.vlgmr.msra.gmra.mrb[4].mxu0 %v7745_v44  ;;  %5202 = vmatpush3.bf16.msra.mxu1 %v9831_v39  ;;  %v9183_v39 = vand.u32 4294901760, %v7355_v10  ;;  %v9842_v44 = vand.u32 4294901760, %v9814_v61  ;;  %v9852_v61 = vand.u32 4294901760, %v9818_v49  ;;  %v9862_v49 = vld [vmem:[#allocation35_spill] sm:$0xff]  ;;  %v9885_v10 = vand.u32 4294901760, %v9773_v26 }
 0x291   :  { %5646 = vmatpush3.bf16.msra.mxu0 %v5645_v33  ;;  %3950 = vmatprep.mubr.f32.mxu0 %v7731_v25  ;;  %v5651_v33 = vpack.c.bf16 %v9179_v40, %v9180_v38  ;;  %v9185_v40 = vand.u32 4294901760, %v9805_v6  ;;  %v9187_v38 = vand.u32 4294901760, %v9808_v36  ;;  %v9851_v36 = vand.u32 4294901760, %v9817_v50  ;;  %v9855_v6 = vld [vmem:[#allocation6_spill] sm:$0xff] }
 0x292   :  { %5204 = vmatprep.subr.bf16.mxu1 %v9832_v55  ;;  %5648 = vmatprep.subr.bf16.mxu0 %v5647_v41  ;;  %v5653_v41 = vpack.c.bf16 %v9181_v51, %v9184_v23  ;;  %v9186_v55 = vand.u32 4294901760, %v7363_v30  ;;  %v9836_v51 = vpack.c.bf16 %v7353_v52, %v7351_v1  ;;  %v9841_v23 = vand.u32 4294901760, %v9813_v48 }
 0x293   :  { %v5261_v62 = vpack.c.bf16 %v9886_v57, %v9885_v10  ;;  %v9893_v12 = vand.u32 4294901760, %v9785_v32  ;;  %v9894_v57 = vand.u32 4294901760, %v9786_v27  ;;  %v9896_v14 = vand.u32 4294901760, %v9788_v45 }
 0x294   :  { %5206 = vmatpush3.bf16.msra.mxu1 %v9833_v56  ;;  %v5655_v56 = vpack.c.bf16 %v9182_v20, %v9183_v39  ;;  %v9194_v20 = vand.u32 4294901760, %v9810_v29  ;;  %v9193_v39 = vand.u32 4294901760, %v9811_v53  ;;  %v9853_v53 = vld [vmem:[#allocation60_spill] sm:$0xff]  ;;  %v9898_v10 = vand.u32 4294901760, %v7104_v5 }
 0x295   :  { %5650 = vmatpush3.bf16.msra.mxu0 %v5649_v35  ;;  %5208 = vmatprep.subr.bf16.mxu1 %v9834_v42  ;;  %v9188_v35 = vand.u32 4294901760, %v9807_v22  ;;  %v9835_v42 = vpack.c.bf16 %v7121_v31, %v7119_v60  ;;  %v9844_v22 = vld [vmem:[#allocation56_spill] sm:$0xff]  ;;  %v9208_v25 = vand.u32 4294901760, %v9853_v53  ;;  %v9867_v53 = vand.u32 4294901760, %v7724_v24  ;;  %v9877_v24 = vld [vmem:[#allocation73_spill] sm:$0xff] }
 0x296   :  { %5652 = vmatprep.subr.bf16.mxu0 %v5651_v33  ;;  %v5657_v33 = vpack.c.bf16 %v9185_v40, %v9186_v55  ;;  %v9838_v40 = vpack.c.bf16 %v7376_v16, %v7374_v13  ;;  %v9839_v55 = vld [vmem:[#allocation9_spill] sm:$0xff]  ;;  %v5269_v47 = vpack.c.bf16 %v9896_v14, %v9895_v37  ;;  %v9901_v27 = vand.u32 4294901760, %v7351_v1 }
 0x297   :  { %v9902_v32 = vand.u32 4294901760, %v7353_v52  ;;  %v9903_v45 = vand.u32 4294901760, %v7359_v4  ;;  %v9905_v5 = vand.u32 4294901760, %v7374_v13 }
 0x298   :  { %5210 = vmatpush3.bf16.msra.mxu1 %v9835_v42  ;;  %v5659_v42 = vpack.c.bf16 %v9187_v38, %v9188_v35  ;;  %v9840_v35 = vld [vmem:[#allocation10_spill] sm:$0xff] }
 0x299   :  { %5654 = vmatpush3.bf16.msra.mxu0 %v5653_v41  ;;  %5212 = vmatprep.subr.bf16.mxu1 %v9836_v51  ;;  %v9837_v51 = vpack.c.bf16 %v7361_v59, %v7359_v4  ;;  %v9202_v41 = vand.u32 4294901760, %v9840_v35  ;;  %v5275_v54 = vpack.c.bf16 %v9902_v32, %v9901_v27  ;;  %v1434_v27 = vld [vmem:[%s8793_s2 + $0x1b8] sm:$0xff] }
 0x29a   :  { %5656 = vmatprep.subr.bf16.mxu0 %v5655_v56  ;;  %v5661_v56 = vpack.c.bf16 %v9193_v39, %v9194_v20  ;;  %v9846_v39 = vld [vmem:[#allocation2_spill] sm:$0xff]  ;;  %v9847_v20 = vld [vmem:[#allocation39_spill] sm:$0xff] }
 0x29b   :  { %v9848_v38 = vpack.c.bf16 %v9846_v39, %v9847_v20  ;;  %v9909_v52 = vand.u32 4294901760, %v9847_v20  ;;  %v9910_v4 = vand.u32 4294901760, %v9846_v39 }
 0x29c   :  { %5214 = vmatpush3.bf16.msra.mxu1 %v9837_v51  ;;  %v5663_v51 = vpack.c.bf16 %v9842_v44, %v9841_v23  ;;  %v9850_v23 = vld [vmem:[#allocation51_spill] sm:$0xff] }
 0x29d   :  { %5658 = vmatpush3.bf16.msra.mxu0 %v5657_v33  ;;  %5216 = vmatprep.subr.bf16.mxu1 %v9838_v40  ;;  %v9843_v40 = vld [vmem:[#allocation70_spill] sm:$0xff]  ;;  %v9206_v33 = vand.u32 4294901760, %v9850_v23  ;;  %v9882_v23 = vand.u32 4294901760, %v6912_v3  ;;  %v9890_v3 = vld [vmem:[#allocation83_spill] sm:$0xff] }
 0x29e   :  { %5660 = vmatprep.subr.bf16.mxu0 %v5659_v42  ;;  %v9845_v29 = vpack.c.bf16 %v9843_v40, %v9844_v22  ;;  %v9849_v42 = vand.u32 4294901760, %v9839_v55  ;;  %v9908_v1 = vand.u32 4294901760, %v9843_v40  ;;  %v9915_v40 = vand.u32 4294901760, %v9862_v49 }
 0x2a0   :  { %5218 = vmatpush3.bf16.msra.mxu1 %v9845_v29  ;;  %v5665_v48 = vpack.c.bf16 %v9202_v41, %v9849_v42  ;;  %v5667_v29 = vpack.c.bf16 %v9852_v61, %v9851_v36  ;;  %v9857_v42 = vld [vmem:[#allocation15_spill] sm:$0xff]  ;;  %v9212_v36 = vand.u32 4294901760, %v9826_v9  ;;  %v9211_v61 = vand.u32 4294901760, %v9827_v15  ;;  %v9872_v9 = vld [vmem:[#allocation66_spill] sm:$0xff]  ;;  %v9876_v15 = vld [vmem:[#allocation69_spill] sm:$0xff] }
 0x2a1   :  { %5662 = vmatpush3.bf16.msra.mxu0 %v5661_v56  ;;  %5220 = vmatprep.subr.bf16.mxu1 %v9848_v38  ;;  %v9209_v56 = vand.u32 4294901760, %v9821_v63  ;;  %v9854_v38 = vld [vmem:[#allocation7_spill] sm:$0xff]  ;;  %v9881_v63 = vld [vmem:[#allocation12_spill] sm:$0xff] }
 0x2a2   :  { %5664 = vmatprep.subr.bf16.mxu0 %v5663_v51  ;;  %v9856_v55 = vpack.c.bf16 %v9854_v38, %v9855_v6  ;;  %v9858_v41 = vld [vmem:[#allocation11_spill] sm:$0xff]  ;;  %v9860_v51 = vand.u32 4294901760, %v9819_v58  ;;  %v9883_v58 = vand.u32 4294901760, %v9772_v43  ;;  %v9891_v43 = vand.u32 4294901760, %v9784_v21 }
 0x2a3   :  { %v9859_v44 = vpack.c.bf16 %v9857_v42, %v9858_v41  ;;  %v9912_v13 = vand.u32 4294901760, %v9854_v38  ;;  %v8077_v38 = vld [vmem:[%s8793_s2 + $0x108] sm:$0xff] }
 0x2a4   :  { %5222 = vmatpush3.bf16.msra.mxu1 %v9856_v55  ;;  %v5669_v50 = vpack.c.bf16 %v9206_v33, %v9860_v51  ;;  %v5671_v55 = vpack.c.bf16 %v9208_v25, %v9209_v56  ;;  %v5673_v51 = vpack.c.bf16 %v9211_v61, %v9212_v36  ;;  %v9865_v33 = vld [vmem:[#allocation14_spill] sm:$0xff]  ;;  %v9875_v36 = vld [vmem:[#allocation67_spill] sm:$0xff]  ;;  %v5259_v30 = vpack.c.bf16 %v9883_v58, %v9882_v23 }
 0x2a5   :  { %5666 = vmatpush3.bf16.msra.mxu0 %v5665_v48  ;;  %5224 = vmatprep.subr.bf16.mxu1 %v9859_v44  ;;  %v9861_v48 = vld [vmem:[#allocation42_spill] sm:$0xff]  ;;  %v9864_v44 = vld [vmem:[#allocation59_spill] sm:$0xff]  ;;  %v9889_v19 = vand.u32 4294901760, %v9865_v33  ;;  %v9892_v58 = vand.u32 4294901760, %v6992_v18  ;;  %v9899_v18 = vand.u32 4294901760, %v7119_v60  ;;  %v9906_v60 = vand.u32 4294901760, %v7376_v16 }
 0x2a6   :  { %5668 = vmatprep.subr.bf16.mxu0 %v5667_v29  ;;  %v9863_v35 = vpack.c.bf16 %v9861_v48, %v9862_v49  ;;  %v9866_v29 = vld [vmem:[#allocation16_spill] sm:$0xff]  ;;  %v9868_v25 = vld [vmem:[#allocation18_spill] sm:$0xff]  ;;  %v9913_v16 = vand.u32 4294901760, %v9858_v41  ;;  %v9916_v20 = vand.u32 4294901760, %v9861_v48  ;;  %v9919_v48 = vld [vmem:[#allocation13_spill] sm:$0xff] }
 0x2a7   :  { %v9871_v56 = vld [vmem:[#allocation46_spill] sm:$0xff]  ;;  %v5265_v26 = vpack.c.bf16 %v9892_v58, %v9891_v43  ;;  %v5283_v43 = vpack.c.bf16 %v9910_v4, %v9909_v52 }
 0x2a8   :  { %5226 = vmatpush3.bf16.msra.mxu1 %v9863_v35  ;;  %v9869_v35 = vld [vmem:[#allocation38_spill] sm:$0xff] }
 0x2a9   :  { %5670 = vmatpush3.bf16.msra.mxu0 %v5669_v50  ;;  %5228 = vmatprep.subr.bf16.mxu1 %v9864_v44  ;;  %v9870_v50 = vld [vmem:[#allocation40_spill] sm:$0xff]  ;;  %v9873_v61 = vld [vmem:[#allocation26_spill] sm:$0xff] }
 0x2aa   :  { %5672 = vmatprep.subr.bf16.mxu0 %v5671_v55  ;;  %v9874_v55 = vld [vmem:[#allocation31_spill] sm:$0xff] }
 0x2ab   :  { %1952 = vmatmul.mubr.f32.vlgmr.msra.gmra.mrb[4].mxu1 %v9865_v33  ;;  %v5279_v33 = vpack.c.bf16 %v9906_v60, %v9905_v5  ;;  %v2407_v60 = vand.u32 4294901760, %v1434_v27 }
 0x2ac   :  { %5230 = vmatpush3.bf16.msra.mxu1 %v9866_v29  ;;  %2056 = vmatprep.mubr.f32.mxu1 %v9867_v53  ;;  %v9878_v53 = vld [vmem:[#allocation53_spill] sm:$0xff] }
 0x2ad   :  { %5674 = vmatpush3.bf16.msra.mxu0 %v5673_v51  ;;  %5232 = vmatprep.subr.bf16.mxu1 %v9868_v25  ;;  %v9879_v51 = vld [vmem:[#allocation88_spill] sm:$0xff] }
 0x2b0   :  { %3952 = vmatmul.mubr.f32.vlgmr.msra.gmra.mrb[6].mxu0 %v9869_v35  ;;  %5234 = vmatpush3.bf16.msra.mxu1 %v9870_v50  ;;  %v9880_v35 = vld [vmem:[#allocation5_spill] sm:$0xff] }
 0x2b1   :  { %5236 = vmatprep.subr.bf16.mxu1 %v9871_v56 }
 0x2b4   :  { %5238 = vmatpush3.bf16.msra.mxu1 %v9872_v9 }
 0x2b5   :  { %5240 = vmatprep.subr.bf16.mxu1 %v9873_v61 }
 0x2b8   :  { %5242 = vmatpush3.bf16.msra.mxu1 %v9874_v55 }
 0x2b9   :  { %5244 = vmatprep.subr.bf16.mxu1 %v9875_v36 }
 0x2bc   :  { %5246 = vmatpush3.bf16.msra.mxu1 %v9876_v15 }
 0x2bd   :  { %5248 = vmatprep.subr.bf16.mxu1 %v9877_v24 }
 0x2c0   :  { %5250 = vmatpush3.bf16.msra.mxu1 %v9878_v53 }
 0x2c1   :  { %5252 = vmatprep.subr.bf16.mxu1 %v9879_v51 }
 0x2c4   :  { %5254 = vmatpush3.bf16.msra.mxu1 %v9880_v35 }
 0x2c5   :  { %5256 = vmatprep.subr.bf16.mxu1 %v9881_v63 }
 0x2c8   :  { %5258 = vmatpush3.bf16.msra.mxu1 %v9884_v0 }
 0x2c9   :  { %5260 = vmatprep.subr.bf16.mxu1 %v5259_v30  ;;  %v5267_v30 = vpack.c.bf16 %v9894_v57, %v9893_v12  ;;  %v5289_v12 = vpack.c.bf16 %v9916_v20, %v9915_v40  ;;  %v8109_v57 = vld [vmem:[%s8793_s2 + $0x1a8] sm:$0xff] }
 0x2cb   :  { %2060 = vmatmul.mubr.f32.vlgmr.msra.gmra.mrb[6].mxu1 %v9889_v19 }
 0x2cc   :  { %5262 = vmatpush3.bf16.msra.mxu1 %v5261_v62  ;;  %2226 = vmatprep.mubr.f32.mxu1 %v9890_v3  ;;  %v9897_v62 = vand.u32 4294901760, %v7094_v8  ;;  %v9904_v8 = vand.u32 4294901760, %v7361_v59  ;;  %v9911_v59 = vand.u32 4294901760, %v9855_v6  ;;  %v9917_v6 = vld [vmem:[#allocation86_spill] sm:$0xff] }
 0x2cd   :  { %5264 = vmatprep.subr.bf16.mxu1 %v5263_v11  ;;  %v9900_v11 = vand.u32 4294901760, %v7121_v31  ;;  %v9907_v31 = vand.u32 4294901760, %v9844_v22  ;;  %v9914_v22 = vand.u32 4294901760, %v9857_v42  ;;  %v8049_v49 = vand.u32 4294901760, %v9917_v6 }
 0x2ce   :  { %v5271_v28 = vpack.c.bf16 %v9898_v10, %v9897_v62  ;;  %v5277_v19 = vpack.c.bf16 %v9904_v8, %v9903_v45  ;;  %v5285_v58 = vpack.c.bf16 %v9912_v13, %v9911_v59 }
 0x2cf   :  { %v5273_v21 = vpack.c.bf16 %v9900_v11, %v9899_v18  ;;  %v5281_v23 = vpack.c.bf16 %v9908_v1, %v9907_v31  ;;  %9918 = vst [vmem:[#allocation21_spill] sm:$0xff] %v8049_v49  ;;  %v8065_v39 = vsub.f32 %v9917_v6, %v8049_v49  ;;  %v1415_v18 = vld [vmem:[%s8793_s2 + $0x120] sm:$0xff]  ;;  %v1416_v11 = vld [vmem:[%s8793_s2 + $0x128] sm:$0xff]  ;;  %v1438_v6 = vld [vmem:[%s8793_s2 + $0x1d8] sm:$0xff] }
 0x2d0   :  { %5266 = vmatpush3.bf16.msra.mxu1 %v5265_v26  ;;  %v5287_v26 = vpack.c.bf16 %v9914_v22, %v9913_v16  ;;  %v2350_v45 = vand.u32 4294901760, %v1415_v18  ;;  %v2353_v8 = vand.u32 4294901760, %v1416_v11  ;;  %v1435_v31 = vld [vmem:[%s8793_s2 + $0x1c0] sm:$0xff]  ;;  %v1436_v1 = vld [vmem:[%s8793_s2 + $0x1c8] sm:$0xff] }
 0x2d1   :  { %5268 = vmatprep.subr.bf16.mxu1 %v5267_v30  ;;  %v9235_v42 = vand.u32 4294901760, %v8065_v39  ;;  %v2410_v13 = vand.u32 4294901760, %v1435_v31  ;;  %v1419_v16 = vld [vmem:[%s8793_s2 + $0x140] sm:$0xff]  ;;  %v1420_v22 = vld [vmem:[%s8793_s2 + $0x148] sm:$0xff] }
 0x2d2   :  { %v8160_v52 = vpack.c.bf16 %v2353_v8, %v2350_v45 }
 0x2d4   :  { %5270 = vmatpush3.bf16.msra.mxu1 %v5269_v47  ;;  %9922 = vst [vmem:[#allocation77_spill] sm:$0xff] %v8160_v52 }
 0x2d5   :  { %5272 = vmatprep.subr.bf16.mxu1 %v5271_v28  ;;  %v2401_v28 = vand.u32 4294901760, %v8109_v57 }
 0x2d8   :  { %5274 = vmatpush3.bf16.msra.mxu1 %v5273_v21  ;;  %v1433_v21 = vld [vmem:[%s8793_s2 + $0x1b0] sm:$0xff] }
 0x2d9   :  { %5276 = vmatprep.subr.bf16.mxu1 %v5275_v54  ;;  %v2404_v5 = vand.u32 4294901760, %v1433_v21 }
 0x2db   :  { %v8163_v59 = vpack.c.bf16 %v2407_v60, %v2404_v5 }
 0x2dc   :  { %5278 = vmatpush3.bf16.msra.mxu1 %v5277_v19 }
 0x2dd   :  { %5280 = vmatprep.subr.bf16.mxu1 %v5279_v33  ;;  %v1417_v33 = vld [vmem:[%s8793_s2 + $0x130] sm:$0xff]  ;;  %9923 = vst [vmem:[#allocation81_spill] sm:$0xff] %v8163_v59 }
 0x2de   :  { %v2356_v4 = vand.u32 4294901760, %v1417_v33 }
 0x2e0   :  { %5282 = vmatpush3.bf16.msra.mxu1 %v5281_v23 }
 0x2e1   :  { %5284 = vmatprep.subr.bf16.mxu1 %v5283_v43 }
 0x2e4   :  { %5286 = vmatpush3.bf16.msra.mxu1 %v5285_v58  ;;  %v2413_v58 = vand.u32 4294901760, %v1436_v1 }
 0x2e5   :  { %5288 = vmatprep.subr.bf16.mxu1 %v5287_v26 }
 0x2e8   :  { %5290 = vmatpush3.bf16.msra.mxu1 %v5289_v12  ;;  %v1437_v12 = vld [vmem:[%s8793_s2 + $0x1d0] sm:$0xff] }
 0x2e9   :  { %5292 = vmatprep.subr.bf16.mxu1 %v9864_v44  ;;  %v8087_v44 = vand.u32 4294901760, %v9919_v48 }
 0x2eb   :  { %2228 = vmatmul.mubr.f32.vlgmr.msra.gmra.mrb[8].mxu1 %v7717_v7  ;;  %v8113_v30 = vsub.f32 %v9919_v48, %v8087_v44  ;;  %v8261_v48 = vsub.f32 %v1436_v1, %v2413_v58 }
 0x2ec   :  { %5294 = vmatpush3.bf16.msra.mxu1 %v9866_v29  ;;  %2330 = vmatprep.mubr.f32.mxu1 %v9890_v3  ;;  %v1414_v3 = vld [vmem:[%s8793_s2 + $0x118] sm:$0xff] }
 0x2ed   :  { %5296 = vmatprep.subr.bf16.mxu1 %v9868_v25  ;;  %v8056_v25 = vld [vmem:[%s8793_s2 + $0x180] sm:$0xff]  ;;  %v2347_v47 = vand.u32 4294901760, %v1414_v3  ;;  %v9234_v32 = vand.u32 4294901760, %v8113_v30 }
 0x2ef   :  { %v8157_v23 = vsub.f32 %v8113_v30, %v9234_v32  ;;  %v8203_v32 = vld [vmem:[%s8793_s2 + $0x150] sm:$0xff] }
 0x2f0   :  { %5298 = vmatpush3.bf16.msra.mxu1 %v9870_v50  ;;  %v2341_v50 = vand.u32 4294901760, %v8077_v38 }
 0x2f1   :  { %5300 = vmatprep.subr.bf16.mxu1 %v9871_v56  ;;  %v1411_v56 = vld [vmem:[%s8793_s2 + $0x100] sm:$0xff] }
 0x2f2   :  { %v2338_v29 = vand.u32 4294901760, %v1411_v56 }
 0x2f4   :  { %5302 = vmatpush3.bf16.msra.mxu1 %v9872_v9  ;;  %v8061_v9 = vld [vmem:[%s8793_s2 + $0x188] sm:$0xff]  ;;  %v8116_v37 = vpack.c.bf16 %v2341_v50, %v2338_v29  ;;  %v8177_v20 = vsub.f32 %v1411_v56, %v2338_v29  ;;  %v2362_v29 = vand.u32 4294901760, %v1419_v16 }
 0x2f5   :  { %5304 = vmatprep.subr.bf16.mxu1 %v9873_v61  ;;  %v2389_v41 = vand.u32 4294901760, %v8061_v9  ;;  %v1430_v61 = vld [vmem:[%s8793_s2 + $0x198] sm:$0xff] }
 0x2f6   :  { %v8263_v2 = vsub.f32 %v1419_v16, %v2362_v29  ;;  %v8289_v16 = vld [vmem:[%s8793_s2 + $0x178] sm:$0xff]  ;;  %v9933_v46 = vand.u32 4294901760, %v8177_v20 }
 0x2f7   :  { %v8175_v40 = vsub.f32 %v8061_v9, %v2389_v41 }
 0x2f8   :  { %5306 = vmatpush3.bf16.msra.mxu1 %v9874_v55 }
 0x2f9   :  { %5308 = vmatprep.subr.bf16.mxu1 %v9875_v36  ;;  %v1429_v36 = vld [vmem:[%s8793_s2 + $0x190] sm:$0xff] }
 0x2fc   :  { %5310 = vmatpush3.bf16.msra.mxu1 %v9876_v15  ;;  %v2386_v15 = vand.u32 4294901760, %v8056_v25 }
 0x2fd   :  { %5312 = vmatprep.subr.bf16.mxu1 %v9877_v24  ;;  %v2392_v24 = vand.u32 4294901760, %v1429_v36 }
 0x2fe   :  { %v8092_v55 = vpack.c.bf16 %v2389_v41, %v2386_v15  ;;  %v8172_v26 = vsub.f32 %v8056_v25, %v2386_v15  ;;  %v8195_v41 = vsub.f32 %v1414_v3, %v2347_v47  ;;  %v8220_v3 = vsub.f32 %v1416_v11, %v2353_v8  ;;  %v8246_v11 = vld [vmem:[%s8793_s2 + $0x168] sm:$0xff]  ;;  %v8270_v8 = vld [vmem:[%s8793_s2 + $0x1f0] sm:$0xff] }
 0x2ff   :  { %v8189_v25 = vsub.f32 %v1429_v36, %v2392_v24 }
 0x300   :  { %5314 = vmatpush3.bf16.msra.mxu1 %v9878_v53  ;;  %v2395_v53 = vand.u32 4294901760, %v1430_v61 }
 0x301   :  { %5316 = vmatprep.subr.bf16.mxu1 %v9879_v51  ;;  %v1413_v51 = vld [vmem:[%s8793_s2 + $0x110] sm:$0xff] }
 0x302   :  { %v2344_v14 = vand.u32 4294901760, %v1413_v51  ;;  %v8119_v62 = vpack.c.bf16 %v2395_v53, %v2392_v24  ;;  %v8191_v15 = vsub.f32 %v1430_v61, %v2395_v53  ;;  %v8213_v61 = vpack.c.bf16 %v2413_v58, %v2410_v13  ;;  %v8284_v58 = vld [vmem:[%s8793_s2 + $0x170] sm:$0xff] }
 0x303   :  { %v2419_v24 = vand.u32 4294901760, %v1438_v6  ;;  %v8216_v53 = vsub.f32 %v8109_v57, %v2401_v28  ;;  %v2368_v57 = vand.u32 4294901760, %v8203_v32 }
 0x304   :  { %5318 = vmatpush3.bf16.msra.mxu1 %v9880_v35  ;;  %v2436_v35 = vsub.f32 %v8065_v39, %v9235_v42  ;;  %v8137_v54 = vpack.c.bf16 %v2347_v47, %v2344_v14  ;;  %v8193_v9 = vsub.f32 %v1413_v51, %v2344_v14  ;;  %9925 = vst [vmem:[#allocation56_spill] sm:$0xff] %v8213_v61  ;;  %v8230_v47 = vld [vmem:[%s8793_s2 + $0x1e8] sm:$0xff] }
 0x305   :  { %5320 = vmatprep.subr.bf16.mxu1 %v9881_v63  ;;  %v1431_v63 = vld [vmem:[%s8793_s2 + $0x1a0] sm:$0xff]  ;;  %v8218_v51 = vsub.f32 %v1415_v18, %v2350_v45  ;;  %v8222_v14 = vsub.f32 %v1433_v21, %v2404_v5  ;;  %v8234_v42 = vsub.f32 %v1417_v33, %v2356_v4  ;;  %v9246_v45 = vand.u32 4294901760, %v8172_v26 }
 0x306   :  { %v2398_v10 = vand.u32 4294901760, %v1431_v63  ;;  %9920 = vst [vmem:[#allocation25_spill] sm:$0xff] %v8137_v54  ;;  %v8241_v18 = vld [vmem:[%s8793_s2 + $0x160] sm:$0xff]  ;;  %v8256_v5 = vsub.f32 %v1435_v31, %v2410_v13  ;;  %v8275_v31 = vld [vmem:[%s8793_s2 + $0x1f8] sm:$0xff] }
 0x308   :  { %5322 = vmatpush3.bf16.msra.mxu1 %v9884_v0  ;;  %v2437_v0 = vand.u32 4294901760, %v2436_v35  ;;  %v8140_v19 = vpack.c.bf16 %v2401_v28, %v2398_v10  ;;  %v8187_v35 = vsub.f32 %v8077_v38, %v2341_v50  ;;  %v8208_v38 = vld [vmem:[%s8793_s2 + $0x158] sm:$0xff]  ;;  %v8210_v36 = vsub.f32 %v1431_v63, %v2398_v10  ;;  %v1439_v63 = vld [vmem:[%s8793_s2 + $0x1e0] sm:$0xff] }
 0x309   :  { %5324 = vmatprep.subr.bf16.mxu1 %v8092_v55  ;;  %v2416_v50 = vand.u32 4294901760, %v1437_v12  ;;  %v8232_v10 = vsub.f32 %v1434_v27, %v2407_v60  ;;  %v2371_v28 = vand.u32 4294901760, %v8208_v38  ;;  %v2422_v33 = vand.u32 4294901760, %v1439_v63 }
 0x30a   :  { %9921 = vst [vmem:[#allocation75_spill] sm:$0xff] %v8140_v19 }
 0x30b   :  { %2332 = vmatmul.mubr.f32.vlgmr.msra.gmra.mrb[10].mxu1 %v7717_v7  ;;  %v1418_v7 = vld [vmem:[%s8793_s2 + $0x138] sm:$0xff]  ;;  %v8258_v60 = vpack.c.bf16 %v2419_v24, %v2416_v50  ;;  %v8279_v1 = vpack.c.bf16 %v2371_v28, %v2368_v57 }
 0x30c   :  { %5326 = vmatpush3.bf16.msra.mxu1 %v8116_v37  ;;  %2438 = vmatprep.mubr.f32.mxu1 %v2437_v0  ;;  %v2359_v43 = vand.u32 4294901760, %v1418_v7  ;;  %v2365_v0 = vand.u32 4294901760, %v1420_v22 }
 0x30d   :  { %5328 = vmatprep.subr.bf16.mxu1 %v8119_v62  ;;  %9927 = vst [vmem:[#allocation39_spill] sm:$0xff] %v8258_v60  ;;  %9928 = vst [vmem:[#allocation7_spill] sm:$0xff] %v8279_v1 }
 0x30e   :  { %v8198_v56 = vpack.c.bf16 %v2359_v43, %v2356_v4  ;;  %v8249_v21 = vsub.f32 %v1418_v7, %v2359_v43  ;;  %v8251_v27 = vpack.c.bf16 %v2365_v0, %v2362_v29  ;;  %v2425_v4 = vand.u32 4294901760, %v8230_v47 }
 0x30f   :  { %v2374_v7 = vand.u32 4294901760, %v8241_v18  ;;  %v8277_v13 = vsub.f32 %v1420_v22, %v2365_v0  ;;  %v2565_v22 = vsub.f32 %v8172_v26, %v9246_v45  ;;  %v9929_v0 = vand.u32 4294901760, %v8175_v40 }
 0x310   :  { %5330 = vmatpush3.bf16.msra.mxu1 %v8137_v54  ;;  %9924 = vst [vmem:[#allocation70_spill] sm:$0xff] %v8198_v56  ;;  %9926 = vst [vmem:[#allocation2_spill] sm:$0xff] %v8251_v27  ;;  %v8305_v29 = vpack.c.bf16 %v2425_v4, %v2422_v33  ;;  %v9931_v45 = vand.u32 4294901760, %v8246_v11  ;;  %v9947_v54 = vand.u32 4294901760, %v8222_v14 }
 0x311   :  { %5332 = vmatprep.subr.bf16.mxu1 %v8140_v19  ;;  %v2572_v34 = vsub.f32 %v8175_v40, %v9929_v0  ;;  %v9935_v0 = vand.u32 4294901760, %v8189_v25  ;;  %v9940_v19 = vand.u32 4294901760, %v8193_v9 }
 0x312   :  { %9930 = vst [vmem:[#allocation6_spill] sm:$0xff] %v8305_v29 }
 0x313   :  { %v2579_v17 = vsub.f32 %v8189_v25, %v9935_v0  ;;  %v8345_v0 = vsub.f32 %v8208_v38, %v2371_v28  ;;  %v9942_v38 = vand.u32 4294901760, %v8284_v58 }
 0x314   :  { %5334 = vmatpush3.bf16.msra.mxu1 %v8160_v52  ;;  %v8333_v52 = vsub.f32 %v8203_v32, %v2368_v57  ;;  %v9266_v32 = vand.u32 4294901760, %v8234_v42 }
 0x315   :  { %5336 = vmatprep.subr.bf16.mxu1 %v8163_v59  ;;  %v8313_v59 = vpack.c.bf16 %v9931_v45, %v2374_v7  ;;  %v2573_v45 = vand.u32 4294901760, %v2572_v34  ;;  %v2580_v57 = vand.u32 4294901760, %v2579_v17  ;;  %v8377_v17 = vsub.f32 %v8241_v18, %v2374_v7 }
 0x316   :  { %v9268_v7 = vand.u32 4294901760, %v8261_v48  ;;  %v9949_v18 = vand.u32 4294901760, %v8157_v23 }
 0x317   :  { %9932 = vst [vmem:[#allocation15_spill] sm:$0xff] %v8313_v59 }
 0x318   :  { %5338 = vmatpush3.bf16.msra.mxu1 %v8198_v56  ;;  %v8309_v56 = vsub.f32 %v1438_v6, %v2419_v24  ;;  %v2566_v24 = vand.u32 4294901760, %v2565_v22  ;;  %v9938_v6 = vand.u32 4294901760, %v8275_v31  ;;  %v9261_v22 = vand.u32 4294901760, %v8216_v53 }
 0x319   :  { %5340 = vmatprep.subr.bf16.mxu1 %v8213_v61  ;;  %v8303_v61 = vsub.f32 %v1437_v12, %v2416_v50  ;;  %v2453_v12 = vsub.f32 %v8177_v20, %v9933_v46  ;;  %v9934_v50 = vand.u32 4294901760, %v8187_v35 }
 0x31b   :  { %v2460_v43 = vsub.f32 %v8187_v35, %v9934_v50  ;;  %v9937_v50 = vand.u32 4294901760, %v8270_v8 }
 0x31c   :  { %5342 = vmatpush3.bf16.msra.mxu1 %v8251_v27 }
 0x31d   :  { %5344 = vmatprep.subr.bf16.mxu1 %v8258_v60  ;;  %v9936_v60 = vand.u32 4294901760, %v8191_v15  ;;  %v8340_v27 = vpack.c.bf16 %v9938_v6, %v9937_v50  ;;  %v2467_v6 = vsub.f32 %v8193_v9, %v9940_v19  ;;  %v9941_v50 = vand.u32 4294901760, %v8195_v41 }
 0x31f   :  { %v2586_v46 = vsub.f32 %v8191_v15, %v9936_v60  ;;  %9939 = vst [vmem:[#allocation11_spill] sm:$0xff] %v8340_v27  ;;  %v2454_v60 = vand.u32 4294901760, %v2453_v12  ;;  %v2474_v34 = vsub.f32 %v8195_v41, %v9941_v50  ;;  %v2600_v50 = vsub.f32 %v8216_v53, %v9261_v22 }
 0x320   :  { %5346 = vmatpush3.bf16.msra.mxu1 %v8279_v1  ;;  %v8347_v1 = vsub.f32 %v1439_v63, %v2422_v33  ;;  %v9943_v63 = vand.u32 4294901760, %v8289_v16  ;;  %v5355_v33 = vpack.c.bf16 %v2573_v45, %v2566_v24  ;;  %v9945_v24 = vand.u32 4294901760, %v8218_v51 }
 0x321   :  { %5348 = vmatprep.subr.bf16.mxu1 %v8305_v29  ;;  %v2461_v29 = vand.u32 4294901760, %v2460_v43  ;;  %v2587_v12 = vand.u32 4294901760, %v2586_v46  ;;  %v9944_v43 = vand.u32 4294901760, %v8210_v36  ;;  %v9946_v46 = vand.u32 4294901760, %v8220_v3 }
 0x322   :  { %v8362_v28 = vpack.c.bf16 %v9943_v63, %v9942_v38  ;;  %v8374_v38 = vsub.f32 %v8230_v47, %v2425_v4  ;;  %v2481_v45 = vsub.f32 %v8218_v51, %v9945_v24  ;;  %v2468_v22 = vand.u32 4294901760, %v2467_v6 }
 0x323   :  { %v2593_v19 = vsub.f32 %v8210_v36, %v9944_v43  ;;  %v2488_v63 = vsub.f32 %v8220_v3, %v9946_v46  ;;  %v5357_v43 = vpack.c.bf16 %v2461_v29, %v2454_v60  ;;  %v5359_v47 = vpack.c.bf16 %v2587_v12, %v2580_v57 }
 0x324   :  { %5350 = vmatpush3.bf16.msra.mxu1 %v8313_v59  ;;  %v9267_v4 = vand.u32 4294901760, %v8249_v21  ;;  %v2601_v59 = vand.u32 4294901760, %v2600_v50  ;;  %v2607_v29 = vsub.f32 %v8222_v14, %v9947_v54  ;;  %v2482_v6 = vand.u32 4294901760, %v2481_v45 }
 0x325   :  { %5352 = vmatprep.subr.bf16.mxu1 %v8340_v27  ;;  %v2475_v27 = vand.u32 4294901760, %v2474_v34  ;;  %v2594_v24 = vand.u32 4294901760, %v2593_v19  ;;  %v9948_v34 = vand.u32 4294901760, %v8232_v10  ;;  %v2489_v46 = vand.u32 4294901760, %v2488_v63 }
 0x326   :  { %v9270_v57 = vand.u32 4294901760, %v8263_v2  ;;  %v9269_v12 = vand.u32 4294901760, %v8277_v13  ;;  %v2495_v19 = vsub.f32 %v8234_v42, %v9266_v32  ;;  %v2502_v45 = vsub.f32 %v8249_v21, %v9267_v4 }
 0x327   :  { %v2614_v60 = vsub.f32 %v8232_v10, %v9948_v34  ;;  %v9950_v63 = vand.u32 4294901760, %v8256_v5  ;;  %v2608_v34 = vand.u32 4294901760, %v2607_v29  ;;  %v9952_v50 = vand.u32 4294901760, %v8270_v8 }
 0x328   :  { %5354 = vmatpush3.bf16.msra.mxu1 %v8362_v28  ;;  %v5365_v54 = vpack.c.bf16 %v2489_v46, %v2482_v6  ;;  %v2503_v6 = vand.u32 4294901760, %v2502_v45 }
 0x329   :  { %5356 = vmatprep.subr.bf16.mxu1 %v5355_v33  ;;  %v5361_v33 = vpack.c.bf16 %v2475_v27, %v2468_v22  ;;  %v2621_v23 = vsub.f32 %v8256_v5, %v9950_v63  ;;  %v2628_v27 = vsub.f32 %v8261_v48, %v9268_v7  ;;  %v9951_v22 = vand.u32 4294901760, %v8246_v11 }
 0x32a   :  { %v2615_v32 = vand.u32 4294901760, %v2614_v60  ;;  %v8423_v4 = vsub.f32 %v8270_v8, %v9952_v50  ;;  %v2509_v63 = vsub.f32 %v8263_v2, %v9270_v57  ;;  %v2516_v7 = vsub.f32 %v8277_v13, %v9269_v12 }
 0x32b   :  { %2444 = vmatmul.mubr.f32.vlgmr.msra.gmra.mrb[12].mxu1 %v9949_v18  ;;  %v8418_v18 = vsub.f32 %v8246_v11, %v9951_v22  ;;  %v9953_v11 = vand.u32 4294901760, %v8303_v61  ;;  %v2496_v60 = vand.u32 4294901760, %v2495_v19  ;;  %v2622_v46 = vand.u32 4294901760, %v2621_v23 }
 0x32c   :  { %5358 = vmatpush3.bf16.msra.mxu1 %v5357_v43  ;;  %2674 = vmatprep.mubr.f32.mxu1 %v8049_v49  ;;  %v5363_v43 = vpack.c.bf16 %v2601_v59, %v2594_v24  ;;  %v2629_v50 = vand.u32 4294901760, %v2628_v27  ;;  %v9955_v22 = vand.u32 4294901760, %v8275_v31  ;;  %v9271_v57 = vand.u32 4294901760, %v8347_v1 }
 0x32d   :  { %5360 = vmatprep.subr.bf16.mxu1 %v5359_v47  ;;  %v2635_v59 = vsub.f32 %v8303_v61, %v9953_v11  ;;  %v9954_v47 = vand.u32 4294901760, %v8309_v56  ;;  %v5367_v11 = vpack.c.bf16 %v2615_v32, %v2608_v34  ;;  %v9956_v8 = vand.u32 4294901760, %v8284_v58 }
 0x32e   :  { %v8442_v12 = vsub.f32 %v8275_v31, %v9955_v22  ;;  %v2510_v45 = vand.u32 4294901760, %v2509_v63  ;;  %v2517_v23 = vand.u32 4294901760, %v2516_v7  ;;  %v9958_v32 = vand.u32 4294901760, %v8333_v52 }
 0x32f   :  { %v2642_v24 = vsub.f32 %v8309_v56, %v9954_v47  ;;  %v8449_v29 = vsub.f32 %v8284_v58, %v9956_v8  ;;  %v2636_v31 = vand.u32 4294901760, %v2635_v59  ;;  %v9959_v34 = vand.u32 4294901760, %v8345_v0 }
 0x330   :  { %5362 = vmatpush3.bf16.msra.mxu1 %v5361_v33  ;;  %v9957_v33 = vand.u32 4294901760, %v8289_v16  ;;  %v5369_v58 = vpack.c.bf16 %v2503_v6, %v2496_v60  ;;  %v5371_v8 = vpack.c.bf16 %v2629_v50, %v2622_v46  ;;  %v9274_v47 = vand.u32 4294901760, %v8377_v17 }
 0x331   :  { %5364 = vmatprep.subr.bf16.mxu1 %v5363_v43  ;;  %v2643_v27 = vand.u32 4294901760, %v2642_v24  ;;  %v2523_v43 = vsub.f32 %v8333_v52, %v9958_v32  ;;  %v2530_v22 = vsub.f32 %v8345_v0, %v9959_v34  ;;  %v2649_v7 = vsub.f32 %v8347_v1, %v9271_v57 }
 0x332   :  { %v8454_v19 = vsub.f32 %v8289_v16, %v9957_v33  ;;  %v9273_v16 = vand.u32 4294901760, %v8418_v18  ;;  %v9960_v63 = vand.u32 4294901760, %v8374_v38  ;;  %v9272_v24 = vand.u32 4294901760, %v8423_v4 }
 0x333   :  { %v9275_v33 = vand.u32 4294901760, %v8442_v12  ;;  %v5375_v60 = vpack.c.bf16 %v2643_v27, %v2636_v31  ;;  %v2524_v6 = vand.u32 4294901760, %v2523_v43  ;;  %v2531_v46 = vand.u32 4294901760, %v2530_v22 }
 0x334   :  { %5366 = vmatpush3.bf16.msra.mxu1 %v5365_v54  ;;  %v2656_v59 = vsub.f32 %v8374_v38, %v9960_v63  ;;  %v5373_v54 = vpack.c.bf16 %v2517_v23, %v2510_v45  ;;  %v2537_v50 = vsub.f32 %v8377_v17, %v9274_v47  ;;  %v9276_v32 = vand.u32 4294901760, %v8449_v29 }
 0x335   :  { %5368 = vmatprep.subr.bf16.mxu1 %v5367_v11  ;;  %v2544_v11 = vsub.f32 %v8418_v18, %v9273_v16  ;;  %v9279_v34 = vand.u32 4294901760, %v8454_v19  ;;  %v2650_v63 = vand.u32 4294901760, %v2649_v7  ;;  %v2663_v45 = vsub.f32 %v8423_v4, %v9272_v24 }
 0x336   :  { %v2657_v57 = vand.u32 4294901760, %v2656_v59  ;;  %v2670_v23 = vsub.f32 %v8442_v12, %v9275_v33  ;;  %v5377_v31 = vpack.c.bf16 %v2531_v46, %v2524_v6  ;;  %v2538_v27 = vand.u32 4294901760, %v2537_v50 }
 0x337   :  { %v2545_v43 = vand.u32 4294901760, %v2544_v11  ;;  %v2551_v22 = vsub.f32 %v8449_v29, %v9276_v32  ;;  %v2664_v7 = vand.u32 4294901760, %v2663_v45  ;;  %v5401_v45 = vpack.c.bf16 %v8249_v21, %v8234_v42 }
 0x338   :  { %5370 = vmatpush3.bf16.msra.mxu1 %v5369_v58  ;;  %v2558_v58 = vsub.f32 %v8454_v19, %v9279_v34  ;;  %v2671_v59 = vand.u32 4294901760, %v2670_v23  ;;  %v5403_v23 = vpack.c.bf16 %v8261_v48, %v8256_v5  ;;  %v9980_v34 = vand.u32 4294901760, %v8113_v30 }
 0x339   :  { %5372 = vmatprep.subr.bf16.mxu1 %v5371_v8  ;;  %v5379_v8 = vpack.c.bf16 %v2657_v57, %v2650_v63  ;;  %v5381_v6 = vpack.c.bf16 %v2545_v43, %v2538_v27  ;;  %v5387_v57 = vpack.c.bf16 %v8175_v40, %v8172_v26  ;;  %v5399_v63 = vpack.c.bf16 %v8232_v10, %v8222_v14 }
 0x33a   :  { %v2559_v46 = vand.u32 4294901760, %v2558_v58  ;;  %v5383_v50 = vpack.c.bf16 %v2671_v59, %v2664_v7  ;;  %v5407_v27 = vpack.c.bf16 %v8309_v56, %v8303_v61  ;;  %v5409_v43 = vpack.c.bf16 %v8345_v0, %v8333_v52 }
 0x33b   :  { %v5413_v59 = vpack.c.bf16 %v8418_v18, %v8377_v17 }
 0x33c   :  { %5374 = vmatpush3.bf16.msra.mxu1 %v5373_v54  ;;  %v2552_v54 = vand.u32 4294901760, %v2551_v22  ;;  %v5411_v22 = vpack.c.bf16 %v8374_v38, %v8347_v1 }
 0x33d   :  { %5376 = vmatprep.subr.bf16.mxu1 %v5375_v60  ;;  %v5395_v60 = vpack.c.bf16 %v8216_v53, %v8210_v36 }
 0x33e   :  { %v4149_v24 = vpop.f32.mrb[0].mxu1  ;;  %v5385_v49 = vpack.c.bf16 %v2559_v46, %v2552_v54 }
 0x33f   :  { %v4150_v16 = vpop.f32.mrb[1].mxu1 }
 0x340   :  { %v4151_v47 = vadd.f32 %v4150_v16, %v4149_v24  ;;  %5378 = vmatpush3.bf16.msra.mxu1 %v5377_v31  ;;  %v5389_v16 = vpack.c.bf16 %v8187_v35, %v8177_v20  ;;  %v5391_v24 = vpack.c.bf16 %v8191_v15, %v8189_v25  ;;  %v5405_v31 = vpack.c.bf16 %v8277_v13, %v8263_v2 }
 0x341   :  { %5380 = vmatprep.subr.bf16.mxu1 %v5379_v8 }
 0x342   :  { %v4569_v11 = vpop.f32.mrb[2].mxu0 }
 0x343   :  { %v4570_v33 = vpop.f32.mrb[3].mxu0 }
 0x344   :  { %5382 = vmatpush3.bf16.msra.mxu1 %v5381_v6  ;;  %v8492_v32 = vadd.f32 %v4570_v33, %v4569_v11  ;;  %v5393_v33 = vpack.c.bf16 %v8195_v41, %v8193_v9  ;;  %v5415_v6 = vpack.c.bf16 %v8442_v12, %v8423_v4  ;;  %v5417_v11 = vpack.c.bf16 %v8454_v19, %v8449_v29 }
 0x345   :  { %5384 = vmatprep.subr.bf16.mxu1 %v5383_v50 }
 0x348   :  { %5386 = vmatpush3.bf16.msra.mxu1 %v5385_v49  ;;  %v5397_v49 = vpack.c.bf16 %v8220_v3, %v8218_v51 }
 0x349   :  { %5388 = vmatprep.subr.bf16.mxu1 %v5387_v57 }
 0x34b   :  { %2676 = vmatmul.mubr.f32.vlgmr.msra.gmra.mrb[14].mxu1 %v8087_v44 }
 0x34c   :  { %5390 = vmatpush3.bf16.msra.mxu1 %v5389_v16  ;;  %2811 = vmatprep.mubr.f32.mxu1 %v8065_v39  ;;  %v9961_v16 = vand.u32 4294901760, %v8065_v39 }
 0x34d   :  { %5392 = vmatprep.subr.bf16.mxu1 %v5391_v24  ;;  %v9963_v24 = vld [vmem:[#allocation75_spill] sm:$0xff] }
 0x350   :  { %5394 = vmatpush3.bf16.msra.mxu1 %v5393_v33  ;;  %v9964_v33 = vld [vmem:[#allocation77_spill] sm:$0xff] }
 0x351   :  { %5396 = vmatprep.subr.bf16.mxu1 %v5395_v60  ;;  %v9965_v60 = vld [vmem:[#allocation81_spill] sm:$0xff] }
 0x354   :  { %5398 = vmatpush3.bf16.msra.mxu1 %v5397_v49  ;;  %v9966_v49 = vld [vmem:[#allocation70_spill] sm:$0xff] }
 0x355   :  { %5400 = vmatprep.subr.bf16.mxu1 %v5399_v63  ;;  %v9967_v63 = vld [vmem:[#allocation56_spill] sm:$0xff] }
 0x358   :  { %5402 = vmatpush3.bf16.msra.mxu1 %v5401_v45  ;;  %v9968_v45 = vld [vmem:[#allocation2_spill] sm:$0xff] }
 0x359   :  { %5404 = vmatprep.subr.bf16.mxu1 %v5403_v23  ;;  %v9969_v23 = vld [vmem:[#allocation39_spill] sm:$0xff] }
 0x35c   :  { %5406 = vmatpush3.bf16.msra.mxu1 %v5405_v31 }
 0x35d   :  { %5408 = vmatprep.subr.bf16.mxu1 %v5407_v27 }
 0x35e   :  { %v4184_v58 = vpop.f32.mrb[2].mxu1 }
 0x35f   :  { %v4185_v8 = vpop.f32.mrb[3].mxu1 }
 0x360   :  { %v4186_v7 = vadd.f32 %v4185_v8, %v4184_v58  ;;  %5410 = vmatpush3.bf16.msra.mxu1 %v5409_v43  ;;  %v9970_v43 = vld [vmem:[#allocation7_spill] sm:$0xff] }
 0x361   :  { %5412 = vmatprep.subr.bf16.mxu1 %v5411_v22  ;;  %v9971_v22 = vld [vmem:[#allocation6_spill] sm:$0xff] }
 0x362   :  { %v1816_v54 = vadd.f32 %v4186_v7, %v4151_v47  ;;  %v9962_v47 = vld [vmem:[#allocation25_spill] sm:$0xff] }
 0x363   :  { %v4639_v46 = vpop.f32.mrb[4].mxu0 }
 0x364   :  { %v4640_v50 = vpop.f32.mrb[5].mxu0  ;;  %5414 = vmatpush3.bf16.msra.mxu1 %v5413_v59  ;;  %v9972_v59 = vld [vmem:[#allocation15_spill] sm:$0xff] }
 0x365   :  { %v8528_v57 = vadd.f32 %v4640_v50, %v4639_v46  ;;  %5416 = vmatprep.subr.bf16.mxu1 %v5415_v6  ;;  %v9973_v46 = vld [vmem:[#allocation11_spill] sm:$0xff]  ;;  %v9974_v50 = vand.u32 4294901760, %v8172_v26  ;;  %v9981_v26 = vld [vmem:[#allocation21_spill] sm:$0xff] }
 0x368   :  { %5418 = vmatpush3.bf16.msra.mxu1 %v5417_v11  ;;  %v9975_v11 = vand.u32 4294901760, %v8175_v40  ;;  %v9982_v40 = vand.u32 4294901760, %v8193_v9  ;;  %v9989_v9 = vand.u32 4294901760, %v8232_v10  ;;  %v9996_v10 = vand.u32 4294901760, %v8303_v61 }
 0x369   :  { %5420 = vmatprep.subr.bf16.mxu1 %v8092_v55  ;;  %v10002_v61 = vand.u32 4294901760, %v8377_v17  ;;  %v10010_v17 = vld [vmem:[#allocation20_spill] sm:$0xff] }
 0x36b   :  { %2814 = vmatmul.mubr.f32.vlgmr.msra.gmra.mrb[16].mxu1 %v8113_v30  ;;  %v9987_v30 = vand.u32 4294901760, %v8220_v3  ;;  %v9994_v3 = vand.u32 4294901760, %v8263_v2  ;;  %v10001_v2 = vand.u32 4294901760, %v8374_v38  ;;  %v10007_v38 = vand.u32 4294901760, %v8454_v19  ;;  %v10012_v19 = vld [vmem:[#allocation41_spill] sm:$0xff] }
 0x36c   :  { %5422 = vmatpush3.bf16.msra.mxu1 %v8116_v37  ;;  %2918 = vmatprep.mubr.f32.mxu1 %v9961_v16  ;;  %v5451_v16 = vpack.c.bf16 %v9975_v11, %v9974_v50  ;;  %v9983_v50 = vand.u32 4294901760, %v8195_v41  ;;  %v9985_v11 = vand.u32 4294901760, %v8216_v53  ;;  %v9990_v41 = vand.u32 4294901760, %v8234_v42 }
 0x36d   :  { %5424 = vmatprep.subr.bf16.mxu1 %v8119_v62  ;;  %v9992_v53 = vand.u32 4294901760, %v8256_v5  ;;  %v9997_v42 = vand.u32 4294901760, %v8309_v56  ;;  %v9999_v5 = vand.u32 4294901760, %v8345_v0  ;;  %v10003_v56 = vand.u32 4294901760, %v8418_v18 }
 0x36e   :  { %v10005_v0 = vand.u32 4294901760, %v8442_v12 }
 0x370   :  { %5426 = vmatpush3.bf16.msra.mxu1 %v9962_v47 }
 0x371   :  { %5428 = vmatprep.subr.bf16.mxu1 %v9963_v24 }
 0x374   :  { %5430 = vmatpush3.bf16.msra.mxu1 %v9964_v33 }
 0x375   :  { %5432 = vmatprep.subr.bf16.mxu1 %v9965_v60 }
 0x378   :  { %5434 = vmatpush3.bf16.msra.mxu1 %v9966_v49 }
 0x379   :  { %5436 = vmatprep.subr.bf16.mxu1 %v9967_v63 }
 0x37c   :  { %5438 = vmatpush3.bf16.msra.mxu1 %v9968_v45 }
 0x37d   :  { %5440 = vmatprep.subr.bf16.mxu1 %v9969_v23 }
 0x37e   :  { %v4219_v39 = vpop.f32.mrb[4].mxu1 }
 0x37f   :  { %v4220_v31 = vpop.f32.mrb[5].mxu1 }
 0x380   :  { %v4221_v27 = vadd.f32 %v4220_v31, %v4219_v39  ;;  %5442 = vmatpush3.bf16.msra.mxu1 %v9970_v43  ;;  %v9976_v39 = vand.u32 4294901760, %v8177_v20  ;;  %v9977_v31 = vand.u32 4294901760, %v8187_v35  ;;  %v5457_v20 = vpack.c.bf16 %v9983_v50, %v9982_v40 }
 0x381   :  { %5444 = vmatprep.subr.bf16.mxu1 %v9971_v22  ;;  %v9984_v35 = vand.u32 4294901760, %v8210_v36  ;;  %v9991_v36 = vand.u32 4294901760, %v8249_v21  ;;  %v9998_v21 = vand.u32 4294901760, %v8333_v52  ;;  %v10004_v52 = vand.u32 4294901760, %v8423_v4 }
 0x382   :  { %v1954_v58 = vadd.f32 %v4221_v27, %v1816_v54  ;;  %v5453_v54 = vpack.c.bf16 %v9977_v31, %v9976_v39  ;;  %v9978_v27 = vand.u32 4294901760, %v8189_v25  ;;  %v10011_v4 = vand.u32 4294901760, %v10010_v17 }
 0x383   :  { %v4709_v8 = vpop.f32.mrb[6].mxu0  ;;  %v5459_v25 = vpack.c.bf16 %v9985_v11, %v9984_v35  ;;  %v5465_v31 = vpack.c.bf16 %v9991_v36, %v9990_v41  ;;  %v5477_v35 = vpack.c.bf16 %v10003_v56, %v10002_v61  ;;  %v5479_v11 = vpack.c.bf16 %v10005_v0, %v10004_v52  ;;  %v10032_v0 = vld [vmem:[#allocation85_spill] sm:$0xff] }
 0x384   :  { %v4710_v7 = vpop.f32.mrb[7].mxu0  ;;  %5446 = vmatpush3.bf16.msra.mxu1 %v9972_v59  ;;  %v3434_v12 = vsub.f32 %v10010_v17, %v10011_v4  ;;  %v10038_v4 = vld [vmem:[#allocation47_spill] sm:$0xff] }
 0x385   :  { %v8547_v6 = vadd.f32 %v4710_v7, %v4709_v8  ;;  %5448 = vmatprep.subr.bf16.mxu1 %v9973_v46  ;;  %v9979_v8 = vand.u32 4294901760, %v8191_v15  ;;  %v9986_v15 = vand.u32 4294901760, %v8218_v51  ;;  %v9993_v51 = vand.u32 4294901760, %v8261_v48 }
 0x386   :  { %v10000_v48 = vand.u32 4294901760, %v8347_v1  ;;  %v10006_v1 = vand.u32 4294901760, %v8449_v29 }
 0x387   :  { %v5455_v7 = vpack.c.bf16 %v9979_v8, %v9978_v27  ;;  %v5471_v8 = vpack.c.bf16 %v9997_v42, %v9996_v10  ;;  %v10026_v10 = vld [vmem:[#allocation28_spill] sm:$0xff] }
 0x388   :  { %5450 = vmatpush3.bf16.msra.mxu1 %v8362_v28  ;;  %v5475_v40 = vpack.c.bf16 %v10001_v2, %v10000_v48  ;;  %v10027_v42 = vand.u32 4294901760, %v10026_v10  ;;  %v10028_v48 = vld [vmem:[#allocation30_spill] sm:$0xff] }
 0x389   :  { %5452 = vmatprep.subr.bf16.mxu1 %v5451_v16  ;;  %v9988_v16 = vand.u32 4294901760, %v8222_v14  ;;  %v9995_v14 = vand.u32 4294901760, %v8277_v13  ;;  %v10029_v2 = vand.u32 4294901760, %v10028_v48 }
 0x38b   :  { %2922 = vmatmul.mubr.f32.vlgmr.msra.gmra.mrb[18].mxu1 %v9980_v34  ;;  %v5461_v34 = vpack.c.bf16 %v9987_v30, %v9986_v15  ;;  %v5463_v39 = vpack.c.bf16 %v9989_v9, %v9988_v16  ;;  %v5469_v27 = vpack.c.bf16 %v9995_v14, %v9994_v3  ;;  %v5481_v15 = vpack.c.bf16 %v10007_v38, %v10006_v1  ;;  %v10024_v3 = vld [vmem:[#allocation29_spill] sm:$0xff]  ;;  %v10034_v1 = vld [vmem:[#allocation80_spill] sm:$0xff] }
 0x38c   :  { %5454 = vmatpush3.bf16.msra.mxu1 %v5453_v54  ;;  %3088 = vmatprep.mubr.f32.mxu1 %v9981_v26  ;;  %v5467_v54 = vpack.c.bf16 %v9993_v51, %v9992_v53  ;;  %v10022_v53 = vld [vmem:[#allocation27_spill] sm:$0xff]  ;;  %v10025_v14 = vand.u32 4294901760, %v10024_v3  ;;  %v10035_v38 = vand.u32 4294901760, %v10034_v1 }
 0x38d   :  { %5456 = vmatprep.subr.bf16.mxu1 %v5455_v7  ;;  %v5473_v7 = vpack.c.bf16 %v9999_v5, %v9998_v21  ;;  %v10023_v51 = vand.u32 4294901760, %v10022_v53 }
 0x390   :  { %5458 = vmatpush3.bf16.msra.mxu1 %v5457_v20 }
 0x391   :  { %5460 = vmatprep.subr.bf16.mxu1 %v5459_v25 }
 0x394   :  { %5462 = vmatpush3.bf16.msra.mxu1 %v5461_v34  ;;  %v10018_v34 = vld [vmem:[#allocation87_spill] sm:$0xff] }
 0x395   :  { %5464 = vmatprep.subr.bf16.mxu1 %v5463_v39  ;;  %v10019_v16 = vand.u32 4294901760, %v10018_v34 }
 0x397   :  { %v3448_v9 = vsub.f32 %v10018_v34, %v10019_v16  ;;  %v10045_v34 = vld [vmem:[#allocation79_spill] sm:$0xff] }
 0x398   :  { %5466 = vmatpush3.bf16.msra.mxu1 %v5465_v31  ;;  %v10020_v31 = vld [vmem:[#allocation24_spill] sm:$0xff]  ;;  %v10046_v16 = vand.u32 4294901760, %v10045_v34 }
 0x399   :  { %5468 = vmatprep.subr.bf16.mxu1 %v5467_v54  ;;  %v3336_v54 = vsub.f32 %v10022_v53, %v10023_v51  ;;  %v3449_v5 = vand.u32 4294901760, %v3448_v9  ;;  %v10051_v51 = vld [vmem:[#allocation4_spill] sm:$0xff] }
 0x39a   :  { %v3371_v9 = vsub.f32 %v10045_v34, %v10046_v16 }
 0x39b   :  { %v3337_v56 = vand.u32 4294901760, %v3336_v54  ;;  %v10052_v54 = vand.u32 4294901760, %v10051_v51 }
 0x39c   :  { %5470 = vmatpush3.bf16.msra.mxu1 %v5469_v27  ;;  %v3455_v27 = vsub.f32 %v10024_v3, %v10025_v14 }
 0x39d   :  { %5472 = vmatprep.subr.bf16.mxu1 %v5471_v8  ;;  %v3462_v8 = vsub.f32 %v10026_v10, %v10027_v42  ;;  %v3504_v3 = vsub.f32 %v10051_v51, %v10052_v54 }
 0x39e   :  { %v4254_v13 = vpop.f32.mrb[6].mxu1 }
 0x39f   :  { %v4255_v50 = vpop.f32.mrb[7].mxu1  ;;  %v3463_v52 = vand.u32 4294901760, %v3462_v8  ;;  %v10053_v8 = vld [vmem:[#allocation9_spill] sm:$0xff] }
 0x3a0   :  { %v4256_v20 = vadd.f32 %v4255_v50, %v4254_v13  ;;  %5474 = vmatpush3.bf16.msra.mxu1 %v5473_v7  ;;  %v10030_v13 = vld [vmem:[#allocation34_spill] sm:$0xff] }
 0x3a1   :  { %5476 = vmatprep.subr.bf16.mxu1 %v5475_v40  ;;  %v3343_v40 = vsub.f32 %v10028_v48, %v10029_v2  ;;  %v10031_v50 = vand.u32 4294901760, %v10030_v13  ;;  %v3372_v2 = vand.u32 4294901760, %v3371_v9 }
 0x3a2   :  { %v2062_v25 = vadd.f32 %v4256_v20, %v1954_v58  ;;  %v10016_v58 = vld [vmem:[#allocation82_spill] sm:$0xff] }
 0x3a3   :  { %v3350_v20 = vsub.f32 %v10030_v13, %v10031_v50  ;;  %v3505_v50 = vand.u32 4294901760, %v3504_v3 }
 0x3a4   :  { %5478 = vmatpush3.bf16.msra.mxu1 %v5477_v35  ;;  %v3456_v35 = vand.u32 4294901760, %v3455_v27 }
 0x3a5   :  { %5480 = vmatprep.subr.bf16.mxu1 %v5479_v11  ;;  %v10033_v11 = vand.u32 4294901760, %v10032_v0 }
 0x3a8   :  { %5482 = vmatpush3.bf16.msra.mxu1 %v5481_v15  ;;  %v3476_v15 = vsub.f32 %v10034_v1, %v10035_v38 }
 0x3a9   :  { %5484 = vmatprep.subr.bf16.mxu1 %v8092_v55  ;;  %v10008_v55 = vld [vmem:[#allocation19_spill] sm:$0xff] }
 0x3ab   :  { %3090 = vmatmul.mubr.f32.vlgmr.msra.gmra.mrb[20].mxu1 %v8087_v44 }
 0x3ac   :  { %5486 = vmatpush3.bf16.msra.mxu1 %v8116_v37  ;;  %3192 = vmatprep.mubr.f32.mxu1 %v9981_v26  ;;  %v10009_v37 = vand.u32 4294901760, %v10008_v55  ;;  %v10017_v26 = vand.u32 4294901760, %v10016_v58 }
 0x3ad   :  { %5488 = vmatprep.subr.bf16.mxu1 %v8119_v62 }
 0x3ae   :  { %v3427_v62 = vsub.f32 %v10008_v55, %v10009_v37  ;;  %v3441_v30 = vsub.f32 %v10016_v58, %v10017_v26  ;;  %v3344_v55 = vand.u32 4294901760, %v3343_v40  ;;  %v3351_v37 = vand.u32 4294901760, %v3350_v20 }
 0x3b0   :  { %5490 = vmatpush3.bf16.msra.mxu1 %v9962_v47  ;;  %v10013_v47 = vand.u32 4294901760, %v10012_v19  ;;  %v5557_v58 = vpack.c.bf16 %v3351_v37, %v3344_v55 }
 0x3b1   :  { %5492 = vmatprep.subr.bf16.mxu1 %v9963_v24 }
 0x3b2   :  { %v3315_v24 = vsub.f32 %v10012_v19, %v10013_v47  ;;  %v5555_v47 = vpack.c.bf16 %v3463_v52, %v3456_v35  ;;  %v10059_v52 = vld [vmem:[#allocation23_spill] sm:$0xff] }
 0x3b4   :  { %5494 = vmatpush3.bf16.msra.mxu1 %v9964_v33  ;;  %v10014_v33 = vld [vmem:[#allocation43_spill] sm:$0xff]  ;;  %v3316_v41 = vand.u32 4294901760, %v3315_v24 }
 0x3b5   :  { %5496 = vmatprep.subr.bf16.mxu1 %v9965_v60  ;;  %v10015_v60 = vand.u32 4294901760, %v10014_v33 }
 0x3b8   :  { %5498 = vmatpush3.bf16.msra.mxu1 %v9966_v49  ;;  %v3322_v49 = vsub.f32 %v10014_v33, %v10015_v60  ;;  %v3477_v33 = vand.u32 4294901760, %v3476_v15  ;;  %v10041_v60 = vld [vmem:[#allocation50_spill] sm:$0xff]  ;;  %v10061_v15 = vld [vmem:[#allocation48_spill] sm:$0xff] }
 0x3b9   :  { %5500 = vmatprep.subr.bf16.mxu1 %v9967_v63  ;;  %v10062_v55 = vand.u32 4294901760, %v10061_v15 }
 0x3ba   :  { %v3323_v36 = vand.u32 4294901760, %v3322_v49 }
 0x3bb   :  { %v3399_v37 = vsub.f32 %v10061_v15, %v10062_v55 }
 0x3bc   :  { %5502 = vmatpush3.bf16.msra.mxu1 %v9968_v45  ;;  %v3428_v45 = vand.u32 4294901760, %v3427_v62  ;;  %v5549_v7 = vpack.c.bf16 %v3323_v36, %v3316_v41  ;;  %v10036_v62 = vld [vmem:[#allocation64_spill] sm:$0xff] }
 0x3bd   :  { %5504 = vmatprep.subr.bf16.mxu1 %v9969_v23  ;;  %v3435_v23 = vand.u32 4294901760, %v3434_v12  ;;  %v10039_v12 = vand.u32 4294901760, %v10038_v4  ;;  %v10047_v41 = vld [vmem:[#allocation84_spill] sm:$0xff] }
 0x3be   :  { %v4289_v18 = vpop.f32.mrb[8].mxu1  ;;  %v10048_v36 = vand.u32 4294901760, %v10047_v41 }
 0x3bf   :  { %v4290_v29 = vpop.f32.mrb[9].mxu1  ;;  %v5547_v21 = vpack.c.bf16 %v3435_v23, %v3428_v45 }
 0x3c0   :  { %v4291_v63 = vadd.f32 %v4290_v29, %v4289_v18  ;;  %5506 = vmatpush3.bf16.msra.mxu1 %v9970_v43  ;;  %v10021_v43 = vand.u32 4294901760, %v10020_v31  ;;  %v3364_v18 = vsub.f32 %v10038_v4, %v10039_v12  ;;  %v10040_v29 = vld [vmem:[#allocation78_spill] sm:$0xff] }
 0x3c1   :  { %5508 = vmatprep.subr.bf16.mxu1 %v9971_v22 }
 0x3c2   :  { %v8651_v39 = vadd.f32 %v4291_v63, %v2062_v25  ;;  %v3329_v22 = vsub.f32 %v10020_v31, %v10021_v43  ;;  %v3469_v25 = vsub.f32 %v10032_v0, %v10033_v11  ;;  %v10043_v63 = vld [vmem:[#allocation52_spill] sm:$0xff]  ;;  %v3378_v31 = vsub.f32 %v10047_v41, %v10048_v36  ;;  %v10049_v43 = vld [vmem:[#allocation3_spill] sm:$0xff] }
 0x3c3   :  { %v10044_v45 = vand.u32 4294901760, %v10043_v63 }
 0x3c4   :  { %5510 = vmatpush3.bf16.msra.mxu1 %v9972_v59  ;;  %v3442_v59 = vand.u32 4294901760, %v3441_v30  ;;  %v3330_v61 = vand.u32 4294901760, %v3329_v22  ;;  %v3470_v24 = vand.u32 4294901760, %v3469_v25  ;;  %v3365_v30 = vand.u32 4294901760, %v3364_v18  ;;  %v10065_v18 = vld [vmem:[#allocation57_spill] sm:$0xff] }
 0x3c5   :  { %5512 = vmatprep.subr.bf16.mxu1 %v9973_v46  ;;  %v3490_v23 = vsub.f32 %v10043_v63, %v10044_v45  ;;  %v10050_v22 = vand.u32 4294901760, %v10049_v43  ;;  %v3379_v40 = vand.u32 4294901760, %v3378_v31  ;;  %v10069_v45 = vld [vmem:[#allocation68_spill] sm:$0xff] }
 0x3c6   :  { %v5551_v46 = vpack.c.bf16 %v3449_v5, %v3442_v59  ;;  %v5553_v19 = vpack.c.bf16 %v3337_v56, %v3330_v61  ;;  %v5559_v14 = vpack.c.bf16 %v3477_v33, %v3470_v24  ;;  %v10055_v5 = vld [vmem:[#allocation10_spill] sm:$0xff]  ;;  %v10067_v24 = vld [vmem:[#allocation60_spill] sm:$0xff] }
 0x3c7   :  { %v3497_v53 = vsub.f32 %v10049_v43, %v10050_v22  ;;  %v3491_v10 = vand.u32 4294901760, %v3490_v23  ;;  %v10057_v61 = vld [vmem:[#allocation22_spill] sm:$0xff]  ;;  %v5565_v1 = vpack.c.bf16 %v3379_v40, %v3372_v2  ;;  %v10068_v33 = vand.u32 4294901760, %v10067_v24  ;;  %v10084_v40 = vld [vmem:[#allocation49_spill] sm:$0xff] }
 0x3c8   :  { %5514 = vmatpush3.bf16.msra.mxu1 %v8362_v28  ;;  %v10037_v28 = vand.u32 4294901760, %v10036_v62  ;;  %v10058_v56 = vand.u32 4294901760, %v10057_v61  ;;  %v10070_v23 = vand.u32 4294901760, %v10069_v45  ;;  %v10083_v2 = vld [vmem:[#allocation74_spill] sm:$0xff] }
 0x3c9   :  { %5548 = vmatprep.subr.bf16.mxu1 %v5547_v21  ;;  %v10054_v21 = vand.u32 4294901760, %v10053_v8  ;;  %v3498_v13 = vand.u32 4294901760, %v3497_v53 }
 0x3ca   :  { %v3357_v17 = vsub.f32 %v10036_v62, %v10037_v28  ;;  %v3511_v35 = vsub.f32 %v10057_v61, %v10058_v56  ;;  %v10063_v62 = vld [vmem:[#allocation51_spill] sm:$0xff] }
 0x3cb   :  { %3194 = vmatmul.mubr.f32.vlgmr.msra.gmra.mrb[22].mxu1 %v8087_v44  ;;  %v10042_v44 = vand.u32 4294901760, %v10041_v60  ;;  %v3385_v59 = vsub.f32 %v10053_v8, %v10054_v21  ;;  %v5567_v38 = vpack.c.bf16 %v3505_v50, %v3498_v13  ;;  %v10064_v28 = vand.u32 4294901760, %v10063_v62  ;;  %v10076_v8 = vld [vmem:[#allocation44_spill] sm:$0xff]  ;;  %v10086_v50 = vld [vmem:[#allocation71_spill] sm:$0xff] }
 0x3cc   :  { %5550 = vmatpush3.bf16.msra.mxu1 %v5549_v7  ;;  %3536 = vmatprep.mubr.f32.mxu1 %v10040_v29  ;;  %v3358_v26 = vand.u32 4294901760, %v3357_v17  ;;  %v10056_v7 = vand.u32 4294901760, %v10055_v5  ;;  %v3512_v4 = vand.u32 4294901760, %v3511_v35  ;;  %v10077_v21 = vand.u32 4294901760, %v10076_v8  ;;  %v10085_v13 = vld [vmem:[#allocation76_spill] sm:$0xff] }
 0x3cd   :  { %5552 = vmatprep.subr.bf16.mxu1 %v5551_v46  ;;  %v3483_v49 = vsub.f32 %v10041_v60, %v10042_v44  ;;  %v10060_v46 = vand.u32 4294901760, %v10059_v52  ;;  %v3386_v11 = vand.u32 4294901760, %v3385_v59  ;;  %v3406_v17 = vsub.f32 %v10063_v62, %v10064_v28  ;;  %v10078_v59 = vld [vmem:[#allocation36_spill] sm:$0xff] }
 0x3ce   :  { %v5561_v42 = vpack.c.bf16 %v3365_v30, %v3358_v26  ;;  %v3392_v48 = vsub.f32 %v10055_v5, %v10056_v7  ;;  %v3532_v60 = vsub.f32 %v10067_v24, %v10068_v33  ;;  %v10071_v26 = vld [vmem:[#allocation72_spill] sm:$0xff]  ;;  %v10079_v5 = vld [vmem:[#allocation58_spill] sm:$0xff] }
 0x3cf   :  { %v3484_v27 = vand.u32 4294901760, %v3483_v49  ;;  %v3518_v0 = vsub.f32 %v10059_v52, %v10060_v46  ;;  %v3400_v49 = vand.u32 4294901760, %v3399_v37  ;;  %v3407_v63 = vand.u32 4294901760, %v3406_v17  ;;  %v10080_v7 = vld [vmem:[#allocation62_spill] sm:$0xff]  ;;  %v10087_v35 = vld [vmem:[#allocation8_spill] sm:$0xff]  ;;  %v10088_v52 = vld [vmem:[#allocation17_spill] sm:$0xff] }
 0x3d0   :  { %5554 = vmatpush3.bf16.msra.mxu1 %v5553_v19  ;;  %v3393_v25 = vand.u32 4294901760, %v3392_v48  ;;  %v10066_v19 = vand.u32 4294901760, %v10065_v18  ;;  %v10072_v30 = vand.u32 4294901760, %v10071_v26  ;;  %v3533_v41 = vand.u32 4294901760, %v3532_v60  ;;  %v10082_v48 = vld [vmem:[#allocation65_spill] sm:$0xff] }
 0x3d1   :  { %5556 = vmatprep.subr.bf16.mxu1 %v5555_v47  ;;  %v5563_v20 = vpack.c.bf16 %v3491_v10, %v3484_v27  ;;  %v3519_v12 = vand.u32 4294901760, %v3518_v0  ;;  %v5573_v22 = vpack.c.bf16 %v3407_v63, %v3400_v49  ;;  %v10073_v27 = vld [vmem:[#allocation32_spill] sm:$0xff]  ;;  %v10074_v10 = vld [vmem:[#allocation38_spill] sm:$0xff]  ;;  %v10089_v0 = vld [vmem:[#allocation45_spill] sm:$0xff] }
 0x3d2   :  { %v3525_v47 = vsub.f32 %v10065_v18, %v10066_v19  ;;  %v5569_v44 = vpack.c.bf16 %v3393_v25, %v3386_v11  ;;  %v3420_v34 = vsub.f32 %v10071_v26, %v10072_v30  ;;  %v10090_v11 = vld [vmem:[#allocation54_spill] sm:$0xff]  ;;  %v10091_v25 = vld [vmem:[#allocation63_spill] sm:$0xff] }
 0x3d3   :  { %v5571_v16 = vpack.c.bf16 %v3519_v12, %v3512_v4 }
 0x3d4   :  { %5558 = vmatpush3.bf16.msra.mxu1 %v5557_v58  ;;  %v3413_v58 = vsub.f32 %v10069_v45, %v10070_v23  ;;  %v3526_v9 = vand.u32 4294901760, %v3525_v47  ;;  %v3421_v51 = vand.u32 4294901760, %v3420_v34 }
 0x3d5   :  { %5560 = vmatprep.subr.bf16.mxu1 %v5559_v14 }
 0x3d6   :  { %v3414_v53 = vand.u32 4294901760, %v3413_v58  ;;  %v5575_v54 = vpack.c.bf16 %v3533_v41, %v3526_v9 }
 0x3d8   :  { %5562 = vmatpush3.bf16.msra.mxu1 %v5561_v42  ;;  %v5577_v14 = vpack.c.bf16 %v3421_v51, %v3414_v53  ;;  %v10075_v42 = vld [vmem:[#allocation37_spill] sm:$0xff] }
 0x3d9   :  { %5564 = vmatprep.subr.bf16.mxu1 %v5563_v20 }
 0x3dc   :  { %5566 = vmatpush3.bf16.msra.mxu1 %v5565_v1  ;;  %v10092_v1 = vld [vmem:[#allocation55_spill] sm:$0xff] }
 0x3dd   :  { %5568 = vmatprep.subr.bf16.mxu1 %v5567_v38  ;;  %v10093_v38 = vand.u32 4294901760, %v10092_v1 }
 0x3de   :  { %v4324_v36 = vpop.f32.mrb[10].mxu1 }
 0x3df   :  { %v4325_v31 = vpop.f32.mrb[11].mxu1 }
 0x3e0   :  { %v4326_v43 = vadd.f32 %v4325_v31, %v4324_v36  ;;  %5570 = vmatpush3.bf16.msra.mxu1 %v5569_v44 }
 0x3e1   :  { %5572 = vmatprep.subr.bf16.mxu1 %v5571_v16 }
 0x3e2   :  { %v2334_v3 = vadd.f32 %v4326_v43, %v8651_v39  ;;  %v10081_v39 = vld [vmem:[#allocation61_spill] sm:$0xff] }
 0x3e4   :  { %5574 = vmatpush3.bf16.msra.mxu1 %v5573_v22 }
 0x3e5   :  { %5576 = vmatprep.subr.bf16.mxu1 %v5575_v54 }
 0x3e8   :  { %5578 = vmatpush3.bf16.msra.mxu1 %v5577_v14 }
 0x3e9   :  { %5612 = vmatprep.subr.bf16.mxu1 %v10073_v27 }
 0x3eb   :  { %3538 = vmatmul.mubr.f32.vlgmr.msra.gmra.mrb[24].mxu1 %v10074_v10 }
 0x3ec   :  { %5614 = vmatpush3.bf16.msra.mxu1 %v10075_v42  ;;  %3780 = vmatprep.mubr.f32.mxu1 %v10077_v21 }
 0x3ed   :  { %5616 = vmatprep.subr.bf16.mxu1 %v10078_v59 }
 0x3f0   :  { %5618 = vmatpush3.bf16.msra.mxu1 %v10079_v5 }
 0x3f1   :  { %5620 = vmatprep.subr.bf16.mxu1 %v10080_v7 }
 0x3f4   :  { %5622 = vmatpush3.bf16.msra.mxu1 %v10081_v39 }
 0x3f5   :  { %5624 = vmatprep.subr.bf16.mxu1 %v10082_v48 }
 0x3f8   :  { %5626 = vmatpush3.bf16.msra.mxu1 %v10083_v2 }
 0x3f9   :  { %5628 = vmatprep.subr.bf16.mxu1 %v10084_v40 }
 0x3fc   :  { %5630 = vmatpush3.bf16.msra.mxu1 %v10085_v13 }
 0x3fd   :  { %5632 = vmatprep.subr.bf16.mxu1 %v10086_v50 }
 0x3fe   :  { %v4359_v20 = vpop.f32.mrb[12].mxu1 }
 0x3ff   :  { %v4360_v61 = vpop.f32.mrb[13].mxu1 }
 0x400   :  { %v4361_v56 = vadd.f32 %v4360_v61, %v4359_v20  ;;  %5634 = vmatpush3.bf16.msra.mxu1 %v10087_v35 }
 0x401   :  { %5636 = vmatprep.subr.bf16.mxu1 %v10088_v52 }
 0x402   :  { %v2446_v46 = vadd.f32 %v4361_v56, %v2334_v3 }
 0x404   :  { %5638 = vmatpush3.bf16.msra.mxu1 %v10089_v0 }
 0x405   :  { %5640 = vmatprep.subr.bf16.mxu1 %v10090_v11 }
 0x408   :  { %5642 = vmatpush3.bf16.msra.mxu1 %v10091_v25 }
 0x409   :  { %5676 = vmatprep.subr.bf16.mxu1 %v10073_v27 }
 0x40b   :  { %3784 = vmatmul.mubr.f32.vlgmr.msra.gmra.mrb[26].mxu1 %v10093_v38  ;;  %v4061_v38 = vld [vmem:[%s8793_s2 + $0x300] sm:$0x1] }
 0x40c   :  { %5678 = vmatpush3.bf16.msra.mxu1 %v10075_v42  ;;  %4054 = vmatprep.mubr.f32.mxu1 %v10040_v29 }
 0x40d   :  { %5680 = vmatprep.subr.bf16.mxu1 %v10078_v59 }
 0x410   :  { %5682 = vmatpush3.bf16.msra.mxu1 %v10079_v5 }
 0x411   :  { %5684 = vmatprep.subr.bf16.mxu1 %v10080_v7 }
 0x414   :  { %5686 = vmatpush3.bf16.msra.mxu1 %v10081_v39 }
 0x415   :  { %5688 = vmatprep.subr.bf16.mxu1 %v10082_v48 }
 0x418   :  { %5690 = vmatpush3.bf16.msra.mxu1 %v10083_v2 }
 0x419   :  { %5692 = vmatprep.subr.bf16.mxu1 %v10084_v40 }
 0x41c   :  { %5694 = vmatpush3.bf16.msra.mxu1 %v10085_v13 }
 0x41d   :  { %5696 = vmatprep.subr.bf16.mxu1 %v10086_v50 }
 0x41e   :  { %v4394_v15 = vpop.f32.mrb[14].mxu1 }
 0x41f   :  { %v4395_v29 = vpop.f32.mrb[15].mxu1 }
 0x420   :  { %v4396_v55 = vadd.f32 %v4395_v29, %v4394_v15  ;;  %5698 = vmatpush3.bf16.msra.mxu1 %v10087_v35 }
 0x421   :  { %5700 = vmatprep.subr.bf16.mxu1 %v10088_v52 }
 0x422   :  { %v2678_v37 = vadd.f32 %v4396_v55, %v2446_v46 }
 0x424   :  { %5702 = vmatpush3.bf16.msra.mxu1 %v10089_v0 }
 0x425   :  { %5704 = vmatprep.subr.bf16.mxu1 %v10090_v11 }
 0x428   :  { %5706 = vmatpush3.bf16.msra.mxu1 %v10091_v25  ;;  %v4101_v25 = vlaneseq }
 0x42a   :  { %v4102_v1 = vshrl.u32 %v4101_v25, 7 }
 0x42b   :  { %4056 = vmatmul.mubr.f32.vlgmr.msra.gmra.mrb[28].mxu1 %v10074_v10 }
 0x42c   :  { %v4103_v15 = vsub.s32 0, %v4102_v1 }
 0x43e   :  { %v4429_v62 = vpop.f32.mrb[16].mxu1 }
 0x43f   :  { %v4430_v28 = vpop.f32.mrb[17].mxu1 }
 0x440   :  { %v4431_v17 = vadd.f32 %v4430_v28, %v4429_v62  ;;  %v4116_v62 = vld [vmem:[%s8793_s2 + $0x301] ss:$0 sm:$0xff] }
 0x442   :  { %v2816_v4 = vadd.f32 %v4431_v17, %v2678_v37 }
 0x45e   :  { %v4464_v12 = vpop.f32.mrb[18].mxu1 }
 0x45f   :  { %v4465_v18 = vpop.f32.mrb[19].mxu1 }
 0x460   :  { %v4466_v19 = vadd.f32 %v4465_v18, %v4464_v12 }
 0x462   :  { %v2924_v47 = vadd.f32 %v4466_v19, %v2816_v4 }
 0x47e   :  { %v4499_v24 = vpop.f32.mrb[20].mxu1 }
 0x47f   :  { %v4500_v33 = vpop.f32.mrb[21].mxu1 }
 0x480   :  { %v4501_v60 = vadd.f32 %v4500_v33, %v4499_v24 }
 0x482   :  { %v3092_v44 = vadd.f32 %v4501_v60, %v2924_v47 }
 0x49e   :  { %v4534_v49 = vpop.f32.mrb[22].mxu1 }
 0x49f   :  { %v4535_v63 = vpop.f32.mrb[23].mxu1 }
 0x4a0   :  { %v4536_v45 = vadd.f32 %v4535_v63, %v4534_v49 }
 0x4a2   :  { %v3196_v23 = vadd.f32 %v4536_v45, %v3092_v44 }
 0x4a4   :  { %v3308_v58 = vadd.f32 %v8492_v32, %v3196_v23 }
 0x4be   :  { %v4604_v26 = vpop.f32.mrb[24].mxu1 }
 0x4bf   :  { %v4605_v30 = vpop.f32.mrb[25].mxu1 }
 0x4c0   :  { %v4606_v34 = vadd.f32 %v4605_v30, %v4604_v26 }
 0x4c2   :  { %v3540_v16 = vadd.f32 %v4606_v34, %v3308_v58 }
 0x4c4   :  { %v3678_v9 = vadd.f32 %v8528_v57, %v3540_v16 }
 0x4de   :  { %v4674_v41 = vpop.f32.mrb[26].mxu1 }
 0x4df   :  { %v4675_v36 = vpop.f32.mrb[27].mxu1 }
 0x4e0   :  { %v4676_v31 = vadd.f32 %v4675_v36, %v4674_v41 }
 0x4e2   :  { %v3786_v43 = vadd.f32 %v4676_v31, %v3678_v9 }
 0x4e4   :  { %v3954_v22 = vadd.f32 %v8547_v6, %v3786_v43 }
 0x4fe   :  { %v4744_v53 = vpop.f32.mrb[28].mxu1 }
 0x4ff   :  { %v4745_v51 = vpop.f32.mrb[29].mxu1 }
 0x500   :  { %v4746_v54 = vadd.f32 %v4745_v51, %v4744_v53 }
 0x502   :  { %v4058_v3 = vadd.f32 %v4746_v54, %v3954_v22 }
 0x504   :  { %4064 = vrot.lane.b32.xlu0 %v4058_v3, %s5722_s22 }
 0x576   :  { %v4065_v32 = vpop.permute.xlu0 %4064 }
 0x577   :  { %v4067_v14 = vadd.f32 %v4065_v32, %v4058_v3 }
 0x579   :  { %v4069_v27 = vsel %vm4068_vm0, %v4067_v14, 0.0 }
 0x57a   :  { %v4070_v10 = vrot.slane %v4069_v27, 4 }
 0x57c   :  { %v4071_v42 = vadd.f32 %v4070_v10, %v4069_v27 }
 0x57e   :  { %v4072_v57 = vrot.slane %v4071_v42, 2 }
 0x580   :  { %v4073_v8 = vadd.f32 %v4072_v57, %v4071_v42 }
 0x582   :  { %v4074_v21 = vrot.slane %v4073_v8, 1 }
 0x584   :  { %v4075_v59 = vadd.f32 %v4074_v21, %v4073_v8 }
 0x586   :  { %v4076_v5 = vmul.f32 0.125, %v4075_v59 }
 0x588   :  { %4079 = vrot.lane.b32.xlu0 %v4076_v5, %s5723_s23  ;;  %v4077_v48 = vsub.f32 %v4058_v3, %v4076_v5 }
 0x58a   :  { %v4083_v2 = vmul.f32 %v4077_v48, %v4077_v48 }
 0x5fa   :  { %v4080_v6 = vpop.permute.xlu0 %4079 }
 0x5fb   :  { %v4082_v7 = vsub.f32 %v4058_v3, %v4080_v6 }
 0x5fd   :  { %v4084_v39 = vmul.f32 %v4082_v7, %v4082_v7 }
 0x5ff   :  { %4086 = vrot.lane.b32.xlu1 %v4084_v39, %s5722_s22 }
 0x671   :  { %v4087_v40 = vpop.permute.xlu1 %4086 }
 0x672   :  { %v4089_v13 = vadd.f32 %v4087_v40, %v4083_v2 }
 0x674   :  { %v4090_v50 = vsel %vm4068_vm0, %v4089_v13, 0.0 }
 0x675   :  { %v4091_v20 = vrot.slane %v4090_v50, 4 }
 0x677   :  { %v4092_v61 = vadd.f32 %v4091_v20, %v4090_v50 }
 0x679   :  { %v4093_v56 = vrot.slane %v4092_v61, 2 }
 0x67b   :  { %v4094_v35 = vadd.f32 %v4093_v56, %v4092_v61 }
 0x67d   :  { %v4095_v52 = vrot.slane %v4094_v35, 1 }
 0x67f   :  { %v4096_v46 = vadd.f32 %v4095_v52, %v4094_v35 }
 0x681   :  { %v4097_v0 = vmul.f32 0.125, %v4096_v46 }
 0x683   :  { %v4098_v11 = vadd.f32 1e-05, %v4097_v0 }
 0x685   :  { %5720 = vrsqrt.f32 %v4098_v11 }
 0x68f   :  { %v5721_v29 = vpop.eup %5720 }
 0x690   :  { %v4100_v55 = vmul.f32 %v5721_v29, %v4061_v38 }
 0x692   :  { %v4104_v37 = vrot.slane %v4100_v55, %v4103_v15 }
 0x694   :  { %v4105_v28 = vmul.f32 %v4104_v37, %v4077_v48 }
 0x696   :  { %v4110_v17 = vadd.f32 %v4116_v62, %v4105_v28 }
 0x698   :  { %4111 = vst.msk [vmem:[%s8794_s3] sm:$0xf] %vm4068_vm0, %v4110_v17 }

</bundles_post_ra>
